<compile_context>
chip_gen: v6e
topology: v6e:2x2x1
jax: 0.10.0
libtpu: 0.0.40
codegen_flags: <defaults>
</compile_context>

<pallas_src>
import math

import jax
import jax.numpy as jnp
from jax.experimental import pallas as pl
from jax.experimental.pallas import tpu as pltpu

# ----- model hyper-parameters (small but TPU-tile friendly) -----
B, S, H = 2, 16, 128          # batch, seq length, hidden (= emb_size)
NH = 4                        # attention heads
DH = H // NH                  # per-head size
FFN = 256                     # feed-forward hidden
V = 512                       # vocab size
LAYERS = 2                    # encoder layers
MAX_SEQ = 32                  # max_seq_length (position table rows)
LN_EPS = 1e-6                 # UER LayerNorm eps (added to std)
M = B * S                     # batch folded into the matmul M dimension

MM_DTYPE = jnp.bfloat16       # MXU-native input dtype; accumulate in f32


# ---------------------------------------------------------------------------
# in-kernel helpers
# ---------------------------------------------------------------------------
def _mm(a, b):
    """a @ b with bf16 operands, f32 accumulation (MXU)."""
    return jnp.dot(a.astype(MM_DTYPE), b.astype(MM_DTYPE),
                   preferred_element_type=jnp.float32)


def _mm_t(a, b):
    """a @ b.T (contract last dims) -- no transpose materialized."""
    return jax.lax.dot_general(
        a.astype(MM_DTYPE), b.astype(MM_DTYPE),
        dimension_numbers=(((1,), (1,)), ((), ())),
        preferred_element_type=jnp.float32)


def _gelu(x):
    # TODO(synk): UER's gelu is erf-based; the tanh approximation is used here
    # so the transcendental rides the EUP tanh unit (~1e-3 numeric difference).
    c = math.sqrt(2.0 / math.pi)
    return 0.5 * x * (1.0 + jnp.tanh(c * (x + 0.044715 * x * x * x)))


def _layernorm(x, g, b):
    # UER LayerNorm: unbiased std, eps added to std, EXACT division.
    n = x.shape[-1]
    mean = jnp.mean(x, axis=-1, keepdims=True)
    xc = x - mean
    var = jnp.sum(xc * xc, axis=-1, keepdims=True) / (n - 1)
    std = jnp.sqrt(var)
    return g * xc / (std + LN_EPS) + b


# ---------------------------------------------------------------------------
# fused kernel: embedding LN + full encoder + MLM head + loss-stat reduction.
# No grid: one invocation, whole (tiny) arrays resident in VMEM.
# ---------------------------------------------------------------------------
def _fused_kernel(emb_ref, mask_ref, tgt_ref,
                  embg_ref, embb_ref,
                  wqkv_ref, bqkv_ref, wo_ref, bo_ref,
                  ln1g_ref, ln1b_ref, w1_ref, b1_ref,
                  w2_ref, b2_ref, ln2g_ref, ln2b_ref,
                  mlmw1_ref, mlmb1_ref, mlmlng_ref, mlmlnb_ref,
                  wembt_ref, mlmb2_ref,
                  hid_ref, stats_ref):
    # ---- embedding LayerNorm (word + pos + seg summed in JAX glue) ----
    x = _layernorm(emb_ref[...], embg_ref[...], embb_ref[...])     # (M, H)
    scale = 1.0 / math.sqrt(DH)

    # additive key mask replicated for every (batch, head): (B*NH*S, S)
    big_mask = jnp.concatenate(
        [jnp.broadcast_to(mask_ref[b], (NH * S, S)) for b in range(B)], axis=0)

    for l in range(LAYERS):                                        # unrolled
        # ---- fused QKV projection: one lane-dense (H, 3H) matmul ----
        qkv = _mm(x, wqkv_ref[l]) + bqkv_ref[l]                    # (M, 3H)
        q = qkv[:, 0:H]
        k = qkv[:, H:2 * H]
        v = qkv[:, 2 * H:3 * H]

        # ---- score tiles for every (batch, head), stacked along sublanes ----
        sc = []
        for b in range(B):
            qb = q[b * S:(b + 1) * S]
            kb = k[b * S:(b + 1) * S]
            for h in range(NH):
                sc.append(_mm_t(qb[:, h * DH:(h + 1) * DH],
                                kb[:, h * DH:(h + 1) * DH]))       # (S, S)
        scores = jnp.concatenate(sc, axis=0) * scale + big_mask    # (B*NH*S, S)

        # ---- ONE batched softmax chain for all batch*head tiles ----
        mmax = jnp.max(scores, axis=-1, keepdims=True)
        e = jnp.exp(scores - mmax)
        p = e * pl.reciprocal(jnp.sum(e, axis=-1, keepdims=True), approx=True)

        # ---- contexts: concat heads along lanes, batches along sublanes ----
        ctx_rows = []
        for b in range(B):
            vb = v[b * S:(b + 1) * S]
            heads = []
            for h in range(NH):
                pbh = p[(b * NH + h) * S:(b * NH + h + 1) * S]     # (S, S)
                heads.append(_mm(pbh, vb[:, h * DH:(h + 1) * DH]))  # (S, DH)
            ctx_rows.append(jnp.concatenate(heads, axis=1))        # (S, H)
        ctx = jnp.concatenate(ctx_rows, axis=0)                    # (M, H)

        # ---- single full-depth output projection + residual + LN1 ----
        attn = _mm(ctx, wo_ref[l]) + bo_ref[l]
        x = _layernorm(attn + x, ln1g_ref[l], ln1b_ref[l])

        # ---- feed forward + residual + LN2 ----
        ff = _gelu(_mm(x, w1_ref[l]) + b1_ref[l])
        ff = _mm(ff, w2_ref[l]) + b2_ref[l]
        x = _layernorm(ff + x, ln2g_ref[l], ln2b_ref[l])

    hid_ref[...] = x.astype(hid_ref.dtype)

    # ---- MLM head (dense+gelu, LN, tied-weight vocab projection) ----
    h1 = _gelu(_mm(x, mlmw1_ref[...]) + mlmb1_ref[...])
    h1 = _layernorm(h1, mlmlng_ref[...], mlmlnb_ref[...])
    logits = _mm(h1, wembt_ref[...]) + mlmb2_ref[...]              # (M, V)

    tgt = tgt_ref[...]                                             # (M, 1) i32
    mx = jnp.max(logits, axis=-1, keepdims=True)
    lse = jnp.log(jnp.sum(jnp.exp(logits - mx), axis=-1, keepdims=True)) + mx
    iota = jax.lax.broadcasted_iota(jnp.int32, logits.shape, 1)
    tgt_logit = jnp.sum(jnp.where(iota == tgt, logits, 0.0),
                        axis=-1, keepdims=True)
    # first-occurrence argmax via masked min over indices
    amax = jnp.min(jnp.where(logits == mx, iota, V),
                   axis=-1, keepdims=True)

    valid = (tgt > 0).astype(jnp.float32)                          # (M, 1)
    nll = (lse - tgt_logit) * valid
    corr = jnp.where(amax == tgt, 1.0, 0.0) * valid

    lane = jax.lax.broadcasted_iota(jnp.int32, stats_ref.shape, 1)
    stats_ref[...] = (jnp.where(lane == 0, jnp.sum(nll, keepdims=True), 0.0)
                      + jnp.where(lane == 1, jnp.sum(corr, keepdims=True), 0.0)
                      + jnp.where(lane == 2, jnp.sum(valid, keepdims=True), 0.0))


def run_model(emb, mask, tgt, wemb_t, p):
    return pl.pallas_call(
        _fused_kernel,
        out_shape=(jax.ShapeDtypeStruct((M, H), jnp.float32),    # hidden
                   jax.ShapeDtypeStruct((1, 128), jnp.float32)),  # stats row
    )(emb, mask, tgt,
      p["emb_ln_g"], p["emb_ln_b"],
      p["wqkv"], p["bqkv"], p["wo"], p["bo"],
      p["ln1_g"], p["ln1_b"], p["w1"], p["b1"],
      p["w2"], p["b2"], p["ln2_g"], p["ln2_b"],
      p["mlm_w1"], p["mlm_b1"], p["mlm_ln_g"], p["mlm_ln_b"],
      wemb_t, p["mlm_b2"])


# ---------------------------------------------------------------------------
# parameter init (deterministic, synthetic).  Per-layer weights are stacked
# with a leading LAYERS axis.  QKV weights are stored fused as (H, 3H) with
# column order [Q | K | V], head h occupying lanes h*DH:(h+1)*DH per block.
# ---------------------------------------------------------------------------
def init_params(key):
    kit = iter(jax.random.split(key, 64))

    def w(shape):
        return jax.random.normal(next(kit), shape, jnp.float32) * 0.02

    zeros = lambda s: jnp.zeros(s, jnp.float32)
    ones = lambda s: jnp.ones(s, jnp.float32)

    return dict(
        word_emb=w((V, H)),
        pos_emb=w((MAX_SEQ, H)),
        seg_emb=w((3, H)),
        emb_ln_g=ones((1, H)), emb_ln_b=zeros((1, H)),
        wqkv=w((LAYERS, H, 3 * H)), bqkv=zeros((LAYERS, 1, 3 * H)),
        wo=w((LAYERS, H, H)), bo=zeros((LAYERS, 1, H)),
        ln1_g=ones((LAYERS, 1, H)), ln1_b=zeros((LAYERS, 1, H)),
        w1=w((LAYERS, H, FFN)), b1=zeros((LAYERS, 1, FFN)),
        w2=w((LAYERS, FFN, H)), b2=zeros((LAYERS, 1, H)),
        ln2_g=ones((LAYERS, 1, H)), ln2_b=zeros((LAYERS, 1, H)),
        mlm_w1=w((H, H)), mlm_b1=zeros((1, H)),
        mlm_ln_g=ones((1, H)), mlm_ln_b=zeros((1, H)),
        mlm_b2=zeros((1, V)),              # mlm_linear_2 weight tied to word_emb
        nsp_w1=w((H, H)), nsp_b1=zeros((H,)),
        nsp_w2=w((H, 2)), nsp_b2=zeros((2,)),
    )


# ---------------------------------------------------------------------------
# forward: embedding -> encoder -> target   (== Model.forward(src, tgt, seg))
# ---------------------------------------------------------------------------
def model_forward(params, src, tgt_mlm, tgt_nsp, seg):
    Bb, Ss = src.shape
    # ---- embedding lookups (JAX gathers); sum fuses with the gathers ----
    word = params["word_emb"][src]                          # (B, S, H)
    pos = params["pos_emb"][:Ss][None, :, :]                # (1, S, H)
    sege = params["seg_emb"][seg]                           # (B, S, H)
    emb = (word + pos + sege).reshape(Bb * Ss, H)           # (M, H)
    mask = ((1.0 - (seg > 0).astype(jnp.float32)) * -10000.0)[:, None, :]
    tgt = tgt_mlm.reshape(Bb * Ss, 1).astype(jnp.int32)
    wemb_t = params["word_emb"].T                           # (H, V) tied weight

    # ---- one fused kernel: embedding LN + encoder + MLM head + stats ----
    hidden, stats = run_model(emb, mask, tgt, wemb_t, params)
    sum_nll, correct_mlm, count = stats[0, 0], stats[0, 1], stats[0, 2]
    denominator = count + 1e-6
    loss_mlm = sum_nll / denominator                        # same denom returned

    # ---- target: NSP (plain JAX -- 512-FLOP matmul, lane width 2) ----
    cls = hidden.reshape(Bb, Ss, H)[:, 0, :]                # (B, H)
    n1 = jnp.tanh(cls @ params["nsp_w1"] + params["nsp_b1"])
    nsp_logits = n1 @ params["nsp_w2"] + params["nsp_b2"]   # (B, 2)
    logp = jax.nn.log_softmax(nsp_logits, axis=-1)
    loss_nsp = -jnp.mean(jnp.take_along_axis(logp, tgt_nsp[:, None], axis=1))
    correct_nsp = jnp.sum((jnp.argmax(logp, axis=-1) == tgt_nsp)
                          .astype(jnp.float32))

    return loss_mlm, loss_nsp, correct_mlm, correct_nsp, denominator


if __name__ == "__main__":
    key = jax.random.PRNGKey(0)
    kp, k1, k2, k3, k4 = jax.random.split(key, 5)

    params = init_params(kp)

    src = jax.random.randint(k1, (B, S), 1, V, dtype=jnp.int32)
    # segment ids: first half segment 1, second half segment 2, last 2 padding
    seg = jnp.concatenate(
        [jnp.full((B, S // 2), 1, jnp.int32),
         jnp.full((B, S // 2 - 2), 2, jnp.int32),
         jnp.zeros((B, 2), jnp.int32)], axis=1)
    # masked-LM targets: nonzero at a few masked positions, 0 elsewhere
    mask_pos = jax.random.bernoulli(k2, 0.25, (B, S))
    tgt_mlm = jnp.where(mask_pos,
                        jax.random.randint(k3, (B, S), 1, V, dtype=jnp.int32),
                        jnp.zeros((B, S), jnp.int32))
    tgt_nsp = jax.random.randint(k4, (B,), 0, 2, dtype=jnp.int32)

    fwd = jax.jit(model_forward)
    out = fwd(params, src, tgt_mlm, tgt_nsp, seg)
    out = jax.block_until_ready(out)

    loss_mlm, loss_nsp, correct_mlm, correct_nsp, denominator = out
    assert all(bool(jnp.isfinite(x)) for x in
               (loss_mlm, loss_nsp, correct_mlm, correct_nsp, denominator))
    print("KERNEL_OK")
</pallas_src>

<mosaic_0001>
module attributes {stable_mosaic.version = 11 : i64} {
  func.func @_fused_kernel(%arg0: memref<32x128xf32, #tpu.memory_space<vmem>>, %arg1: memref<2x1x16xf32, #tpu.memory_space<vmem>>, %arg2: memref<32x1xi32, #tpu.memory_space<vmem>>, %arg3: memref<1x128xf32, #tpu.memory_space<vmem>>, %arg4: memref<1x128xf32, #tpu.memory_space<vmem>>, %arg5: memref<2x128x384xf32, #tpu.memory_space<vmem>>, %arg6: memref<2x1x384xf32, #tpu.memory_space<vmem>>, %arg7: memref<2x128x128xf32, #tpu.memory_space<vmem>>, %arg8: memref<2x1x128xf32, #tpu.memory_space<vmem>>, %arg9: memref<2x1x128xf32, #tpu.memory_space<vmem>>, %arg10: memref<2x1x128xf32, #tpu.memory_space<vmem>>, %arg11: memref<2x128x256xf32, #tpu.memory_space<vmem>>, %arg12: memref<2x1x256xf32, #tpu.memory_space<vmem>>, %arg13: memref<2x256x128xf32, #tpu.memory_space<vmem>>, %arg14: memref<2x1x128xf32, #tpu.memory_space<vmem>>, %arg15: memref<2x1x128xf32, #tpu.memory_space<vmem>>, %arg16: memref<2x1x128xf32, #tpu.memory_space<vmem>>, %arg17: memref<128x128xf32, #tpu.memory_space<vmem>>, %arg18: memref<1x128xf32, #tpu.memory_space<vmem>>, %arg19: memref<1x128xf32, #tpu.memory_space<vmem>>, %arg20: memref<1x128xf32, #tpu.memory_space<vmem>>, %arg21: memref<128x512xf32, #tpu.memory_space<vmem>>, %arg22: memref<1x512xf32, #tpu.memory_space<vmem>>, %arg23: memref<32x128xf32, #tpu.memory_space<vmem>>, %arg24: memref<1x128xf32, #tpu.memory_space<vmem>>) attributes {dimension_semantics = [], scalar_prefetch = 0 : i64, scratch_operands = 0 : i64, tpu.core_type = #tpu.core_type<tc>} {
    %c0 = arith.constant 0 : index
    %c0_0 = arith.constant 0 : index
    %0 = vector.load %arg0[%c0, %c0_0] : memref<32x128xf32, #tpu.memory_space<vmem>>, vector<32x128xf32>
    %c0_1 = arith.constant 0 : index
    %c0_2 = arith.constant 0 : index
    %1 = vector.load %arg3[%c0_1, %c0_2] : memref<1x128xf32, #tpu.memory_space<vmem>>, vector<1x128xf32>
    %c0_3 = arith.constant 0 : index
    %c0_4 = arith.constant 0 : index
    %2 = vector.load %arg4[%c0_3, %c0_4] : memref<1x128xf32, #tpu.memory_space<vmem>>, vector<1x128xf32>
    %cst = arith.constant dense<0.000000e+00> : vector<32xf32>
    %3 = vector.multi_reduction <add>, %0, %cst [1] : vector<32x128xf32> to vector<32xf32>
    %4 = vector.shape_cast %3 : vector<32xf32> to vector<32x1xf32>
    %cst_5 = arith.constant 1.280000e+02 : f32
    %5 = vector.broadcast %cst_5 : f32 to vector<32x1xf32>
    %6 = arith.divf %4, %5 : vector<32x1xf32>
    %7 = vector.broadcast %6 : vector<32x1xf32> to vector<32x128xf32>
    %8 = arith.subf %0, %7 : vector<32x128xf32>
    %9 = arith.mulf %8, %8 : vector<32x128xf32>
    %cst_6 = arith.constant dense<0.000000e+00> : vector<32xf32>
    %10 = vector.multi_reduction <add>, %9, %cst_6 [1] : vector<32x128xf32> to vector<32xf32>
    %11 = vector.shape_cast %10 : vector<32xf32> to vector<32x1xf32>
    %cst_7 = arith.constant 1.270000e+02 : f32
    %12 = vector.broadcast %cst_7 : f32 to vector<32x1xf32>
    %13 = arith.divf %11, %12 : vector<32x1xf32>
    %14 = math.sqrt %13 : vector<32x1xf32>
    %15 = vector.broadcast %1 : vector<1x128xf32> to vector<32x128xf32>
    %16 = arith.mulf %15, %8 : vector<32x128xf32>
    %cst_8 = arith.constant 9.99999997E-7 : f32
    %17 = vector.broadcast %cst_8 : f32 to vector<32x1xf32>
    %18 = arith.addf %14, %17 : vector<32x1xf32>
    %19 = vector.broadcast %18 : vector<32x1xf32> to vector<32x128xf32>
    %20 = arith.divf %16, %19 : vector<32x128xf32>
    %21 = vector.broadcast %2 : vector<1x128xf32> to vector<32x128xf32>
    %22 = arith.addf %20, %21 : vector<32x128xf32>
    %c0_9 = arith.constant 0 : index
    %c0_10 = arith.constant 0 : index
    %c0_11 = arith.constant 0 : index
    %23 = vector.load %arg1[%c0_9, %c0_10, %c0_11] : memref<2x1x16xf32, #tpu.memory_space<vmem>>, vector<1x1x16xf32>
    %24 = vector.shape_cast %23 : vector<1x1x16xf32> to vector<1x16xf32>
    %25 = vector.shape_cast %24 : vector<1x16xf32> to vector<1x16xf32>
    %26 = vector.broadcast %25 : vector<1x16xf32> to vector<64x16xf32>
    %c1 = arith.constant 1 : index
    %c0_12 = arith.constant 0 : index
    %c0_13 = arith.constant 0 : index
    %27 = vector.load %arg1[%c1, %c0_12, %c0_13] : memref<2x1x16xf32, #tpu.memory_space<vmem>>, vector<1x1x16xf32>
    %28 = vector.shape_cast %27 : vector<1x1x16xf32> to vector<1x16xf32>
    %29 = vector.shape_cast %28 : vector<1x16xf32> to vector<1x16xf32>
    %30 = vector.broadcast %29 : vector<1x16xf32> to vector<64x16xf32>
    %31 = tpu.concatenate %26, %30 in 0 : vector<64x16xf32>, vector<64x16xf32> -> vector<128x16xf32>
    %c0_14 = arith.constant 0 : index
    %c0_15 = arith.constant 0 : index
    %c0_16 = arith.constant 0 : index
    %32 = vector.load %arg5[%c0_14, %c0_15, %c0_16] : memref<2x128x384xf32, #tpu.memory_space<vmem>>, vector<1x128x384xf32>
    %33 = vector.shape_cast %32 : vector<1x128x384xf32> to vector<128x384xf32>
    %34 = arith.truncf %22 : vector<32x128xf32> to vector<32x128xbf16>
    %35 = arith.truncf %33 : vector<128x384xf32> to vector<128x384xbf16>
    %cst_17 = arith.constant dense<0.000000e+00> : vector<32x384xf32>
    %36 = tpu.matmul %34, %35, %cst_17 {dimension_numbers = #tpu.dot_dimension_numbers<[1], [0], [0], [1], [0, 0, 1, 1], [], []>} : vector<32x128xbf16>, vector<128x384xbf16>, vector<32x384xf32> -> vector<32x384xf32>
    %c0_18 = arith.constant 0 : index
    %c0_19 = arith.constant 0 : index
    %c0_20 = arith.constant 0 : index
    %37 = vector.load %arg6[%c0_18, %c0_19, %c0_20] : memref<2x1x384xf32, #tpu.memory_space<vmem>>, vector<1x1x384xf32>
    %38 = vector.shape_cast %37 : vector<1x1x384xf32> to vector<1x384xf32>
    %39 = vector.broadcast %38 : vector<1x384xf32> to vector<32x384xf32>
    %40 = arith.addf %36, %39 : vector<32x384xf32>
    %41 = vector.extract_strided_slice %40 {offsets = [0, 0], sizes = [32, 128], strides = [1, 1]} : vector<32x384xf32> to vector<32x128xf32>
    %42 = vector.extract_strided_slice %40 {offsets = [0, 128], sizes = [32, 128], strides = [1, 1]} : vector<32x384xf32> to vector<32x128xf32>
    %43 = vector.extract_strided_slice %40 {offsets = [0, 256], sizes = [32, 128], strides = [1, 1]} : vector<32x384xf32> to vector<32x128xf32>
    %44 = vector.extract_strided_slice %41 {offsets = [0, 0], sizes = [16, 128], strides = [1, 1]} : vector<32x128xf32> to vector<16x128xf32>
    %45 = vector.extract_strided_slice %42 {offsets = [0, 0], sizes = [16, 128], strides = [1, 1]} : vector<32x128xf32> to vector<16x128xf32>
    %46 = vector.extract_strided_slice %44 {offsets = [0, 0], sizes = [16, 32], strides = [1, 1]} : vector<16x128xf32> to vector<16x32xf32>
    %47 = vector.extract_strided_slice %45 {offsets = [0, 0], sizes = [16, 32], strides = [1, 1]} : vector<16x128xf32> to vector<16x32xf32>
    %48 = arith.truncf %46 : vector<16x32xf32> to vector<16x32xbf16>
    %49 = arith.truncf %47 : vector<16x32xf32> to vector<16x32xbf16>
    %cst_21 = arith.constant dense<0.000000e+00> : vector<16x16xf32>
    %50 = tpu.matmul %48, %49, %cst_21 {dimension_numbers = #tpu.dot_dimension_numbers<[1], [1], [0], [0], [0, 0, 1, 0], [], []>} : vector<16x32xbf16>, vector<16x32xbf16>, vector<16x16xf32> -> vector<16x16xf32>
    %51 = vector.extract_strided_slice %44 {offsets = [0, 32], sizes = [16, 32], strides = [1, 1]} : vector<16x128xf32> to vector<16x32xf32>
    %52 = vector.extract_strided_slice %45 {offsets = [0, 32], sizes = [16, 32], strides = [1, 1]} : vector<16x128xf32> to vector<16x32xf32>
    %53 = arith.truncf %51 : vector<16x32xf32> to vector<16x32xbf16>
    %54 = arith.truncf %52 : vector<16x32xf32> to vector<16x32xbf16>
    %cst_22 = arith.constant dense<0.000000e+00> : vector<16x16xf32>
    %55 = tpu.matmul %53, %54, %cst_22 {dimension_numbers = #tpu.dot_dimension_numbers<[1], [1], [0], [0], [0, 0, 1, 0], [], []>} : vector<16x32xbf16>, vector<16x32xbf16>, vector<16x16xf32> -> vector<16x16xf32>
    %56 = vector.extract_strided_slice %44 {offsets = [0, 64], sizes = [16, 32], strides = [1, 1]} : vector<16x128xf32> to vector<16x32xf32>
    %57 = vector.extract_strided_slice %45 {offsets = [0, 64], sizes = [16, 32], strides = [1, 1]} : vector<16x128xf32> to vector<16x32xf32>
    %58 = arith.truncf %56 : vector<16x32xf32> to vector<16x32xbf16>
    %59 = arith.truncf %57 : vector<16x32xf32> to vector<16x32xbf16>
    %cst_23 = arith.constant dense<0.000000e+00> : vector<16x16xf32>
    %60 = tpu.matmul %58, %59, %cst_23 {dimension_numbers = #tpu.dot_dimension_numbers<[1], [1], [0], [0], [0, 0, 1, 0], [], []>} : vector<16x32xbf16>, vector<16x32xbf16>, vector<16x16xf32> -> vector<16x16xf32>
    %61 = vector.extract_strided_slice %44 {offsets = [0, 96], sizes = [16, 32], strides = [1, 1]} : vector<16x128xf32> to vector<16x32xf32>
    %62 = vector.extract_strided_slice %45 {offsets = [0, 96], sizes = [16, 32], strides = [1, 1]} : vector<16x128xf32> to vector<16x32xf32>
    %63 = arith.truncf %61 : vector<16x32xf32> to vector<16x32xbf16>
    %64 = arith.truncf %62 : vector<16x32xf32> to vector<16x32xbf16>
    %cst_24 = arith.constant dense<0.000000e+00> : vector<16x16xf32>
    %65 = tpu.matmul %63, %64, %cst_24 {dimension_numbers = #tpu.dot_dimension_numbers<[1], [1], [0], [0], [0, 0, 1, 0], [], []>} : vector<16x32xbf16>, vector<16x32xbf16>, vector<16x16xf32> -> vector<16x16xf32>
    %66 = vector.extract_strided_slice %41 {offsets = [16, 0], sizes = [16, 128], strides = [1, 1]} : vector<32x128xf32> to vector<16x128xf32>
    %67 = vector.extract_strided_slice %42 {offsets = [16, 0], sizes = [16, 128], strides = [1, 1]} : vector<32x128xf32> to vector<16x128xf32>
    %68 = vector.extract_strided_slice %66 {offsets = [0, 0], sizes = [16, 32], strides = [1, 1]} : vector<16x128xf32> to vector<16x32xf32>
    %69 = vector.extract_strided_slice %67 {offsets = [0, 0], sizes = [16, 32], strides = [1, 1]} : vector<16x128xf32> to vector<16x32xf32>
    %70 = arith.truncf %68 : vector<16x32xf32> to vector<16x32xbf16>
    %71 = arith.truncf %69 : vector<16x32xf32> to vector<16x32xbf16>
    %cst_25 = arith.constant dense<0.000000e+00> : vector<16x16xf32>
    %72 = tpu.matmul %70, %71, %cst_25 {dimension_numbers = #tpu.dot_dimension_numbers<[1], [1], [0], [0], [0, 0, 1, 0], [], []>} : vector<16x32xbf16>, vector<16x32xbf16>, vector<16x16xf32> -> vector<16x16xf32>
    %73 = vector.extract_strided_slice %66 {offsets = [0, 32], sizes = [16, 32], strides = [1, 1]} : vector<16x128xf32> to vector<16x32xf32>
    %74 = vector.extract_strided_slice %67 {offsets = [0, 32], sizes = [16, 32], strides = [1, 1]} : vector<16x128xf32> to vector<16x32xf32>
    %75 = arith.truncf %73 : vector<16x32xf32> to vector<16x32xbf16>
    %76 = arith.truncf %74 : vector<16x32xf32> to vector<16x32xbf16>
    %cst_26 = arith.constant dense<0.000000e+00> : vector<16x16xf32>
    %77 = tpu.matmul %75, %76, %cst_26 {dimension_numbers = #tpu.dot_dimension_numbers<[1], [1], [0], [0], [0, 0, 1, 0], [], []>} : vector<16x32xbf16>, vector<16x32xbf16>, vector<16x16xf32> -> vector<16x16xf32>
    %78 = vector.extract_strided_slice %66 {offsets = [0, 64], sizes = [16, 32], strides = [1, 1]} : vector<16x128xf32> to vector<16x32xf32>
    %79 = vector.extract_strided_slice %67 {offsets = [0, 64], sizes = [16, 32], strides = [1, 1]} : vector<16x128xf32> to vector<16x32xf32>
    %80 = arith.truncf %78 : vector<16x32xf32> to vector<16x32xbf16>
    %81 = arith.truncf %79 : vector<16x32xf32> to vector<16x32xbf16>
    %cst_27 = arith.constant dense<0.000000e+00> : vector<16x16xf32>
    %82 = tpu.matmul %80, %81, %cst_27 {dimension_numbers = #tpu.dot_dimension_numbers<[1], [1], [0], [0], [0, 0, 1, 0], [], []>} : vector<16x32xbf16>, vector<16x32xbf16>, vector<16x16xf32> -> vector<16x16xf32>
    %83 = vector.extract_strided_slice %66 {offsets = [0, 96], sizes = [16, 32], strides = [1, 1]} : vector<16x128xf32> to vector<16x32xf32>
    %84 = vector.extract_strided_slice %67 {offsets = [0, 96], sizes = [16, 32], strides = [1, 1]} : vector<16x128xf32> to vector<16x32xf32>
    %85 = arith.truncf %83 : vector<16x32xf32> to vector<16x32xbf16>
    %86 = arith.truncf %84 : vector<16x32xf32> to vector<16x32xbf16>
    %cst_28 = arith.constant dense<0.000000e+00> : vector<16x16xf32>
    %87 = tpu.matmul %85, %86, %cst_28 {dimension_numbers = #tpu.dot_dimension_numbers<[1], [1], [0], [0], [0, 0, 1, 0], [], []>} : vector<16x32xbf16>, vector<16x32xbf16>, vector<16x16xf32> -> vector<16x16xf32>
    %88 = tpu.concatenate %50, %55, %60, %65, %72, %77, %82, %87 in 0 : vector<16x16xf32>, vector<16x16xf32>, vector<16x16xf32>, vector<16x16xf32>, vector<16x16xf32>, vector<16x16xf32>, vector<16x16xf32>, vector<16x16xf32> -> vector<128x16xf32>
    %cst_29 = arith.constant 0.176776692 : f32
    %89 = vector.broadcast %cst_29 : f32 to vector<128x16xf32>
    %90 = arith.mulf %88, %89 : vector<128x16xf32>
    %91 = arith.addf %90, %31 : vector<128x16xf32>
    %cst_30 = arith.constant dense<0xFF800000> : vector<128xf32>
    %92 = vector.multi_reduction <maximumf>, %91, %cst_30 [1] : vector<128x16xf32> to vector<128xf32>
    %93 = vector.shape_cast %92 : vector<128xf32> to vector<128x1xf32>
    %94 = vector.broadcast %93 : vector<128x1xf32> to vector<128x16xf32>
    %95 = arith.subf %91, %94 : vector<128x16xf32>
    %96 = math.exp %95 : vector<128x16xf32>
    %cst_31 = arith.constant dense<0.000000e+00> : vector<128xf32>
    %97 = vector.multi_reduction <add>, %96, %cst_31 [1] : vector<128x16xf32> to vector<128xf32>
    %98 = vector.shape_cast %97 : vector<128xf32> to vector<128x1xf32>
    %99 = tpu.reciprocal %98 {approx = true} : vector<128x1xf32> -> vector<128x1xf32>
    %100 = vector.broadcast %99 : vector<128x1xf32> to vector<128x16xf32>
    %101 = arith.mulf %96, %100 : vector<128x16xf32>
    %102 = vector.extract_strided_slice %43 {offsets = [0, 0], sizes = [16, 128], strides = [1, 1]} : vector<32x128xf32> to vector<16x128xf32>
    %103 = vector.extract_strided_slice %101 {offsets = [0, 0], sizes = [16, 16], strides = [1, 1]} : vector<128x16xf32> to vector<16x16xf32>
    %104 = vector.extract_strided_slice %102 {offsets = [0, 0], sizes = [16, 32], strides = [1, 1]} : vector<16x128xf32> to vector<16x32xf32>
    %105 = arith.truncf %103 : vector<16x16xf32> to vector<16x16xbf16>
    %106 = arith.truncf %104 : vector<16x32xf32> to vector<16x32xbf16>
    %cst_32 = arith.constant dense<0.000000e+00> : vector<16x32xf32>
    %107 = tpu.matmul %105, %106, %cst_32 {dimension_numbers = #tpu.dot_dimension_numbers<[1], [0], [0], [1], [0, 0, 1, 1], [], []>} : vector<16x16xbf16>, vector<16x32xbf16>, vector<16x32xf32> -> vector<16x32xf32>
    %108 = vector.extract_strided_slice %101 {offsets = [16, 0], sizes = [16, 16], strides = [1, 1]} : vector<128x16xf32> to vector<16x16xf32>
    %109 = vector.extract_strided_slice %102 {offsets = [0, 32], sizes = [16, 32], strides = [1, 1]} : vector<16x128xf32> to vector<16x32xf32>
    %110 = arith.truncf %108 : vector<16x16xf32> to vector<16x16xbf16>
    %111 = arith.truncf %109 : vector<16x32xf32> to vector<16x32xbf16>
    %cst_33 = arith.constant dense<0.000000e+00> : vector<16x32xf32>
    %112 = tpu.matmul %110, %111, %cst_33 {dimension_numbers = #tpu.dot_dimension_numbers<[1], [0], [0], [1], [0, 0, 1, 1], [], []>} : vector<16x16xbf16>, vector<16x32xbf16>, vector<16x32xf32> -> vector<16x32xf32>
    %113 = vector.extract_strided_slice %101 {offsets = [32, 0], sizes = [16, 16], strides = [1, 1]} : vector<128x16xf32> to vector<16x16xf32>
    %114 = vector.extract_strided_slice %102 {offsets = [0, 64], sizes = [16, 32], strides = [1, 1]} : vector<16x128xf32> to vector<16x32xf32>
    %115 = arith.truncf %113 : vector<16x16xf32> to vector<16x16xbf16>
    %116 = arith.truncf %114 : vector<16x32xf32> to vector<16x32xbf16>
    %cst_34 = arith.constant dense<0.000000e+00> : vector<16x32xf32>
    %117 = tpu.matmul %115, %116, %cst_34 {dimension_numbers = #tpu.dot_dimension_numbers<[1], [0], [0], [1], [0, 0, 1, 1], [], []>} : vector<16x16xbf16>, vector<16x32xbf16>, vector<16x32xf32> -> vector<16x32xf32>
    %118 = vector.extract_strided_slice %101 {offsets = [48, 0], sizes = [16, 16], strides = [1, 1]} : vector<128x16xf32> to vector<16x16xf32>
    %119 = vector.extract_strided_slice %102 {offsets = [0, 96], sizes = [16, 32], strides = [1, 1]} : vector<16x128xf32> to vector<16x32xf32>
    %120 = arith.truncf %118 : vector<16x16xf32> to vector<16x16xbf16>
    %121 = arith.truncf %119 : vector<16x32xf32> to vector<16x32xbf16>
    %cst_35 = arith.constant dense<0.000000e+00> : vector<16x32xf32>
    %122 = tpu.matmul %120, %121, %cst_35 {dimension_numbers = #tpu.dot_dimension_numbers<[1], [0], [0], [1], [0, 0, 1, 1], [], []>} : vector<16x16xbf16>, vector<16x32xbf16>, vector<16x32xf32> -> vector<16x32xf32>
    %123 = tpu.concatenate %107, %112, %117, %122 in 1 : vector<16x32xf32>, vector<16x32xf32>, vector<16x32xf32>, vector<16x32xf32> -> vector<16x128xf32>
    %124 = vector.extract_strided_slice %43 {offsets = [16, 0], sizes = [16, 128], strides = [1, 1]} : vector<32x128xf32> to vector<16x128xf32>
    %125 = vector.extract_strided_slice %101 {offsets = [64, 0], sizes = [16, 16], strides = [1, 1]} : vector<128x16xf32> to vector<16x16xf32>
    %126 = vector.extract_strided_slice %124 {offsets = [0, 0], sizes = [16, 32], strides = [1, 1]} : vector<16x128xf32> to vector<16x32xf32>
    %127 = arith.truncf %125 : vector<16x16xf32> to vector<16x16xbf16>
    %128 = arith.truncf %126 : vector<16x32xf32> to vector<16x32xbf16>
    %cst_36 = arith.constant dense<0.000000e+00> : vector<16x32xf32>
    %129 = tpu.matmul %127, %128, %cst_36 {dimension_numbers = #tpu.dot_dimension_numbers<[1], [0], [0], [1], [0, 0, 1, 1], [], []>} : vector<16x16xbf16>, vector<16x32xbf16>, vector<16x32xf32> -> vector<16x32xf32>
    %130 = vector.extract_strided_slice %101 {offsets = [80, 0], sizes = [16, 16], strides = [1, 1]} : vector<128x16xf32> to vector<16x16xf32>
    %131 = vector.extract_strided_slice %124 {offsets = [0, 32], sizes = [16, 32], strides = [1, 1]} : vector<16x128xf32> to vector<16x32xf32>
    %132 = arith.truncf %130 : vector<16x16xf32> to vector<16x16xbf16>
    %133 = arith.truncf %131 : vector<16x32xf32> to vector<16x32xbf16>
    %cst_37 = arith.constant dense<0.000000e+00> : vector<16x32xf32>
    %134 = tpu.matmul %132, %133, %cst_37 {dimension_numbers = #tpu.dot_dimension_numbers<[1], [0], [0], [1], [0, 0, 1, 1], [], []>} : vector<16x16xbf16>, vector<16x32xbf16>, vector<16x32xf32> -> vector<16x32xf32>
    %135 = vector.extract_strided_slice %101 {offsets = [96, 0], sizes = [16, 16], strides = [1, 1]} : vector<128x16xf32> to vector<16x16xf32>
    %136 = vector.extract_strided_slice %124 {offsets = [0, 64], sizes = [16, 32], strides = [1, 1]} : vector<16x128xf32> to vector<16x32xf32>
    %137 = arith.truncf %135 : vector<16x16xf32> to vector<16x16xbf16>
    %138 = arith.truncf %136 : vector<16x32xf32> to vector<16x32xbf16>
    %cst_38 = arith.constant dense<0.000000e+00> : vector<16x32xf32>
    %139 = tpu.matmul %137, %138, %cst_38 {dimension_numbers = #tpu.dot_dimension_numbers<[1], [0], [0], [1], [0, 0, 1, 1], [], []>} : vector<16x16xbf16>, vector<16x32xbf16>, vector<16x32xf32> -> vector<16x32xf32>
    %140 = vector.extract_strided_slice %101 {offsets = [112, 0], sizes = [16, 16], strides = [1, 1]} : vector<128x16xf32> to vector<16x16xf32>
    %141 = vector.extract_strided_slice %124 {offsets = [0, 96], sizes = [16, 32], strides = [1, 1]} : vector<16x128xf32> to vector<16x32xf32>
    %142 = arith.truncf %140 : vector<16x16xf32> to vector<16x16xbf16>
    %143 = arith.truncf %141 : vector<16x32xf32> to vector<16x32xbf16>
    %cst_39 = arith.constant dense<0.000000e+00> : vector<16x32xf32>
    %144 = tpu.matmul %142, %143, %cst_39 {dimension_numbers = #tpu.dot_dimension_numbers<[1], [0], [0], [1], [0, 0, 1, 1], [], []>} : vector<16x16xbf16>, vector<16x32xbf16>, vector<16x32xf32> -> vector<16x32xf32>
    %145 = tpu.concatenate %129, %134, %139, %144 in 1 : vector<16x32xf32>, vector<16x32xf32>, vector<16x32xf32>, vector<16x32xf32> -> vector<16x128xf32>
    %146 = tpu.concatenate %123, %145 in 0 : vector<16x128xf32>, vector<16x128xf32> -> vector<32x128xf32>
    %c0_40 = arith.constant 0 : index
    %c0_41 = arith.constant 0 : index
    %c0_42 = arith.constant 0 : index
    %147 = vector.load %arg7[%c0_40, %c0_41, %c0_42] : memref<2x128x128xf32, #tpu.memory_space<vmem>>, vector<1x128x128xf32>
    %148 = vector.shape_cast %147 : vector<1x128x128xf32> to vector<128x128xf32>
    %149 = arith.truncf %146 : vector<32x128xf32> to vector<32x128xbf16>
    %150 = arith.truncf %148 : vector<128x128xf32> to vector<128x128xbf16>
    %cst_43 = arith.constant dense<0.000000e+00> : vector<32x128xf32>
    %151 = tpu.matmul %149, %150, %cst_43 {dimension_numbers = #tpu.dot_dimension_numbers<[1], [0], [0], [1], [0, 0, 1, 1], [], []>} : vector<32x128xbf16>, vector<128x128xbf16>, vector<32x128xf32> -> vector<32x128xf32>
    %c0_44 = arith.constant 0 : index
    %c0_45 = arith.constant 0 : index
    %c0_46 = arith.constant 0 : index
    %152 = vector.load %arg8[%c0_44, %c0_45, %c0_46] : memref<2x1x128xf32, #tpu.memory_space<vmem>>, vector<1x1x128xf32>
    %153 = vector.shape_cast %152 : vector<1x1x128xf32> to vector<1x128xf32>
    %154 = vector.broadcast %153 : vector<1x128xf32> to vector<32x128xf32>
    %155 = arith.addf %151, %154 : vector<32x128xf32>
    %156 = arith.addf %155, %22 : vector<32x128xf32>
    %c0_47 = arith.constant 0 : index
    %c0_48 = arith.constant 0 : index
    %c0_49 = arith.constant 0 : index
    %157 = vector.load %arg9[%c0_47, %c0_48, %c0_49] : memref<2x1x128xf32, #tpu.memory_space<vmem>>, vector<1x1x128xf32>
    %158 = vector.shape_cast %157 : vector<1x1x128xf32> to vector<1x128xf32>
    %c0_50 = arith.constant 0 : index
    %c0_51 = arith.constant 0 : index
    %c0_52 = arith.constant 0 : index
    %159 = vector.load %arg10[%c0_50, %c0_51, %c0_52] : memref<2x1x128xf32, #tpu.memory_space<vmem>>, vector<1x1x128xf32>
    %160 = vector.shape_cast %159 : vector<1x1x128xf32> to vector<1x128xf32>
    %cst_53 = arith.constant dense<0.000000e+00> : vector<32xf32>
    %161 = vector.multi_reduction <add>, %156, %cst_53 [1] : vector<32x128xf32> to vector<32xf32>
    %162 = vector.shape_cast %161 : vector<32xf32> to vector<32x1xf32>
    %cst_54 = arith.constant 1.280000e+02 : f32
    %163 = vector.broadcast %cst_54 : f32 to vector<32x1xf32>
    %164 = arith.divf %162, %163 : vector<32x1xf32>
    %165 = vector.broadcast %164 : vector<32x1xf32> to vector<32x128xf32>
    %166 = arith.subf %156, %165 : vector<32x128xf32>
    %167 = arith.mulf %166, %166 : vector<32x128xf32>
    %cst_55 = arith.constant dense<0.000000e+00> : vector<32xf32>
    %168 = vector.multi_reduction <add>, %167, %cst_55 [1] : vector<32x128xf32> to vector<32xf32>
    %169 = vector.shape_cast %168 : vector<32xf32> to vector<32x1xf32>
    %cst_56 = arith.constant 1.270000e+02 : f32
    %170 = vector.broadcast %cst_56 : f32 to vector<32x1xf32>
    %171 = arith.divf %169, %170 : vector<32x1xf32>
    %172 = math.sqrt %171 : vector<32x1xf32>
    %173 = vector.broadcast %158 : vector<1x128xf32> to vector<32x128xf32>
    %174 = arith.mulf %173, %166 : vector<32x128xf32>
    %cst_57 = arith.constant 9.99999997E-7 : f32
    %175 = vector.broadcast %cst_57 : f32 to vector<32x1xf32>
    %176 = arith.addf %172, %175 : vector<32x1xf32>
    %177 = vector.broadcast %176 : vector<32x1xf32> to vector<32x128xf32>
    %178 = arith.divf %174, %177 : vector<32x128xf32>
    %179 = vector.broadcast %160 : vector<1x128xf32> to vector<32x128xf32>
    %180 = arith.addf %178, %179 : vector<32x128xf32>
    %c0_58 = arith.constant 0 : index
    %c0_59 = arith.constant 0 : index
    %c0_60 = arith.constant 0 : index
    %181 = vector.load %arg11[%c0_58, %c0_59, %c0_60] : memref<2x128x256xf32, #tpu.memory_space<vmem>>, vector<1x128x256xf32>
    %182 = vector.shape_cast %181 : vector<1x128x256xf32> to vector<128x256xf32>
    %183 = arith.truncf %180 : vector<32x128xf32> to vector<32x128xbf16>
    %184 = arith.truncf %182 : vector<128x256xf32> to vector<128x256xbf16>
    %cst_61 = arith.constant dense<0.000000e+00> : vector<32x256xf32>
    %185 = tpu.matmul %183, %184, %cst_61 {dimension_numbers = #tpu.dot_dimension_numbers<[1], [0], [0], [1], [0, 0, 1, 1], [], []>} : vector<32x128xbf16>, vector<128x256xbf16>, vector<32x256xf32> -> vector<32x256xf32>
    %c0_62 = arith.constant 0 : index
    %c0_63 = arith.constant 0 : index
    %c0_64 = arith.constant 0 : index
    %186 = vector.load %arg12[%c0_62, %c0_63, %c0_64] : memref<2x1x256xf32, #tpu.memory_space<vmem>>, vector<1x1x256xf32>
    %187 = vector.shape_cast %186 : vector<1x1x256xf32> to vector<1x256xf32>
    %188 = vector.broadcast %187 : vector<1x256xf32> to vector<32x256xf32>
    %189 = arith.addf %185, %188 : vector<32x256xf32>
    %cst_65 = arith.constant 5.000000e-01 : f32
    %190 = vector.broadcast %cst_65 : f32 to vector<32x256xf32>
    %191 = arith.mulf %190, %189 : vector<32x256xf32>
    %cst_66 = arith.constant 4.471500e-02 : f32
    %192 = vector.broadcast %cst_66 : f32 to vector<32x256xf32>
    %193 = arith.mulf %192, %189 : vector<32x256xf32>
    %194 = arith.mulf %193, %189 : vector<32x256xf32>
    %195 = arith.mulf %194, %189 : vector<32x256xf32>
    %196 = arith.addf %189, %195 : vector<32x256xf32>
    %cst_67 = arith.constant 0.797884583 : f32
    %197 = vector.broadcast %cst_67 : f32 to vector<32x256xf32>
    %198 = arith.mulf %197, %196 : vector<32x256xf32>
    %199 = math.tanh %198 : vector<32x256xf32>
    %cst_68 = arith.constant 1.000000e+00 : f32
    %200 = vector.broadcast %cst_68 : f32 to vector<32x256xf32>
    %201 = arith.addf %200, %199 : vector<32x256xf32>
    %202 = arith.mulf %191, %201 : vector<32x256xf32>
    %c0_69 = arith.constant 0 : index
    %c0_70 = arith.constant 0 : index
    %c0_71 = arith.constant 0 : index
    %203 = vector.load %arg13[%c0_69, %c0_70, %c0_71] : memref<2x256x128xf32, #tpu.memory_space<vmem>>, vector<1x256x128xf32>
    %204 = vector.shape_cast %203 : vector<1x256x128xf32> to vector<256x128xf32>
    %205 = arith.truncf %202 : vector<32x256xf32> to vector<32x256xbf16>
    %206 = arith.truncf %204 : vector<256x128xf32> to vector<256x128xbf16>
    %cst_72 = arith.constant dense<0.000000e+00> : vector<32x128xf32>
    %207 = tpu.matmul %205, %206, %cst_72 {dimension_numbers = #tpu.dot_dimension_numbers<[1], [0], [0], [1], [0, 0, 1, 1], [], []>} : vector<32x256xbf16>, vector<256x128xbf16>, vector<32x128xf32> -> vector<32x128xf32>
    %c0_73 = arith.constant 0 : index
    %c0_74 = arith.constant 0 : index
    %c0_75 = arith.constant 0 : index
    %208 = vector.load %arg14[%c0_73, %c0_74, %c0_75] : memref<2x1x128xf32, #tpu.memory_space<vmem>>, vector<1x1x128xf32>
    %209 = vector.shape_cast %208 : vector<1x1x128xf32> to vector<1x128xf32>
    %210 = vector.broadcast %209 : vector<1x128xf32> to vector<32x128xf32>
    %211 = arith.addf %207, %210 : vector<32x128xf32>
    %212 = arith.addf %211, %180 : vector<32x128xf32>
    %c0_76 = arith.constant 0 : index
    %c0_77 = arith.constant 0 : index
    %c0_78 = arith.constant 0 : index
    %213 = vector.load %arg15[%c0_76, %c0_77, %c0_78] : memref<2x1x128xf32, #tpu.memory_space<vmem>>, vector<1x1x128xf32>
    %214 = vector.shape_cast %213 : vector<1x1x128xf32> to vector<1x128xf32>
    %c0_79 = arith.constant 0 : index
    %c0_80 = arith.constant 0 : index
    %c0_81 = arith.constant 0 : index
    %215 = vector.load %arg16[%c0_79, %c0_80, %c0_81] : memref<2x1x128xf32, #tpu.memory_space<vmem>>, vector<1x1x128xf32>
    %216 = vector.shape_cast %215 : vector<1x1x128xf32> to vector<1x128xf32>
    %cst_82 = arith.constant dense<0.000000e+00> : vector<32xf32>
    %217 = vector.multi_reduction <add>, %212, %cst_82 [1] : vector<32x128xf32> to vector<32xf32>
    %218 = vector.shape_cast %217 : vector<32xf32> to vector<32x1xf32>
    %cst_83 = arith.constant 1.280000e+02 : f32
    %219 = vector.broadcast %cst_83 : f32 to vector<32x1xf32>
    %220 = arith.divf %218, %219 : vector<32x1xf32>
    %221 = vector.broadcast %220 : vector<32x1xf32> to vector<32x128xf32>
    %222 = arith.subf %212, %221 : vector<32x128xf32>
    %223 = arith.mulf %222, %222 : vector<32x128xf32>
    %cst_84 = arith.constant dense<0.000000e+00> : vector<32xf32>
    %224 = vector.multi_reduction <add>, %223, %cst_84 [1] : vector<32x128xf32> to vector<32xf32>
    %225 = vector.shape_cast %224 : vector<32xf32> to vector<32x1xf32>
    %cst_85 = arith.constant 1.270000e+02 : f32
    %226 = vector.broadcast %cst_85 : f32 to vector<32x1xf32>
    %227 = arith.divf %225, %226 : vector<32x1xf32>
    %228 = math.sqrt %227 : vector<32x1xf32>
    %229 = vector.broadcast %214 : vector<1x128xf32> to vector<32x128xf32>
    %230 = arith.mulf %229, %222 : vector<32x128xf32>
    %cst_86 = arith.constant 9.99999997E-7 : f32
    %231 = vector.broadcast %cst_86 : f32 to vector<32x1xf32>
    %232 = arith.addf %228, %231 : vector<32x1xf32>
    %233 = vector.broadcast %232 : vector<32x1xf32> to vector<32x128xf32>
    %234 = arith.divf %230, %233 : vector<32x128xf32>
    %235 = vector.broadcast %216 : vector<1x128xf32> to vector<32x128xf32>
    %236 = arith.addf %234, %235 : vector<32x128xf32>
    %c1_87 = arith.constant 1 : index
    %c0_88 = arith.constant 0 : index
    %c0_89 = arith.constant 0 : index
    %237 = vector.load %arg5[%c1_87, %c0_88, %c0_89] : memref<2x128x384xf32, #tpu.memory_space<vmem>>, vector<1x128x384xf32>
    %238 = vector.shape_cast %237 : vector<1x128x384xf32> to vector<128x384xf32>
    %239 = arith.truncf %236 : vector<32x128xf32> to vector<32x128xbf16>
    %240 = arith.truncf %238 : vector<128x384xf32> to vector<128x384xbf16>
    %cst_90 = arith.constant dense<0.000000e+00> : vector<32x384xf32>
    %241 = tpu.matmul %239, %240, %cst_90 {dimension_numbers = #tpu.dot_dimension_numbers<[1], [0], [0], [1], [0, 0, 1, 1], [], []>} : vector<32x128xbf16>, vector<128x384xbf16>, vector<32x384xf32> -> vector<32x384xf32>
    %c1_91 = arith.constant 1 : index
    %c0_92 = arith.constant 0 : index
    %c0_93 = arith.constant 0 : index
    %242 = vector.load %arg6[%c1_91, %c0_92, %c0_93] : memref<2x1x384xf32, #tpu.memory_space<vmem>>, vector<1x1x384xf32>
    %243 = vector.shape_cast %242 : vector<1x1x384xf32> to vector<1x384xf32>
    %244 = vector.broadcast %243 : vector<1x384xf32> to vector<32x384xf32>
    %245 = arith.addf %241, %244 : vector<32x384xf32>
    %246 = vector.extract_strided_slice %245 {offsets = [0, 0], sizes = [32, 128], strides = [1, 1]} : vector<32x384xf32> to vector<32x128xf32>
    %247 = vector.extract_strided_slice %245 {offsets = [0, 128], sizes = [32, 128], strides = [1, 1]} : vector<32x384xf32> to vector<32x128xf32>
    %248 = vector.extract_strided_slice %245 {offsets = [0, 256], sizes = [32, 128], strides = [1, 1]} : vector<32x384xf32> to vector<32x128xf32>
    %249 = vector.extract_strided_slice %246 {offsets = [0, 0], sizes = [16, 128], strides = [1, 1]} : vector<32x128xf32> to vector<16x128xf32>
    %250 = vector.extract_strided_slice %247 {offsets = [0, 0], sizes = [16, 128], strides = [1, 1]} : vector<32x128xf32> to vector<16x128xf32>
    %251 = vector.extract_strided_slice %249 {offsets = [0, 0], sizes = [16, 32], strides = [1, 1]} : vector<16x128xf32> to vector<16x32xf32>
    %252 = vector.extract_strided_slice %250 {offsets = [0, 0], sizes = [16, 32], strides = [1, 1]} : vector<16x128xf32> to vector<16x32xf32>
    %253 = arith.truncf %251 : vector<16x32xf32> to vector<16x32xbf16>
    %254 = arith.truncf %252 : vector<16x32xf32> to vector<16x32xbf16>
    %cst_94 = arith.constant dense<0.000000e+00> : vector<16x16xf32>
    %255 = tpu.matmul %253, %254, %cst_94 {dimension_numbers = #tpu.dot_dimension_numbers<[1], [1], [0], [0], [0, 0, 1, 0], [], []>} : vector<16x32xbf16>, vector<16x32xbf16>, vector<16x16xf32> -> vector<16x16xf32>
    %256 = vector.extract_strided_slice %249 {offsets = [0, 32], sizes = [16, 32], strides = [1, 1]} : vector<16x128xf32> to vector<16x32xf32>
    %257 = vector.extract_strided_slice %250 {offsets = [0, 32], sizes = [16, 32], strides = [1, 1]} : vector<16x128xf32> to vector<16x32xf32>
    %258 = arith.truncf %256 : vector<16x32xf32> to vector<16x32xbf16>
    %259 = arith.truncf %257 : vector<16x32xf32> to vector<16x32xbf16>
    %cst_95 = arith.constant dense<0.000000e+00> : vector<16x16xf32>
    %260 = tpu.matmul %258, %259, %cst_95 {dimension_numbers = #tpu.dot_dimension_numbers<[1], [1], [0], [0], [0, 0, 1, 0], [], []>} : vector<16x32xbf16>, vector<16x32xbf16>, vector<16x16xf32> -> vector<16x16xf32>
    %261 = vector.extract_strided_slice %249 {offsets = [0, 64], sizes = [16, 32], strides = [1, 1]} : vector<16x128xf32> to vector<16x32xf32>
    %262 = vector.extract_strided_slice %250 {offsets = [0, 64], sizes = [16, 32], strides = [1, 1]} : vector<16x128xf32> to vector<16x32xf32>
    %263 = arith.truncf %261 : vector<16x32xf32> to vector<16x32xbf16>
    %264 = arith.truncf %262 : vector<16x32xf32> to vector<16x32xbf16>
    %cst_96 = arith.constant dense<0.000000e+00> : vector<16x16xf32>
    %265 = tpu.matmul %263, %264, %cst_96 {dimension_numbers = #tpu.dot_dimension_numbers<[1], [1], [0], [0], [0, 0, 1, 0], [], []>} : vector<16x32xbf16>, vector<16x32xbf16>, vector<16x16xf32> -> vector<16x16xf32>
    %266 = vector.extract_strided_slice %249 {offsets = [0, 96], sizes = [16, 32], strides = [1, 1]} : vector<16x128xf32> to vector<16x32xf32>
    %267 = vector.extract_strided_slice %250 {offsets = [0, 96], sizes = [16, 32], strides = [1, 1]} : vector<16x128xf32> to vector<16x32xf32>
    %268 = arith.truncf %266 : vector<16x32xf32> to vector<16x32xbf16>
    %269 = arith.truncf %267 : vector<16x32xf32> to vector<16x32xbf16>
    %cst_97 = arith.constant dense<0.000000e+00> : vector<16x16xf32>
    %270 = tpu.matmul %268, %269, %cst_97 {dimension_numbers = #tpu.dot_dimension_numbers<[1], [1], [0], [0], [0, 0, 1, 0], [], []>} : vector<16x32xbf16>, vector<16x32xbf16>, vector<16x16xf32> -> vector<16x16xf32>
    %271 = vector.extract_strided_slice %246 {offsets = [16, 0], sizes = [16, 128], strides = [1, 1]} : vector<32x128xf32> to vector<16x128xf32>
    %272 = vector.extract_strided_slice %247 {offsets = [16, 0], sizes = [16, 128], strides = [1, 1]} : vector<32x128xf32> to vector<16x128xf32>
    %273 = vector.extract_strided_slice %271 {offsets = [0, 0], sizes = [16, 32], strides = [1, 1]} : vector<16x128xf32> to vector<16x32xf32>
    %274 = vector.extract_strided_slice %272 {offsets = [0, 0], sizes = [16, 32], strides = [1, 1]} : vector<16x128xf32> to vector<16x32xf32>
    %275 = arith.truncf %273 : vector<16x32xf32> to vector<16x32xbf16>
    %276 = arith.truncf %274 : vector<16x32xf32> to vector<16x32xbf16>
    %cst_98 = arith.constant dense<0.000000e+00> : vector<16x16xf32>
    %277 = tpu.matmul %275, %276, %cst_98 {dimension_numbers = #tpu.dot_dimension_numbers<[1], [1], [0], [0], [0, 0, 1, 0], [], []>} : vector<16x32xbf16>, vector<16x32xbf16>, vector<16x16xf32> -> vector<16x16xf32>
    %278 = vector.extract_strided_slice %271 {offsets = [0, 32], sizes = [16, 32], strides = [1, 1]} : vector<16x128xf32> to vector<16x32xf32>
    %279 = vector.extract_strided_slice %272 {offsets = [0, 32], sizes = [16, 32], strides = [1, 1]} : vector<16x128xf32> to vector<16x32xf32>
    %280 = arith.truncf %278 : vector<16x32xf32> to vector<16x32xbf16>
    %281 = arith.truncf %279 : vector<16x32xf32> to vector<16x32xbf16>
    %cst_99 = arith.constant dense<0.000000e+00> : vector<16x16xf32>
    %282 = tpu.matmul %280, %281, %cst_99 {dimension_numbers = #tpu.dot_dimension_numbers<[1], [1], [0], [0], [0, 0, 1, 0], [], []>} : vector<16x32xbf16>, vector<16x32xbf16>, vector<16x16xf32> -> vector<16x16xf32>
    %283 = vector.extract_strided_slice %271 {offsets = [0, 64], sizes = [16, 32], strides = [1, 1]} : vector<16x128xf32> to vector<16x32xf32>
    %284 = vector.extract_strided_slice %272 {offsets = [0, 64], sizes = [16, 32], strides = [1, 1]} : vector<16x128xf32> to vector<16x32xf32>
    %285 = arith.truncf %283 : vector<16x32xf32> to vector<16x32xbf16>
    %286 = arith.truncf %284 : vector<16x32xf32> to vector<16x32xbf16>
    %cst_100 = arith.constant dense<0.000000e+00> : vector<16x16xf32>
    %287 = tpu.matmul %285, %286, %cst_100 {dimension_numbers = #tpu.dot_dimension_numbers<[1], [1], [0], [0], [0, 0, 1, 0], [], []>} : vector<16x32xbf16>, vector<16x32xbf16>, vector<16x16xf32> -> vector<16x16xf32>
    %288 = vector.extract_strided_slice %271 {offsets = [0, 96], sizes = [16, 32], strides = [1, 1]} : vector<16x128xf32> to vector<16x32xf32>
    %289 = vector.extract_strided_slice %272 {offsets = [0, 96], sizes = [16, 32], strides = [1, 1]} : vector<16x128xf32> to vector<16x32xf32>
    %290 = arith.truncf %288 : vector<16x32xf32> to vector<16x32xbf16>
    %291 = arith.truncf %289 : vector<16x32xf32> to vector<16x32xbf16>
    %cst_101 = arith.constant dense<0.000000e+00> : vector<16x16xf32>
    %292 = tpu.matmul %290, %291, %cst_101 {dimension_numbers = #tpu.dot_dimension_numbers<[1], [1], [0], [0], [0, 0, 1, 0], [], []>} : vector<16x32xbf16>, vector<16x32xbf16>, vector<16x16xf32> -> vector<16x16xf32>
    %293 = tpu.concatenate %255, %260, %265, %270, %277, %282, %287, %292 in 0 : vector<16x16xf32>, vector<16x16xf32>, vector<16x16xf32>, vector<16x16xf32>, vector<16x16xf32>, vector<16x16xf32>, vector<16x16xf32>, vector<16x16xf32> -> vector<128x16xf32>
    %cst_102 = arith.constant 0.176776692 : f32
    %294 = vector.broadcast %cst_102 : f32 to vector<128x16xf32>
    %295 = arith.mulf %293, %294 : vector<128x16xf32>
    %296 = arith.addf %295, %31 : vector<128x16xf32>
    %cst_103 = arith.constant dense<0xFF800000> : vector<128xf32>
    %297 = vector.multi_reduction <maximumf>, %296, %cst_103 [1] : vector<128x16xf32> to vector<128xf32>
    %298 = vector.shape_cast %297 : vector<128xf32> to vector<128x1xf32>
    %299 = vector.broadcast %298 : vector<128x1xf32> to vector<128x16xf32>
    %300 = arith.subf %296, %299 : vector<128x16xf32>
    %301 = math.exp %300 : vector<128x16xf32>
    %cst_104 = arith.constant dense<0.000000e+00> : vector<128xf32>
    %302 = vector.multi_reduction <add>, %301, %cst_104 [1] : vector<128x16xf32> to vector<128xf32>
    %303 = vector.shape_cast %302 : vector<128xf32> to vector<128x1xf32>
    %304 = tpu.reciprocal %303 {approx = true} : vector<128x1xf32> -> vector<128x1xf32>
    %305 = vector.broadcast %304 : vector<128x1xf32> to vector<128x16xf32>
    %306 = arith.mulf %301, %305 : vector<128x16xf32>
    %307 = vector.extract_strided_slice %248 {offsets = [0, 0], sizes = [16, 128], strides = [1, 1]} : vector<32x128xf32> to vector<16x128xf32>
    %308 = vector.extract_strided_slice %306 {offsets = [0, 0], sizes = [16, 16], strides = [1, 1]} : vector<128x16xf32> to vector<16x16xf32>
    %309 = vector.extract_strided_slice %307 {offsets = [0, 0], sizes = [16, 32], strides = [1, 1]} : vector<16x128xf32> to vector<16x32xf32>
    %310 = arith.truncf %308 : vector<16x16xf32> to vector<16x16xbf16>
    %311 = arith.truncf %309 : vector<16x32xf32> to vector<16x32xbf16>
    %cst_105 = arith.constant dense<0.000000e+00> : vector<16x32xf32>
    %312 = tpu.matmul %310, %311, %cst_105 {dimension_numbers = #tpu.dot_dimension_numbers<[1], [0], [0], [1], [0, 0, 1, 1], [], []>} : vector<16x16xbf16>, vector<16x32xbf16>, vector<16x32xf32> -> vector<16x32xf32>
    %313 = vector.extract_strided_slice %306 {offsets = [16, 0], sizes = [16, 16], strides = [1, 1]} : vector<128x16xf32> to vector<16x16xf32>
    %314 = vector.extract_strided_slice %307 {offsets = [0, 32], sizes = [16, 32], strides = [1, 1]} : vector<16x128xf32> to vector<16x32xf32>
    %315 = arith.truncf %313 : vector<16x16xf32> to vector<16x16xbf16>
    %316 = arith.truncf %314 : vector<16x32xf32> to vector<16x32xbf16>
    %cst_106 = arith.constant dense<0.000000e+00> : vector<16x32xf32>
    %317 = tpu.matmul %315, %316, %cst_106 {dimension_numbers = #tpu.dot_dimension_numbers<[1], [0], [0], [1], [0, 0, 1, 1], [], []>} : vector<16x16xbf16>, vector<16x32xbf16>, vector<16x32xf32> -> vector<16x32xf32>
    %318 = vector.extract_strided_slice %306 {offsets = [32, 0], sizes = [16, 16], strides = [1, 1]} : vector<128x16xf32> to vector<16x16xf32>
    %319 = vector.extract_strided_slice %307 {offsets = [0, 64], sizes = [16, 32], strides = [1, 1]} : vector<16x128xf32> to vector<16x32xf32>
    %320 = arith.truncf %318 : vector<16x16xf32> to vector<16x16xbf16>
    %321 = arith.truncf %319 : vector<16x32xf32> to vector<16x32xbf16>
    %cst_107 = arith.constant dense<0.000000e+00> : vector<16x32xf32>
    %322 = tpu.matmul %320, %321, %cst_107 {dimension_numbers = #tpu.dot_dimension_numbers<[1], [0], [0], [1], [0, 0, 1, 1], [], []>} : vector<16x16xbf16>, vector<16x32xbf16>, vector<16x32xf32> -> vector<16x32xf32>
    %323 = vector.extract_strided_slice %306 {offsets = [48, 0], sizes = [16, 16], strides = [1, 1]} : vector<128x16xf32> to vector<16x16xf32>
    %324 = vector.extract_strided_slice %307 {offsets = [0, 96], sizes = [16, 32], strides = [1, 1]} : vector<16x128xf32> to vector<16x32xf32>
    %325 = arith.truncf %323 : vector<16x16xf32> to vector<16x16xbf16>
    %326 = arith.truncf %324 : vector<16x32xf32> to vector<16x32xbf16>
    %cst_108 = arith.constant dense<0.000000e+00> : vector<16x32xf32>
    %327 = tpu.matmul %325, %326, %cst_108 {dimension_numbers = #tpu.dot_dimension_numbers<[1], [0], [0], [1], [0, 0, 1, 1], [], []>} : vector<16x16xbf16>, vector<16x32xbf16>, vector<16x32xf32> -> vector<16x32xf32>
    %328 = tpu.concatenate %312, %317, %322, %327 in 1 : vector<16x32xf32>, vector<16x32xf32>, vector<16x32xf32>, vector<16x32xf32> -> vector<16x128xf32>
    %329 = vector.extract_strided_slice %248 {offsets = [16, 0], sizes = [16, 128], strides = [1, 1]} : vector<32x128xf32> to vector<16x128xf32>
    %330 = vector.extract_strided_slice %306 {offsets = [64, 0], sizes = [16, 16], strides = [1, 1]} : vector<128x16xf32> to vector<16x16xf32>
    %331 = vector.extract_strided_slice %329 {offsets = [0, 0], sizes = [16, 32], strides = [1, 1]} : vector<16x128xf32> to vector<16x32xf32>
    %332 = arith.truncf %330 : vector<16x16xf32> to vector<16x16xbf16>
    %333 = arith.truncf %331 : vector<16x32xf32> to vector<16x32xbf16>
    %cst_109 = arith.constant dense<0.000000e+00> : vector<16x32xf32>
    %334 = tpu.matmul %332, %333, %cst_109 {dimension_numbers = #tpu.dot_dimension_numbers<[1], [0], [0], [1], [0, 0, 1, 1], [], []>} : vector<16x16xbf16>, vector<16x32xbf16>, vector<16x32xf32> -> vector<16x32xf32>
    %335 = vector.extract_strided_slice %306 {offsets = [80, 0], sizes = [16, 16], strides = [1, 1]} : vector<128x16xf32> to vector<16x16xf32>
    %336 = vector.extract_strided_slice %329 {offsets = [0, 32], sizes = [16, 32], strides = [1, 1]} : vector<16x128xf32> to vector<16x32xf32>
    %337 = arith.truncf %335 : vector<16x16xf32> to vector<16x16xbf16>
    %338 = arith.truncf %336 : vector<16x32xf32> to vector<16x32xbf16>
    %cst_110 = arith.constant dense<0.000000e+00> : vector<16x32xf32>
    %339 = tpu.matmul %337, %338, %cst_110 {dimension_numbers = #tpu.dot_dimension_numbers<[1], [0], [0], [1], [0, 0, 1, 1], [], []>} : vector<16x16xbf16>, vector<16x32xbf16>, vector<16x32xf32> -> vector<16x32xf32>
    %340 = vector.extract_strided_slice %306 {offsets = [96, 0], sizes = [16, 16], strides = [1, 1]} : vector<128x16xf32> to vector<16x16xf32>
    %341 = vector.extract_strided_slice %329 {offsets = [0, 64], sizes = [16, 32], strides = [1, 1]} : vector<16x128xf32> to vector<16x32xf32>
    %342 = arith.truncf %340 : vector<16x16xf32> to vector<16x16xbf16>
    %343 = arith.truncf %341 : vector<16x32xf32> to vector<16x32xbf16>
    %cst_111 = arith.constant dense<0.000000e+00> : vector<16x32xf32>
    %344 = tpu.matmul %342, %343, %cst_111 {dimension_numbers = #tpu.dot_dimension_numbers<[1], [0], [0], [1], [0, 0, 1, 1], [], []>} : vector<16x16xbf16>, vector<16x32xbf16>, vector<16x32xf32> -> vector<16x32xf32>
    %345 = vector.extract_strided_slice %306 {offsets = [112, 0], sizes = [16, 16], strides = [1, 1]} : vector<128x16xf32> to vector<16x16xf32>
    %346 = vector.extract_strided_slice %329 {offsets = [0, 96], sizes = [16, 32], strides = [1, 1]} : vector<16x128xf32> to vector<16x32xf32>
    %347 = arith.truncf %345 : vector<16x16xf32> to vector<16x16xbf16>
    %348 = arith.truncf %346 : vector<16x32xf32> to vector<16x32xbf16>
    %cst_112 = arith.constant dense<0.000000e+00> : vector<16x32xf32>
    %349 = tpu.matmul %347, %348, %cst_112 {dimension_numbers = #tpu.dot_dimension_numbers<[1], [0], [0], [1], [0, 0, 1, 1], [], []>} : vector<16x16xbf16>, vector<16x32xbf16>, vector<16x32xf32> -> vector<16x32xf32>
    %350 = tpu.concatenate %334, %339, %344, %349 in 1 : vector<16x32xf32>, vector<16x32xf32>, vector<16x32xf32>, vector<16x32xf32> -> vector<16x128xf32>
    %351 = tpu.concatenate %328, %350 in 0 : vector<16x128xf32>, vector<16x128xf32> -> vector<32x128xf32>
    %c1_113 = arith.constant 1 : index
    %c0_114 = arith.constant 0 : index
    %c0_115 = arith.constant 0 : index
    %352 = vector.load %arg7[%c1_113, %c0_114, %c0_115] : memref<2x128x128xf32, #tpu.memory_space<vmem>>, vector<1x128x128xf32>
    %353 = vector.shape_cast %352 : vector<1x128x128xf32> to vector<128x128xf32>
    %354 = arith.truncf %351 : vector<32x128xf32> to vector<32x128xbf16>
    %355 = arith.truncf %353 : vector<128x128xf32> to vector<128x128xbf16>
    %cst_116 = arith.constant dense<0.000000e+00> : vector<32x128xf32>
    %356 = tpu.matmul %354, %355, %cst_116 {dimension_numbers = #tpu.dot_dimension_numbers<[1], [0], [0], [1], [0, 0, 1, 1], [], []>} : vector<32x128xbf16>, vector<128x128xbf16>, vector<32x128xf32> -> vector<32x128xf32>
    %c1_117 = arith.constant 1 : index
    %c0_118 = arith.constant 0 : index
    %c0_119 = arith.constant 0 : index
    %357 = vector.load %arg8[%c1_117, %c0_118, %c0_119] : memref<2x1x128xf32, #tpu.memory_space<vmem>>, vector<1x1x128xf32>
    %358 = vector.shape_cast %357 : vector<1x1x128xf32> to vector<1x128xf32>
    %359 = vector.broadcast %358 : vector<1x128xf32> to vector<32x128xf32>
    %360 = arith.addf %356, %359 : vector<32x128xf32>
    %361 = arith.addf %360, %236 : vector<32x128xf32>
    %c1_120 = arith.constant 1 : index
    %c0_121 = arith.constant 0 : index
    %c0_122 = arith.constant 0 : index
    %362 = vector.load %arg9[%c1_120, %c0_121, %c0_122] : memref<2x1x128xf32, #tpu.memory_space<vmem>>, vector<1x1x128xf32>
    %363 = vector.shape_cast %362 : vector<1x1x128xf32> to vector<1x128xf32>
    %c1_123 = arith.constant 1 : index
    %c0_124 = arith.constant 0 : index
    %c0_125 = arith.constant 0 : index
    %364 = vector.load %arg10[%c1_123, %c0_124, %c0_125] : memref<2x1x128xf32, #tpu.memory_space<vmem>>, vector<1x1x128xf32>
    %365 = vector.shape_cast %364 : vector<1x1x128xf32> to vector<1x128xf32>
    %cst_126 = arith.constant dense<0.000000e+00> : vector<32xf32>
    %366 = vector.multi_reduction <add>, %361, %cst_126 [1] : vector<32x128xf32> to vector<32xf32>
    %367 = vector.shape_cast %366 : vector<32xf32> to vector<32x1xf32>
    %cst_127 = arith.constant 1.280000e+02 : f32
    %368 = vector.broadcast %cst_127 : f32 to vector<32x1xf32>
    %369 = arith.divf %367, %368 : vector<32x1xf32>
    %370 = vector.broadcast %369 : vector<32x1xf32> to vector<32x128xf32>
    %371 = arith.subf %361, %370 : vector<32x128xf32>
    %372 = arith.mulf %371, %371 : vector<32x128xf32>
    %cst_128 = arith.constant dense<0.000000e+00> : vector<32xf32>
    %373 = vector.multi_reduction <add>, %372, %cst_128 [1] : vector<32x128xf32> to vector<32xf32>
    %374 = vector.shape_cast %373 : vector<32xf32> to vector<32x1xf32>
    %cst_129 = arith.constant 1.270000e+02 : f32
    %375 = vector.broadcast %cst_129 : f32 to vector<32x1xf32>
    %376 = arith.divf %374, %375 : vector<32x1xf32>
    %377 = math.sqrt %376 : vector<32x1xf32>
    %378 = vector.broadcast %363 : vector<1x128xf32> to vector<32x128xf32>
    %379 = arith.mulf %378, %371 : vector<32x128xf32>
    %cst_130 = arith.constant 9.99999997E-7 : f32
    %380 = vector.broadcast %cst_130 : f32 to vector<32x1xf32>
    %381 = arith.addf %377, %380 : vector<32x1xf32>
    %382 = vector.broadcast %381 : vector<32x1xf32> to vector<32x128xf32>
    %383 = arith.divf %379, %382 : vector<32x128xf32>
    %384 = vector.broadcast %365 : vector<1x128xf32> to vector<32x128xf32>
    %385 = arith.addf %383, %384 : vector<32x128xf32>
    %c1_131 = arith.constant 1 : index
    %c0_132 = arith.constant 0 : index
    %c0_133 = arith.constant 0 : index
    %386 = vector.load %arg11[%c1_131, %c0_132, %c0_133] : memref<2x128x256xf32, #tpu.memory_space<vmem>>, vector<1x128x256xf32>
    %387 = vector.shape_cast %386 : vector<1x128x256xf32> to vector<128x256xf32>
    %388 = arith.truncf %385 : vector<32x128xf32> to vector<32x128xbf16>
    %389 = arith.truncf %387 : vector<128x256xf32> to vector<128x256xbf16>
    %cst_134 = arith.constant dense<0.000000e+00> : vector<32x256xf32>
    %390 = tpu.matmul %388, %389, %cst_134 {dimension_numbers = #tpu.dot_dimension_numbers<[1], [0], [0], [1], [0, 0, 1, 1], [], []>} : vector<32x128xbf16>, vector<128x256xbf16>, vector<32x256xf32> -> vector<32x256xf32>
    %c1_135 = arith.constant 1 : index
    %c0_136 = arith.constant 0 : index
    %c0_137 = arith.constant 0 : index
    %391 = vector.load %arg12[%c1_135, %c0_136, %c0_137] : memref<2x1x256xf32, #tpu.memory_space<vmem>>, vector<1x1x256xf32>
    %392 = vector.shape_cast %391 : vector<1x1x256xf32> to vector<1x256xf32>
    %393 = vector.broadcast %392 : vector<1x256xf32> to vector<32x256xf32>
    %394 = arith.addf %390, %393 : vector<32x256xf32>
    %cst_138 = arith.constant 5.000000e-01 : f32
    %395 = vector.broadcast %cst_138 : f32 to vector<32x256xf32>
    %396 = arith.mulf %395, %394 : vector<32x256xf32>
    %cst_139 = arith.constant 4.471500e-02 : f32
    %397 = vector.broadcast %cst_139 : f32 to vector<32x256xf32>
    %398 = arith.mulf %397, %394 : vector<32x256xf32>
    %399 = arith.mulf %398, %394 : vector<32x256xf32>
    %400 = arith.mulf %399, %394 : vector<32x256xf32>
    %401 = arith.addf %394, %400 : vector<32x256xf32>
    %cst_140 = arith.constant 0.797884583 : f32
    %402 = vector.broadcast %cst_140 : f32 to vector<32x256xf32>
    %403 = arith.mulf %402, %401 : vector<32x256xf32>
    %404 = math.tanh %403 : vector<32x256xf32>
    %cst_141 = arith.constant 1.000000e+00 : f32
    %405 = vector.broadcast %cst_141 : f32 to vector<32x256xf32>
    %406 = arith.addf %405, %404 : vector<32x256xf32>
    %407 = arith.mulf %396, %406 : vector<32x256xf32>
    %c1_142 = arith.constant 1 : index
    %c0_143 = arith.constant 0 : index
    %c0_144 = arith.constant 0 : index
    %408 = vector.load %arg13[%c1_142, %c0_143, %c0_144] : memref<2x256x128xf32, #tpu.memory_space<vmem>>, vector<1x256x128xf32>
    %409 = vector.shape_cast %408 : vector<1x256x128xf32> to vector<256x128xf32>
    %410 = arith.truncf %407 : vector<32x256xf32> to vector<32x256xbf16>
    %411 = arith.truncf %409 : vector<256x128xf32> to vector<256x128xbf16>
    %cst_145 = arith.constant dense<0.000000e+00> : vector<32x128xf32>
    %412 = tpu.matmul %410, %411, %cst_145 {dimension_numbers = #tpu.dot_dimension_numbers<[1], [0], [0], [1], [0, 0, 1, 1], [], []>} : vector<32x256xbf16>, vector<256x128xbf16>, vector<32x128xf32> -> vector<32x128xf32>
    %c1_146 = arith.constant 1 : index
    %c0_147 = arith.constant 0 : index
    %c0_148 = arith.constant 0 : index
    %413 = vector.load %arg14[%c1_146, %c0_147, %c0_148] : memref<2x1x128xf32, #tpu.memory_space<vmem>>, vector<1x1x128xf32>
    %414 = vector.shape_cast %413 : vector<1x1x128xf32> to vector<1x128xf32>
    %415 = vector.broadcast %414 : vector<1x128xf32> to vector<32x128xf32>
    %416 = arith.addf %412, %415 : vector<32x128xf32>
    %417 = arith.addf %416, %385 : vector<32x128xf32>
    %c1_149 = arith.constant 1 : index
    %c0_150 = arith.constant 0 : index
    %c0_151 = arith.constant 0 : index
    %418 = vector.load %arg15[%c1_149, %c0_150, %c0_151] : memref<2x1x128xf32, #tpu.memory_space<vmem>>, vector<1x1x128xf32>
    %419 = vector.shape_cast %418 : vector<1x1x128xf32> to vector<1x128xf32>
    %c1_152 = arith.constant 1 : index
    %c0_153 = arith.constant 0 : index
    %c0_154 = arith.constant 0 : index
    %420 = vector.load %arg16[%c1_152, %c0_153, %c0_154] : memref<2x1x128xf32, #tpu.memory_space<vmem>>, vector<1x1x128xf32>
    %421 = vector.shape_cast %420 : vector<1x1x128xf32> to vector<1x128xf32>
    %cst_155 = arith.constant dense<0.000000e+00> : vector<32xf32>
    %422 = vector.multi_reduction <add>, %417, %cst_155 [1] : vector<32x128xf32> to vector<32xf32>
    %423 = vector.shape_cast %422 : vector<32xf32> to vector<32x1xf32>
    %cst_156 = arith.constant 1.280000e+02 : f32
    %424 = vector.broadcast %cst_156 : f32 to vector<32x1xf32>
    %425 = arith.divf %423, %424 : vector<32x1xf32>
    %426 = vector.broadcast %425 : vector<32x1xf32> to vector<32x128xf32>
    %427 = arith.subf %417, %426 : vector<32x128xf32>
    %428 = arith.mulf %427, %427 : vector<32x128xf32>
    %cst_157 = arith.constant dense<0.000000e+00> : vector<32xf32>
    %429 = vector.multi_reduction <add>, %428, %cst_157 [1] : vector<32x128xf32> to vector<32xf32>
    %430 = vector.shape_cast %429 : vector<32xf32> to vector<32x1xf32>
    %cst_158 = arith.constant 1.270000e+02 : f32
    %431 = vector.broadcast %cst_158 : f32 to vector<32x1xf32>
    %432 = arith.divf %430, %431 : vector<32x1xf32>
    %433 = math.sqrt %432 : vector<32x1xf32>
    %434 = vector.broadcast %419 : vector<1x128xf32> to vector<32x128xf32>
    %435 = arith.mulf %434, %427 : vector<32x128xf32>
    %cst_159 = arith.constant 9.99999997E-7 : f32
    %436 = vector.broadcast %cst_159 : f32 to vector<32x1xf32>
    %437 = arith.addf %433, %436 : vector<32x1xf32>
    %438 = vector.broadcast %437 : vector<32x1xf32> to vector<32x128xf32>
    %439 = arith.divf %435, %438 : vector<32x128xf32>
    %440 = vector.broadcast %421 : vector<1x128xf32> to vector<32x128xf32>
    %441 = arith.addf %439, %440 : vector<32x128xf32>
    %c0_160 = arith.constant 0 : index
    %c0_161 = arith.constant 0 : index
    %442 = vector.load %arg23[%c0_160, %c0_161] : memref<32x128xf32, #tpu.memory_space<vmem>>, vector<32x128xf32>
    tpu.vector_store %arg23[%c0_160, %c0_161], %441 {strides = array<i32>} : memref<32x128xf32, #tpu.memory_space<vmem>>, vector<32x128xf32>,
    %c0_162 = arith.constant 0 : index
    %c0_163 = arith.constant 0 : index
    %443 = vector.load %arg17[%c0_162, %c0_163] : memref<128x128xf32, #tpu.memory_space<vmem>>, vector<128x128xf32>
    %444 = arith.truncf %441 : vector<32x128xf32> to vector<32x128xbf16>
    %445 = arith.truncf %443 : vector<128x128xf32> to vector<128x128xbf16>
    %cst_164 = arith.constant dense<0.000000e+00> : vector<32x128xf32>
    %446 = tpu.matmul %444, %445, %cst_164 {dimension_numbers = #tpu.dot_dimension_numbers<[1], [0], [0], [1], [0, 0, 1, 1], [], []>} : vector<32x128xbf16>, vector<128x128xbf16>, vector<32x128xf32> -> vector<32x128xf32>
    %c0_165 = arith.constant 0 : index
    %c0_166 = arith.constant 0 : index
    %447 = vector.load %arg18[%c0_165, %c0_166] : memref<1x128xf32, #tpu.memory_space<vmem>>, vector<1x128xf32>
    %448 = vector.broadcast %447 : vector<1x128xf32> to vector<32x128xf32>
    %449 = arith.addf %446, %448 : vector<32x128xf32>
    %cst_167 = arith.constant 5.000000e-01 : f32
    %450 = vector.broadcast %cst_167 : f32 to vector<32x128xf32>
    %451 = arith.mulf %450, %449 : vector<32x128xf32>
    %cst_168 = arith.constant 4.471500e-02 : f32
    %452 = vector.broadcast %cst_168 : f32 to vector<32x128xf32>
    %453 = arith.mulf %452, %449 : vector<32x128xf32>
    %454 = arith.mulf %453, %449 : vector<32x128xf32>
    %455 = arith.mulf %454, %449 : vector<32x128xf32>
    %456 = arith.addf %449, %455 : vector<32x128xf32>
    %cst_169 = arith.constant 0.797884583 : f32
    %457 = vector.broadcast %cst_169 : f32 to vector<32x128xf32>
    %458 = arith.mulf %457, %456 : vector<32x128xf32>
    %459 = math.tanh %458 : vector<32x128xf32>
    %cst_170 = arith.constant 1.000000e+00 : f32
    %460 = vector.broadcast %cst_170 : f32 to vector<32x128xf32>
    %461 = arith.addf %460, %459 : vector<32x128xf32>
    %462 = arith.mulf %451, %461 : vector<32x128xf32>
    %c0_171 = arith.constant 0 : index
    %c0_172 = arith.constant 0 : index
    %463 = vector.load %arg19[%c0_171, %c0_172] : memref<1x128xf32, #tpu.memory_space<vmem>>, vector<1x128xf32>
    %c0_173 = arith.constant 0 : index
    %c0_174 = arith.constant 0 : index
    %464 = vector.load %arg20[%c0_173, %c0_174] : memref<1x128xf32, #tpu.memory_space<vmem>>, vector<1x128xf32>
    %cst_175 = arith.constant dense<0.000000e+00> : vector<32xf32>
    %465 = vector.multi_reduction <add>, %462, %cst_175 [1] : vector<32x128xf32> to vector<32xf32>
    %466 = vector.shape_cast %465 : vector<32xf32> to vector<32x1xf32>
    %cst_176 = arith.constant 1.280000e+02 : f32
    %467 = vector.broadcast %cst_176 : f32 to vector<32x1xf32>
    %468 = arith.divf %466, %467 : vector<32x1xf32>
    %469 = vector.broadcast %468 : vector<32x1xf32> to vector<32x128xf32>
    %470 = arith.subf %462, %469 : vector<32x128xf32>
    %471 = arith.mulf %470, %470 : vector<32x128xf32>
    %cst_177 = arith.constant dense<0.000000e+00> : vector<32xf32>
    %472 = vector.multi_reduction <add>, %471, %cst_177 [1] : vector<32x128xf32> to vector<32xf32>
    %473 = vector.shape_cast %472 : vector<32xf32> to vector<32x1xf32>
    %cst_178 = arith.constant 1.270000e+02 : f32
    %474 = vector.broadcast %cst_178 : f32 to vector<32x1xf32>
    %475 = arith.divf %473, %474 : vector<32x1xf32>
    %476 = math.sqrt %475 : vector<32x1xf32>
    %477 = vector.broadcast %463 : vector<1x128xf32> to vector<32x128xf32>
    %478 = arith.mulf %477, %470 : vector<32x128xf32>
    %cst_179 = arith.constant 9.99999997E-7 : f32
    %479 = vector.broadcast %cst_179 : f32 to vector<32x1xf32>
    %480 = arith.addf %476, %479 : vector<32x1xf32>
    %481 = vector.broadcast %480 : vector<32x1xf32> to vector<32x128xf32>
    %482 = arith.divf %478, %481 : vector<32x128xf32>
    %483 = vector.broadcast %464 : vector<1x128xf32> to vector<32x128xf32>
    %484 = arith.addf %482, %483 : vector<32x128xf32>
    %c0_180 = arith.constant 0 : index
    %c0_181 = arith.constant 0 : index
    %485 = vector.load %arg21[%c0_180, %c0_181] : memref<128x512xf32, #tpu.memory_space<vmem>>, vector<128x512xf32>
    %486 = arith.truncf %484 : vector<32x128xf32> to vector<32x128xbf16>
    %487 = arith.truncf %485 : vector<128x512xf32> to vector<128x512xbf16>
    %cst_182 = arith.constant dense<0.000000e+00> : vector<32x512xf32>
    %488 = tpu.matmul %486, %487, %cst_182 {dimension_numbers = #tpu.dot_dimension_numbers<[1], [0], [0], [1], [0, 0, 1, 1], [], []>} : vector<32x128xbf16>, vector<128x512xbf16>, vector<32x512xf32> -> vector<32x512xf32>
    %c0_183 = arith.constant 0 : index
    %c0_184 = arith.constant 0 : index
    %489 = vector.load %arg22[%c0_183, %c0_184] : memref<1x512xf32, #tpu.memory_space<vmem>>, vector<1x512xf32>
    %490 = vector.broadcast %489 : vector<1x512xf32> to vector<32x512xf32>
    %491 = arith.addf %488, %490 : vector<32x512xf32>
    %c0_185 = arith.constant 0 : index
    %c0_186 = arith.constant 0 : index
    %492 = vector.load %arg2[%c0_185, %c0_186] : memref<32x1xi32, #tpu.memory_space<vmem>>, vector<32x1xi32>
    %cst_187 = arith.constant dense<0xFF800000> : vector<32xf32>
    %493 = vector.multi_reduction <maximumf>, %491, %cst_187 [1] : vector<32x512xf32> to vector<32xf32>
    %494 = vector.shape_cast %493 : vector<32xf32> to vector<32x1xf32>
    %495 = vector.broadcast %494 : vector<32x1xf32> to vector<32x512xf32>
    %496 = arith.subf %491, %495 : vector<32x512xf32>
    %497 = math.exp %496 : vector<32x512xf32>
    %cst_188 = arith.constant dense<0.000000e+00> : vector<32xf32>
    %498 = vector.multi_reduction <add>, %497, %cst_188 [1] : vector<32x512xf32> to vector<32xf32>
    %499 = vector.shape_cast %498 : vector<32xf32> to vector<32x1xf32>
    %500 = math.log %499 : vector<32x1xf32>
    %501 = arith.addf %500, %494 : vector<32x1xf32>
    %502 = tpu.iota {dimensions = array<i32: 1>} : vector<32x512xi32>
    %503 = vector.broadcast %492 : vector<32x1xi32> to vector<32x512xi32>
    %504 = arith.cmpi eq, %502, %503 : vector<32x512xi32>
    %cst_189 = arith.constant 0.000000e+00 : f32
    %505 = vector.broadcast %cst_189 : f32 to vector<32x512xf32>
    %506 = arith.select %504, %491, %505 : vector<32x512xi1>, vector<32x512xf32>
    %cst_190 = arith.constant dense<0.000000e+00> : vector<32xf32>
    %507 = vector.multi_reduction <add>, %506, %cst_190 [1] : vector<32x512xf32> to vector<32xf32>
    %508 = vector.shape_cast %507 : vector<32xf32> to vector<32x1xf32>
    %509 = vector.broadcast %494 : vector<32x1xf32> to vector<32x512xf32>
    %510 = arith.cmpf oeq, %491, %509 : vector<32x512xf32>
    %c512_i32 = arith.constant 512 : i32
    %511 = vector.broadcast %c512_i32 : i32 to vector<32x512xi32>
    %512 = arith.select %510, %502, %511 : vector<32x512xi1>, vector<32x512xi32>
    %cst_191 = arith.constant dense<2147483647> : vector<32xi32>
    %513 = vector.multi_reduction <minsi>, %512, %cst_191 [1] : vector<32x512xi32> to vector<32xi32>
    %514 = vector.shape_cast %513 : vector<32xi32> to vector<32x1xi32>
    %c0_i32 = arith.constant 0 : i32
    %515 = vector.broadcast %c0_i32 : i32 to vector<32x1xi32>
    %516 = arith.cmpi sgt, %492, %515 : vector<32x1xi32>
    %517 = arith.extui %516 : vector<32x1xi1> to vector<32x1xi32>
    %518 = arith.sitofp %517 : vector<32x1xi32> to vector<32x1xf32>
    %519 = arith.subf %501, %508 : vector<32x1xf32>
    %520 = arith.mulf %519, %518 : vector<32x1xf32>
    %521 = arith.cmpi eq, %514, %492 : vector<32x1xi32>
    %cst_192 = arith.constant 1.000000e+00 : f32
    %cst_193 = arith.constant 0.000000e+00 : f32
    %522 = vector.broadcast %cst_192 : f32 to vector<32x1xf32>
    %523 = vector.broadcast %cst_193 : f32 to vector<32x1xf32>
    %524 = arith.select %521, %522, %523 : vector<32x1xi1>, vector<32x1xf32>
    %525 = arith.mulf %524, %518 : vector<32x1xf32>
    %526 = tpu.iota {dimensions = array<i32: 1>} : vector<1x128xi32>
    %c0_i32_194 = arith.constant 0 : i32
    %527 = vector.broadcast %c0_i32_194 : i32 to vector<1x128xi32>
    %528 = arith.cmpi eq, %526, %527 : vector<1x128xi32>
    %529 = vector.shape_cast %520 : vector<32x1xf32> to vector<1x32x1xf32>
    %cst_195 = arith.constant dense<0.000000e+00> : vector<1xf32>
    %530 = vector.multi_reduction <add>, %529, %cst_195 [1, 2] : vector<1x32x1xf32> to vector<1xf32>
    %531 = vector.shape_cast %530 : vector<1xf32> to vector<1x1x1xf32>
    %532 = vector.extract %531[0, 0, 0] : f32 from vector<1x1x1xf32>
    %533 = vector.broadcast %532 : f32 to vector<1x1xf32>
    %cst_196 = arith.constant 0.000000e+00 : f32
    %534 = vector.shape_cast %533 : vector<1x1xf32> to vector<1x1xf32>
    %535 = vector.broadcast %534 : vector<1x1xf32> to vector<1x128xf32>
    %536 = vector.broadcast %cst_196 : f32 to vector<1x128xf32>
    %537 = arith.select %528, %535, %536 : vector<1x128xi1>, vector<1x128xf32>
    %c1_i32 = arith.constant 1 : i32
    %538 = vector.broadcast %c1_i32 : i32 to vector<1x128xi32>
    %539 = arith.cmpi eq, %526, %538 : vector<1x128xi32>
    %540 = vector.shape_cast %525 : vector<32x1xf32> to vector<1x32x1xf32>
    %cst_197 = arith.constant dense<0.000000e+00> : vector<1xf32>
    %541 = vector.multi_reduction <add>, %540, %cst_197 [1, 2] : vector<1x32x1xf32> to vector<1xf32>
    %542 = vector.shape_cast %541 : vector<1xf32> to vector<1x1x1xf32>
    %543 = vector.extract %542[0, 0, 0] : f32 from vector<1x1x1xf32>
    %544 = vector.broadcast %543 : f32 to vector<1x1xf32>
    %cst_198 = arith.constant 0.000000e+00 : f32
    %545 = vector.shape_cast %544 : vector<1x1xf32> to vector<1x1xf32>
    %546 = vector.broadcast %545 : vector<1x1xf32> to vector<1x128xf32>
    %547 = vector.broadcast %cst_198 : f32 to vector<1x128xf32>
    %548 = arith.select %539, %546, %547 : vector<1x128xi1>, vector<1x128xf32>
    %549 = arith.addf %537, %548 : vector<1x128xf32>
    %c2_i32 = arith.constant 2 : i32
    %550 = vector.broadcast %c2_i32 : i32 to vector<1x128xi32>
    %551 = arith.cmpi eq, %526, %550 : vector<1x128xi32>
    %552 = vector.shape_cast %518 : vector<32x1xf32> to vector<1x32x1xf32>
    %cst_199 = arith.constant dense<0.000000e+00> : vector<1xf32>
    %553 = vector.multi_reduction <add>, %552, %cst_199 [1, 2] : vector<1x32x1xf32> to vector<1xf32>
    %554 = vector.shape_cast %553 : vector<1xf32> to vector<1x1x1xf32>
    %555 = vector.extract %554[0, 0, 0] : f32 from vector<1x1x1xf32>
    %556 = vector.broadcast %555 : f32 to vector<1x1xf32>
    %cst_200 = arith.constant 0.000000e+00 : f32
    %557 = vector.shape_cast %556 : vector<1x1xf32> to vector<1x1xf32>
    %558 = vector.broadcast %557 : vector<1x1xf32> to vector<1x128xf32>
    %559 = vector.broadcast %cst_200 : f32 to vector<1x128xf32>
    %560 = arith.select %551, %558, %559 : vector<1x128xi1>, vector<1x128xf32>
    %561 = arith.addf %549, %560 : vector<1x128xf32>
    %c0_201 = arith.constant 0 : index
    %c0_202 = arith.constant 0 : index
    %562 = vector.load %arg24[%c0_201, %c0_202] : memref<1x128xf32, #tpu.memory_space<vmem>>, vector<1x128xf32>
    tpu.vector_store %arg24[%c0_201, %c0_202], %561 {strides = array<i32>} : memref<1x128xf32, #tpu.memory_space<vmem>>, vector<1x128xf32>,
    return
  }
}

</mosaic_0001>

<bundles_post_ra>
// kernel: model_forward.1
= control target key start
LH: loop header
LB: loop body
LE: loop exit
PB: predicated region body
PF: predicated region fallthrough
CT: control target
= control target key end

     0   :  { %s8105_s0 = inlined_call_operand.vmem [shape: f32[32,128], index: 0, kind: input, shape index: {}]   ;;  %s8106_s1 = inlined_call_operand.vmem [shape: f32[2,1,16], index: 1, kind: input, shape index: {}]   ;;  %s8107_s2 = inlined_call_operand.vmem [shape: s32[32,1], index: 2, kind: input, shape index: {}]   ;;  %s8108_s3 = inlined_call_operand.vmem [shape: f32[1,128], index: 3, kind: input, shape index: {}]   ;;  %s8109_s4 = inlined_call_operand.vmem [shape: f32[1,128], index: 4, kind: input, shape index: {}]   ;;  %s8110_s5 = inlined_call_operand.vmem [shape: f32[2,128,384], index: 5, kind: input, shape index: {}]   ;;  %s8111_s6 = inlined_call_operand.vmem [shape: f32[2,1,384], index: 6, kind: input, shape index: {}]   ;;  %s8112_s7 = inlined_call_operand.hbm [shape: f32[2,128,128], index: 7, kind: input, shape index: {}]   ;;  %s8113_s8 = inlined_call_operand.vmem [shape: f32[2,1,128], index: 8, kind: input, shape index: {}]   ;;  %s8114_s9 = inlined_call_operand.vmem [shape: f32[2,1,128], index: 9, kind: input, shape index: {}]   ;;  %s8115_s10 = inlined_call_operand.vmem [shape: f32[2,1,128], index: 10, kind: input, shape index: {}]   ;;  %s8116_s11 = inlined_call_operand.vmem [shape: f32[2,128,256], index: 11, kind: input, shape index: {}]   ;;  %s8117_s12 = inlined_call_operand.vmem [shape: f32[2,1,256], index: 12, kind: input, shape index: {}]   ;;  %s8118_s13 = inlined_call_operand.hbm [shape: f32[2,256,128], index: 13, kind: input, shape index: {}]   ;;  %s8119_s14 = inlined_call_operand.hbm [shape: f32[2,1,128], index: 14, kind: input, shape index: {}]   ;;  %s8120_s15 = inlined_call_operand.hbm [shape: f32[2,1,128], index: 15, kind: input, shape index: {}]   ;;  %s8121_s16 = inlined_call_operand.hbm [shape: f32[2,1,128], index: 16, kind: input, shape index: {}]   ;;  %s8122_s17 = inlined_call_operand.hbm [shape: f32[128,128], index: 17, kind: input, shape index: {}]   ;;  %s8123_s18 = inlined_call_operand.hbm [shape: f32[1,128], index: 18, kind: input, shape index: {}]   ;;  %s8124_s19 = inlined_call_operand.hbm [shape: f32[1,128], index: 19, kind: input, shape index: {}]   ;;  %s8125_s20 = inlined_call_operand.hbm [shape: f32[1,128], index: 20, kind: input, shape index: {}]   ;;  %s8126_s21 = inlined_call_operand.vmem [shape: f32[128,512], index: 21, kind: input, shape index: {}]   ;;  %s8127_s22 = inlined_call_operand.vmem [shape: f32[1,512], index: 22, kind: input, shape index: {}]   ;;  %s8128_s23 = inlined_call_operand.vmem [shape: f32[32,128], index: 23, kind: output, shape index: {0}]   ;;  %s8129_s24 = inlined_call_operand.vmem [shape: f32[1,128], index: 24, kind: output, shape index: {1}]  }
   0x1   :  { %8136 = sst [smem:[#allocation21_spill]] %s8105_s0 }
   0x2   :  { %8137 = sst [smem:[#allocation22_spill]] %s8106_s1 }
   0x3   :  { %8138 = sst [smem:[#allocation23_spill]] %s8107_s2 }
   0x4   :  { %8139 = sst [smem:[#allocation24_spill]] %s8108_s3 }
   0x5   :  { %8140 = sst [smem:[#allocation25_spill]] %s8109_s4 }
   0x6   :  { %8141 = sst [smem:[#allocation26_spill]] %s8110_s5 }
   0x7   :  { %8142 = sst [smem:[#allocation27_spill]] %s8111_s6 }
   0x8   :  { %8143 = sst [smem:[#allocation28_spill]] %s8112_s7 }
   0x9   :  { %8144 = sst [smem:[#allocation29_spill]] %s8113_s8 }
   0xa   :  { %30 = vsyncpa [#allocation3], 0 }
   0xb   :  { %31 = vsyncpa [#allocation5], 0 }
   0xc   :  { %32 = vsyncpa [#allocation8], 0 }
   0xd   :  { %33 = vsyncpa [#allocation11], 0 }
   0xe   :  { %34 = vsyncpa [#allocation14], 0  ;;  %s5991_s5 = smov [#allocation4]  }
   0xf   :  { %s76_s26 = sshll.u32 %s5991_s5, 4  ;;  %s77_s26 = int_to_ptr.vmem [resolvable:$true] %s76_s26 }
  0x10   :  { %s5809_s27 = scalar_lea.vmem %s77_s26, 8192  ;;  %p5814_p1 = scmp.lt.s32.totalorder %s77_s26, %s77_s26 }
  0x11   :  { %p5810_p0 = scmp.ne.s32.totalorder %s77_s26, %s5809_s27  ;;  %p5815_p2 = scmp.lt.s32.totalorder %s5809_s27, %s5809_s27 }
  0x13   :  { %p5816_p3 = por %p5815_p2, %p5814_p1 }
  0x15   :  { %p5817_p4 = pnand %p5816_p3, %p5810_p0 }
  0x17   :  { %5820 = shalt.err (!%p5817_p4)
}
  0x18   :  { %s5992_s28 = smov 128   ;;  %s5993_s6 = smov 8  }
  0x19   :  { %82 = dma.hbm_to_vmem [thread:$0]  %s8118_s13, 8192, %s77_s26, [#allocation5], %s5992_s28, %s5992_s28, %s5993_s6  }
  0x1a   :  { %s5994_s0 = smov [#allocation7]   ;;  %s5995_s30 = smov [#allocation10]  }
  0x1b   :  { %s100_s7 = sshll.u32 %s5994_s0, 4  ;;  %s124_s3 = sshll.u32 %s5995_s30, 4  ;;  %s101_s7 = int_to_ptr.vmem [resolvable:$true] %s100_s7  ;;  %s125_s3 = int_to_ptr.vmem [resolvable:$true] %s124_s3 }
  0x1c   :  { %s5829_s25 = scalar_lea.vmem %s101_s7, 32  ;;  %p5834_p6 = scmp.lt.s32.totalorder %s101_s7, %s101_s7 }
  0x1d   :  { %p5830_p5 = scmp.ne.s32.totalorder %s101_s7, %s5829_s25  ;;  %p5835_p7 = scmp.lt.s32.totalorder %s5829_s25, %s5829_s25 }
  0x1f   :  { %p5836_p8 = por %p5835_p7, %p5834_p6 }
  0x21   :  { %p5837_p9 = pnand %p5836_p8, %p5830_p5 }
  0x23   :  { %5840 = shalt.err (!%p5837_p9)
}
  0x24   :  { %s5996_s8 = smov 16   ;;  %s5997_s4 = smov 1  }
  0x25   :  { %106 = dma.hbm_to_vmem [thread:$0]  %s8120_s15, 32, %s101_s7, [#allocation8], %s5996_s8, %s5996_s8, %s5997_s4  }
  0x26   :  { %s5849_s13 = scalar_lea.vmem %s125_s3, 2048  ;;  %p5854_p11 = scmp.lt.s32.totalorder %s125_s3, %s125_s3 }
  0x27   :  { %p5850_p10 = scmp.ne.s32.totalorder %s125_s3, %s5849_s13  ;;  %p5855_p12 = scmp.lt.s32.totalorder %s5849_s13, %s5849_s13 }
  0x29   :  { %p5856_p13 = por %p5855_p12, %p5854_p11 }
  0x2b   :  { %p5857_p0 = pnand %p5856_p13, %p5850_p10 }
  0x2d   :  { %5860 = shalt.err (!%p5857_p0)
}
  0x2e   :  { %130 = dma.hbm_to_vmem [thread:$0]  %s8122_s17, 2048, %s125_s3, [#allocation11], %s5992_s28, %s5992_s28, %s5993_s6  }
  0x2f   :  { %s5998_s2 = smov [#allocation13]   ;;  %s5999_s0 = smov [#allocation2]  }
  0x30   :  { %s147_s29 = sshll.u32 %s5998_s2, 4  ;;  %s54_s15 = sshll.u32 %s5999_s0, 4  ;;  %s148_s29 = int_to_ptr.vmem [resolvable:$true] %s147_s29  ;;  %s55_s15 = int_to_ptr.vmem [resolvable:$true] %s54_s15 }
  0x31   :  { %s5869_s7 = scalar_lea.vmem %s148_s29, 16  ;;  %s5873_s30 = scalar_lea.vmem %s148_s29, 32 }
  0x32   :  { %p5870_p1 = scmp.ne.s32.totalorder %s148_s29, %s5869_s7  ;;  %p5874_p2 = scmp.lt.s32.totalorder %s148_s29, %s148_s29 }
  0x33   :  { %p5875_p3 = scmp.lt.s32.totalorder %s5873_s30, %s5869_s7 }
  0x35   :  { %p5876_p4 = por %p5875_p3, %p5874_p2 }
  0x37   :  { %p5877_p5 = pnand %p5876_p4, %p5870_p1 }
  0x39   :  { %5880 = shalt.err (!%p5877_p5)
}
  0x3a   :  { %150 = dma.hbm_to_vmem [thread:$0]  %s8124_s19, 16, %s148_s29, [#allocation14]  }
  0x3b   :  { %s5889_s5 = scalar_lea.vmem %s55_s15, 4096  ;;  %p5894_p7 = scmp.lt.s32.totalorder %s55_s15, %s55_s15 }
  0x3c   :  { %p5890_p6 = scmp.ne.s32.totalorder %s55_s15, %s5889_s5  ;;  %p5895_p8 = scmp.lt.s32.totalorder %s5889_s5, %s5889_s5 }
  0x3e   :  { %p5896_p9 = por %p5895_p8, %p5894_p7 }
  0x40   :  { %p5897_p10 = pnand %p5896_p9, %p5890_p6 }
  0x42   :  { %5900 = shalt.err (!%p5897_p10)
}
  0x43   :  { %s8145_s13 = sld [smem:[#allocation28_spill]]  ;;  %s6000_s26 = smov [#allocation6]  }
  0x44   :  { %s88_s27 = sshll.u32 %s6000_s26, 4  ;;  %s6001_s2 = smov [#allocation9]   ;;  %s89_s27 = int_to_ptr.vmem [resolvable:$true] %s88_s27 }
  0x45   :  { %s112_s19 = sshll.u32 %s6001_s2, 4  ;;  %s5909_s29 = scalar_lea.vmem %s89_s27, 32  ;;  %s113_s19 = int_to_ptr.vmem [resolvable:$true] %s112_s19 }
  0x46   :  { %p5910_p11 = scmp.ne.s32.totalorder %s89_s27, %s5909_s29  ;;  %p5914_p12 = scmp.lt.s32.totalorder %s89_s27, %s89_s27 }
  0x47   :  { %p5915_p13 = scmp.lt.s32.totalorder %s5909_s29, %s5909_s29 }
  0x49   :  { %60 = dma.hbm_to_vmem [thread:$0]  %s8145_s13, 4096, %s55_s15, [#allocation3], %s5992_s28, %s5992_s28, %s5993_s6  }
  0x4a   :  { %p5916_p0 = por %p5915_p13, %p5914_p12 }
  0x4c   :  { %p5917_p1 = pnand %p5916_p0, %p5910_p11 }
  0x4e   :  { %5920 = shalt.err (!%p5917_p1)
}
  0x4f   :  { %94 = dma.hbm_to_vmem [thread:$0]  %s8119_s14, 32, %s89_s27, [#allocation5], %s5996_s8, %s5996_s8, %s5997_s4  }
  0x50   :  { %s5929_s28 = scalar_lea.vmem %s113_s19, 32  ;;  %p5934_p3 = scmp.lt.s32.totalorder %s113_s19, %s113_s19 }
  0x51   :  { %p5930_p2 = scmp.ne.s32.totalorder %s113_s19, %s5929_s28  ;;  %p5935_p4 = scmp.lt.s32.totalorder %s5929_s28, %s5929_s28 }
  0x53   :  { %p5936_p5 = por %p5935_p4, %p5934_p3 }
  0x55   :  { %p5937_p6 = pnand %p5936_p5, %p5930_p2 }
  0x57   :  { %5940 = shalt.err (!%p5937_p6)
}
  0x58   :  { %118 = dma.hbm_to_vmem [thread:$0]  %s8121_s16, 32, %s113_s19, [#allocation8], %s5996_s8, %s5996_s8, %s5997_s4  }
  0x59   :  { %s6002_s30 = smov [#allocation12]   ;;  %s6003_s1 = smov [#allocation15]  }
  0x5a   :  { %s137_s25 = sshll.u32 %s6002_s30, 4  ;;  %s157_s14 = sshll.u32 %s6003_s1, 4  ;;  %s138_s25 = int_to_ptr.vmem [resolvable:$true] %s137_s25  ;;  %s158_s14 = int_to_ptr.vmem [resolvable:$true] %s157_s14 }
  0x5b   :  { %s5949_s5 = scalar_lea.vmem %s138_s25, 16  ;;  %s5953_s17 = scalar_lea.vmem %s138_s25, 32 }
  0x5c   :  { %p5950_p7 = scmp.ne.s32.totalorder %s138_s25, %s5949_s5  ;;  %p5954_p8 = scmp.lt.s32.totalorder %s138_s25, %s138_s25 }
  0x5d   :  { %p5955_p9 = scmp.lt.s32.totalorder %s5953_s17, %s5949_s5 }
  0x5f   :  { %p5956_p10 = por %p5955_p9, %p5954_p8 }
  0x61   :  { %p5957_p11 = pnand %p5956_p10, %p5950_p7 }
  0x63   :  { %5960 = shalt.err (!%p5957_p11)
}
  0x64   :  { %140 = dma.hbm_to_vmem [thread:$0]  %s8123_s18, 16, %s138_s25, [#allocation11]  }
  0x65   :  { %s5969_s26 = scalar_lea.vmem %s158_s14, 16  ;;  %s5973_s16 = scalar_lea.vmem %s158_s14, 32 }
  0x66   :  { %p5970_p12 = scmp.ne.s32.totalorder %s158_s14, %s5969_s26  ;;  %p5974_p13 = scmp.lt.s32.totalorder %s158_s14, %s158_s14 }
  0x67   :  { %p5975_p0 = scmp.lt.s32.totalorder %s5973_s16, %s5969_s26 }
  0x69   :  { %p5976_p1 = por %p5975_p0, %p5974_p13 }
  0x6b   :  { %p5977_p2 = pnand %p5976_p1, %p5970_p12 }
  0x6d   :  { %5980 = shalt.err (!%p5977_p2)
}
  0x6e   :  { %160 = dma.hbm_to_vmem [thread:$0]  %s8125_s20, 16, %s158_s14, [#allocation14]  }
  0x6f   :  { %5981 = dma.done.wait [#allocation3], 4096  }
  0x70   :  { %5982 = vsyncadd [#allocation3], 4294963200 }
  0x71   :  { %5983 = dma.done.wait [#allocation5], 8224  }
  0x72   :  { %5984 = vsyncadd [#allocation5], 4294959072 }
  0x73   :  { %5985 = dma.done.wait [#allocation8], 64  }
  0x74   :  { %5986 = vsyncadd [#allocation8], 4294967232 }
  0x75   :  { %5987 = dma.done.wait [#allocation11], 2064  }
  0x76   :  { %5988 = vsyncadd [#allocation11], 4294965232 }
  0x77   :  { %5989 = dma.done.wait [#allocation14], 32  }
  0x78   :  { %5990 = vsyncadd [#allocation14], 4294967264  ;;  %s8146_s2 = sld [smem:[#allocation21_spill]]  ;;  %v6004_v60 = vmov 0   ;;  %vm6006_vm8 = vmmov 0   ;;  %vm503_vm9 = vcmask 261120  }
  0x79   :  { %s8147_s30 = sld [smem:[#allocation26_spill]]  ;;  %431 = vmatprep.mubr.bf16.mxu0 %v6004_v60  ;;  %5494 = vset.pattern.permute.xlu1 %v6004_v60  ;;  %s6007_s29 = smov 96   ;;  %vm942_vm10 = vcmask 130048   ;;  %vm1336_vm11 = vcmask 523264   ;;  %vm1339_vm12 = vcmask 785408  }
  0x7a   :  { %5493 = vset.pattern.permute.xlu0 %v6004_v60  ;;  %s8148_s16 = sld [smem:[#allocation24_spill]]  ;;  %s6008_s20 = smov 64  }
  0x7b   :  { %s8149_s18 = sld [smem:[#allocation25_spill]]  ;;  %s6009_s0 = smov 32  }
  0x7c   :  { %s8150_s19 = sld [smem:[#allocation27_spill]] }
  0x7d   :  { %s8151_s6 = sld [smem:[#allocation22_spill]] }
  0x7e   :  { %v193_v0 = vld [vmem:[%s8146_s2] sm:$0xff]  ;;  %v195_v1 = vld [vmem:[%s8146_s2 + $0x10] sm:$0xff]  ;;  %v194_v2 = vld [vmem:[%s8146_s2 + $0x8] sm:$0xff]  ;;  %s8152_s5 = sld [smem:[#allocation29_spill]] }
  0x7f   :  { %199 = vadd.xlane.f32.xlu0 %v193_v0  ;;  %203 = vadd.xlane.f32.xlu1 %v195_v1  ;;  %v196_v3 = vld [vmem:[%s8146_s2 + $0x18] sm:$0xff]  ;;  %v354_v21 = vld [vmem:[%s8147_s30 + $0x170] sm:$0xff]  ;;  %v353_v24 = vld [vmem:[%s8147_s30 + $0x168] sm:$0xff] }
  0x80   :  { %v351_v20 = vld [vmem:[%s8147_s30 + $0x158] sm:$0xff]  ;;  %v350_v23 = vld [vmem:[%s8147_s30 + $0x150] sm:$0xff]  ;;  %v345_v26 = vld [vmem:[%s8147_s30 + $0x128] sm:$0xff] }
  0x81   :  { %v380_v22 = vpack.c.bf16 %v354_v21, %v351_v20  ;;  %v379_v25 = vpack.c.bf16 %v353_v24, %v350_v23  ;;  %v348_v27 = vld [vmem:[%s8147_s30 + $0x140] sm:$0xff]  ;;  %v355_v30 = vld [vmem:[%s8147_s30 + $0x178] sm:$0xff]  ;;  %v342_v36 = vld [vmem:[%s8147_s30 + $0x110] sm:$0xff] }
  0x82   :  { %v352_v28 = vld [vmem:[%s8147_s30 + $0x160] sm:$0xff]  ;;  %v377_v29 = vpack.c.bf16 %v348_v27, %v345_v26  ;;  %v347_v32 = vld [vmem:[%s8147_s30 + $0x138] sm:$0xff]  ;;  %v346_v37 = vld [vmem:[%s8147_s30 + $0x130] sm:$0xff] }
  0x83   :  { %201 = vadd.xlane.f32.xlu0 %v194_v2  ;;  %205 = vadd.xlane.f32.xlu1 %v196_v3  ;;  %v344_v31 = vld [vmem:[%s8147_s30 + $0x120] sm:$0xff]  ;;  %v381_v33 = vpack.c.bf16 %v355_v30, %v352_v28  ;;  %v339_v35 = vld [vmem:[%s8147_s30 + $0xf8] sm:$0xff]  ;;  %v349_v39 = vld [vmem:[%s8147_s30 + $0x148] sm:$0xff] }
  0x84   :  { %399 = vmatprep.subr.bf16.mxu0 %v380_v22  ;;  %v376_v34 = vpack.c.bf16 %v347_v32, %v344_v31  ;;  %v374_v38 = vpack.c.bf16 %v342_v36, %v339_v35  ;;  %v338_v40 = vld [vmem:[%s8147_s30 + $0xf0] sm:$0xff]  ;;  %v341_v41 = vld [vmem:[%s8147_s30 + $0x108] sm:$0xff]  ;;  %v378_v42 = vpack.c.bf16 %v349_v39, %v346_v37  ;;  %v336_v45 = vld [vmem:[%s8147_s30 + $0xe0] sm:$0xff] }
  0x85   :  { %400 = vmatpush1.bf16.msra.mxu0 %v379_v25  ;;  %5116 = vmatprep.subr.bf16.mxu1 %v381_v33  ;;  %v373_v43 = vpack.c.bf16 %v341_v41, %v338_v40  ;;  %v333_v44 = vld [vmem:[%s8147_s30 + $0xc8] sm:$0xff]  ;;  %v340_v46 = vld [vmem:[%s8147_s30 + $0x100] sm:$0xff]  ;;  %v343_v48 = vld [vmem:[%s8147_s30 + $0x118] sm:$0xff] }
  0x86   :  { %401 = vmatprep.subr.bf16.mxu0 %v377_v29  ;;  %5117 = vmatpush3.bf16.msra.mxu1 %v381_v33  ;;  %v371_v47 = vpack.c.bf16 %v336_v45, %v333_v44  ;;  %v332_v49 = vld [vmem:[%s8147_s30 + $0xc0] sm:$0xff]  ;;  %v335_v50 = vld [vmem:[%s8147_s30 + $0xd8] sm:$0xff]  ;;  %v375_v51 = vpack.c.bf16 %v343_v48, %v340_v46  ;;  %v330_v54 = vld [vmem:[%s8147_s30 + $0xb0] sm:$0xff] }
  0x87   :  { %5118 = vmatprep.subr.bf16.mxu1 %v378_v42  ;;  %v370_v52 = vpack.c.bf16 %v335_v50, %v332_v49  ;;  %v327_v53 = vld [vmem:[%s8147_s30 + $0x98] sm:$0xff]  ;;  %v334_v55 = vld [vmem:[%s8147_s30 + $0xd0] sm:$0xff]  ;;  %v337_v57 = vld [vmem:[%s8147_s30 + $0xe8] sm:$0xff] }
  0x88   :  { %v368_v56 = vpack.c.bf16 %v330_v54, %v327_v53  ;;  %v326_v58 = vld [vmem:[%s8147_s30 + $0x90] sm:$0xff]  ;;  %v329_v59 = vld [vmem:[%s8147_s30 + $0xa8] sm:$0xff]  ;;  %v372_v61 = vpack.c.bf16 %v337_v57, %v334_v55  ;;  %v312_v21 = vld [vmem:[%s8147_s30 + $0x20] sm:$0xff] }
  0x89   :  { %402 = vmatpush1.bf16.msra.mxu0 %v376_v34  ;;  %v367_v62 = vpack.c.bf16 %v329_v59, %v326_v58  ;;  %v321_v63 = vld [vmem:[%s8147_s30 + $0x68] sm:$0xff]  ;;  %v316_v22 = vld [vmem:[%s8147_s30 + $0x40] sm:$0xff]  ;;  %v319_v23 = vld [vmem:[%s8147_s30 + $0x58] sm:$0xff] }
  0x8a   :  { %403 = vmatprep.subr.bf16.mxu0 %v374_v38  ;;  %5119 = vmatpush3.bf16.msra.mxu1 %v378_v42  ;;  %v309_v20 = vld [vmem:[%s8147_s30 + $0x8] sm:$0xff]  ;;  %v308_v26 = vld [vmem:[%s8147_s30] sm:$0xff]  ;;  %v311_v27 = vld [vmem:[%s8147_s30 + $0x18] sm:$0xff]  ;;  %v363_v28 = vpack.c.bf16 %v319_v23, %v316_v22  ;;  %v384_v23 = vlaneseq }
  0x8b   :  { %5120 = vmatprep.subr.bf16.mxu1 %v375_v51  ;;  %v359_v25 = vpack.c.bf16 %v312_v21, %v309_v20  ;;  %v358_v29 = vpack.c.bf16 %v311_v27, %v308_v26  ;;  %v310_v30 = vld [vmem:[%s8147_s30 + $0x10] sm:$0xff]  ;;  %v313_v31 = vld [vmem:[%s8147_s30 + $0x28] sm:$0xff]  ;;  %v382_v27 = vld [vmem:[%s8150_s19] sm:$0x7] }
  0x8c   :  { %v360_v32 = vpack.c.bf16 %v313_v31, %v310_v30 }
  0x8d   :  { %404 = vmatpush1.bf16.msra.mxu0 %v373_v43 }
  0x8e   :  { %405 = vmatprep.subr.bf16.mxu0 %v371_v47  ;;  %5121 = vmatpush3.bf16.msra.mxu1 %v375_v51 }
  0x8f   :  { %5122 = vmatprep.subr.bf16.mxu1 %v372_v61 }
  0x91   :  { %406 = vmatpush1.bf16.msra.mxu0 %v370_v52 }
  0x92   :  { %407 = vmatprep.subr.bf16.mxu0 %v368_v56  ;;  %5123 = vmatpush3.bf16.msra.mxu1 %v372_v61 }
  0x95   :  { %408 = vmatpush1.bf16.msra.mxu0 %v367_v62 }
 0x108   :  { %v200_v4 = vpop.xlane.xlu0 %199  ;;  %v204_v5 = vpop.xlane.xlu1 %203 }
 0x109   :  { %v208_v6 = vmul.f32 0.0078125, %v200_v4  ;;  %v210_v7 = vmul.f32 0.0078125, %v204_v5  ;;  %v320_v4 = vld [vmem:[%s8147_s30 + $0x60] sm:$0xff]  ;;  %v323_v5 = vld [vmem:[%s8147_s30 + $0x78] sm:$0xff] }
 0x10b   :  { %v6192_v8 = vsub.f32 %v193_v0, %v208_v6  ;;  %v6194_v9 = vsub.f32 %v195_v1, %v210_v7  ;;  %v324_v0 = vld [vmem:[%s8147_s30 + $0x80] sm:$0xff]  ;;  %v364_v7 = vpack.c.bf16 %v323_v5, %v320_v4 }
 0x10c   :  { %v202_v10 = vpop.xlane.xlu0 %201  ;;  %v206_v11 = vpop.xlane.xlu1 %205  ;;  %v328_v1 = vld [vmem:[%s8147_s30 + $0xa0] sm:$0xff] }
 0x10d   :  { %v209_v12 = vmul.f32 0.0078125, %v202_v10  ;;  %v216_v13 = vmul.f32 %v6192_v8, %v6192_v8  ;;  %v211_v14 = vmul.f32 0.0078125, %v206_v11  ;;  %v218_v15 = vmul.f32 %v6194_v9, %v6194_v9  ;;  %v315_v10 = vld [vmem:[%s8147_s30 + $0x38] sm:$0xff]  ;;  %v318_v11 = vld [vmem:[%s8147_s30 + $0x50] sm:$0xff] }
 0x10f   :  { %220 = vadd.xlane.f32.xlu0 %v216_v13  ;;  %v6200_v16 = vsub.f32 %v194_v2, %v209_v12  ;;  %v6202_v17 = vsub.f32 %v196_v3, %v211_v14  ;;  %v365_v2 = vpack.c.bf16 %v324_v0, %v321_v63  ;;  %v331_v3 = vld [vmem:[%s8147_s30 + $0xb8] sm:$0xff]  ;;  %v322_v12 = vld [vmem:[%s8147_s30 + $0x70] sm:$0xff]  ;;  %v362_v13 = vpack.c.bf16 %v318_v11, %v315_v10  ;;  %v325_v14 = vld [vmem:[%s8147_s30 + $0x88] sm:$0xff] }
 0x110   :  { %v369_v6 = vpack.c.bf16 %v331_v3, %v328_v1  ;;  %v4806_v10 = vld [vmem:[%s8149_s18] ss:$0 sm:$0xff] }
 0x111   :  { %v217_v18 = vmul.f32 %v6200_v16, %v6200_v16  ;;  %v219_v19 = vmul.f32 %v6202_v17, %v6202_v17  ;;  %409 = vmatprep.subr.bf16.mxu0 %v365_v2  ;;  %v4805_v2 = vld [vmem:[%s8148_s16] ss:$0 sm:$0xff] }
 0x112   :  { %5124 = vmatprep.subr.bf16.mxu1 %v369_v6  ;;  %410 = vmatpush1.bf16.msra.mxu0 %v364_v7  ;;  %v267_v4 = vmul.f32 %v4805_v2, %v6192_v8  ;;  %v268_v5 = vmul.f32 %v4805_v2, %v6200_v16 }
 0x113   :  { %224 = vadd.xlane.f32.xlu0 %v218_v15  ;;  %222 = vadd.xlane.f32.xlu1 %v217_v18  ;;  %v314_v15 = vld [vmem:[%s8147_s30 + $0x30] sm:$0xff]  ;;  %v317_v18 = vld [vmem:[%s8147_s30 + $0x48] sm:$0xff] }
 0x114   :  { %v361_v24 = vpack.c.bf16 %v317_v18, %v314_v15  ;;  %5125 = vmatpush3.bf16.msra.mxu1 %v369_v6  ;;  %411 = vmatprep.subr.bf16.mxu0 %v362_v13 }
 0x116   :  { %412 = vmatpush1.bf16.msra.mxu0 %v361_v24  ;;  %v6385_v24 = vshrl.u32 %v384_v23, 7 }
 0x117   :  { %226 = vadd.xlane.f32.xlu1 %v219_v19  ;;  %v366_v19 = vpack.c.bf16 %v325_v14, %v322_v12  ;;  %413 = vmatprep.subr.bf16.mxu0 %v359_v25  ;;  %v269_v12 = vmul.f32 %v4805_v2, %v6194_v9  ;;  %v270_v14 = vmul.f32 %v4805_v2, %v6202_v17  ;;  %v6005_v17 = vmov 0.0  }
 0x118   :  { %v6388_v25 = vsub.s32 0, %v6385_v24  ;;  %v6391_v26 = vsub.s32 2, %v6385_v24 }
 0x119   :  { %5126 = vmatprep.subr.bf16.mxu1 %v366_v19 }
 0x11a   :  { %5127 = vmatpush3.bf16.msra.mxu1 %v366_v19  ;;  %414 = vmatpush1.bf16.msra.mxu0 %v358_v29  ;;  %v387_v30 = vrot.slane %v382_v27, %v6388_v25  ;;  %v6401_v31 = vrot.slane %v382_v27, %v6391_v26 }
 0x11b   :  { %5128 = vmatprep.subr.bf16.mxu1 %v363_v28  ;;  %5142 = vmatprep.subr.bf16.mxu0 %v6005_v17 }
 0x11e   :  { %5129 = vmatpush3.bf16.msra.mxu1 %v363_v28  ;;  %v6397_v28 = vsub.s32 1, %v6385_v24 }
 0x11f   :  { %5130 = vmatprep.subr.bf16.mxu1 %v360_v32 }
 0x122   :  { %5131 = vmatpush3.bf16.msra.mxu1 %v360_v32 }
 0x123   :  { %5136 = vmatprep.subr.bf16.mxu1 %v6005_v17 }
 0x198   :  { %v221_v33 = vpop.xlane.xlu0 %220 }
 0x199   :  { %v229_v34 = vmul.f32 0.007874016, %v221_v33  ;;  %v391_v33 = vrot.slane %v382_v27, %v6397_v28 }
 0x19b   :  { %5495 = vrsqrt.f32 %v229_v34  ;;  %vm235_vm0 = vcmp.eq.f32.partialorder %v229_v34, inf  ;;  %v238_v43 = vand.u32 2147483648, %v229_v34  ;;  %vm237_vm1 = vcmp.eq.f32.partialorder %v229_v34, 0.0 }
 0x19c   :  { %v223_v35 = vpop.xlane.xlu1 %222  ;;  %v225_v36 = vpop.xlane.xlu0 %224 }
 0x19d   :  { %v230_v37 = vmul.f32 0.007874016, %v223_v35  ;;  %v231_v38 = vmul.f32 0.007874016, %v225_v36 }
 0x19f   :  { %5497 = vrsqrt.f32 %v230_v37  ;;  %vm242_vm2 = vcmp.eq.f32.partialorder %v230_v37, inf  ;;  %vm244_vm3 = vcmp.eq.f32.partialorder %v230_v37, 0.0  ;;  %v245_v50 = vand.u32 2147483648, %v230_v37 }
 0x1a0   :  { %5499 = vrsqrt.f32 %v231_v38  ;;  %v227_v39 = vpop.xlane.xlu1 %226  ;;  %vm249_vm4 = vcmp.eq.f32.partialorder %v231_v38, inf  ;;  %v252_v53 = vand.u32 2147483648, %v231_v38  ;;  %vm251_vm5 = vcmp.eq.f32.partialorder %v231_v38, 0.0 }
 0x1a1   :  { %v232_v40 = vmul.f32 0.007874016, %v227_v39 }
 0x1a3   :  { %5501 = vrsqrt.f32 %v232_v40  ;;  %vm256_vm6 = vcmp.eq.f32.partialorder %v232_v40, inf  ;;  %v259_v62 = vand.u32 2147483648, %v232_v40  ;;  %vm258_vm7 = vcmp.eq.f32.partialorder %v232_v40, 0.0 }
 0x1a8   :  { %v5496_v41 = vpop.eup %5495 }
 0x1a9   :  { %v234_v42 = vmul.f32 %v5496_v41, %v229_v34 }
 0x1ab   :  { %v236_v44 = vsel %vm235_vm0, %v229_v34, %v234_v42 }
 0x1ac   :  { %v5498_v45 = vpop.eup %5497  ;;  %v239_v46 = vsel %vm237_vm1, %v238_v43, %v236_v44 }
 0x1ad   :  { %v5500_v47 = vpop.eup %5499  ;;  %v271_v48 = vadd.f32 1e-06, %v239_v46  ;;  %v241_v49 = vmul.f32 %v5498_v45, %v230_v37 }
 0x1ae   :  { %v248_v51 = vmul.f32 %v5500_v47, %v231_v38 }
 0x1af   :  { %v243_v52 = vsel %vm242_vm2, %v230_v37, %v241_v49  ;;  %5503 = vrcp.f32 %v271_v48 }
 0x1b0   :  { %v5502_v54 = vpop.eup %5501  ;;  %v246_v55 = vsel %vm244_vm3, %v245_v50, %v243_v52  ;;  %v250_v56 = vsel %vm249_vm4, %v231_v38, %v248_v51 }
 0x1b1   :  { %v272_v57 = vadd.f32 1e-06, %v246_v55  ;;  %v253_v58 = vsel %vm251_vm5, %v252_v53, %v250_v56  ;;  %v255_v59 = vmul.f32 %v5502_v54, %v232_v40 }
 0x1b2   :  { %v273_v61 = vadd.f32 1e-06, %v253_v58 }
 0x1b3   :  { %v257_v63 = vsel %vm256_vm6, %v232_v40, %v255_v59  ;;  %5505 = vrcp.f32 %v272_v57 }
 0x1b4   :  { %v260_v0 = vsel %vm258_vm7, %v259_v62, %v257_v63  ;;  %5507 = vrcp.f32 %v273_v61 }
 0x1b5   :  { %v274_v1 = vadd.f32 1e-06, %v260_v0 }
 0x1b7   :  { %5509 = vrcp.f32 %v274_v1 }
 0x1bc   :  { %v5504_v3 = vpop.eup %5503 }
 0x1bd   :  { %v276_v6 = vmul.f32 %v5504_v3, %v267_v4 }
 0x1bf   :  { %v6365_v15 = vadd.f32 %v4806_v10, %v276_v6 }
 0x1c0   :  { %v5506_v7 = vpop.eup %5505 }
 0x1c1   :  { %v5508_v11 = vpop.eup %5507  ;;  %v278_v13 = vmul.f32 %v5506_v7, %v268_v5 }
 0x1c2   :  { %v280_v19 = vmul.f32 %v5508_v11, %v269_v12 }
 0x1c3   :  { %v6367_v18 = vadd.f32 %v4806_v10, %v278_v13 }
 0x1c4   :  { %v5510_v8 = vpop.eup %5509  ;;  %v6371_v21 = vadd.f32 %v4806_v10, %v280_v19 }
 0x1c5   :  { %v356_v16 = vpack.c.bf16 %v6367_v18, %v6365_v15  ;;  %v282_v20 = vmul.f32 %v5510_v8, %v270_v14 }
 0x1c7   :  { %432 = vmatmul.mubr.bf16.vlgmr.msra.gmra.mxu0 %v356_v16  ;;  %5132 = vmatprep.mubr.bf16.mxu1 %v356_v16  ;;  %v6373_v22 = vadd.f32 %v4806_v10, %v282_v20 }
 0x1c8   :  { %441 = vmatprep.mubr.bf16.mxu0 %v6004_v60 }
 0x1c9   :  { %v357_v9 = vpack.c.bf16 %v6373_v22, %v6371_v21 }
 0x1cb   :  { %5133 = vmatmul.mubr.bf16.vlgmr.msra.gmra.mxu1 %v357_v9 }
 0x1cc   :  { %5138 = vmatprep.mubr.msk.bf16.mxu1 %vm6006_vm8, %v6005_v17 }
 0x1cf   :  { %442 = vmatmul.mubr.bf16.gmra.mxu0 %v357_v9 }
 0x1d0   :  { %5144 = vmatprep.mubr.msk.bf16.mxu0 %vm6006_vm8, %v6005_v17 }
 0x287   :  { %v433_v29 = vpop.f32.mrf.mxu0 }
 0x288   :  { %v434_v36 = vadd.f32 %v433_v29, %v387_v30 }
 0x289   :  { %v435_v32 = vpop.f32.mrf.mxu0 }
 0x28a   :  { %v436_v41 = vadd.f32 %v435_v32, %v391_v33 }
 0x28b   :  { %v437_v34 = vpop.f32.mrf.mxu0  ;;  %v5134_v35 = vpop.f32.mrf.mxu1 }
 0x28c   :  { %v438_v37 = vadd.f32 %v437_v34, %v387_v30  ;;  %v495_v38 = vadd.f32 %v5134_v35, %v6401_v31 }
 0x28d   :  { %v439_v39 = vpop.f32.mrf.mxu0  ;;  %v6405_v40 = vpop.f32.mrf.mxu1 }
 0x28e   :  { %v501_v42 = vpack.c.bf16 %v438_v37, %v434_v36  ;;  %v440_v43 = vadd.f32 %v439_v39, %v391_v33  ;;  %v487_v8 = vadd.f32 %v6405_v40, %v6401_v31 }
 0x28f   :  { %v443_v44 = vpop.f32.mrf.mxu0  ;;  %v5135_v45 = vpop.f32.mrf.mxu1 }
 0x290   :  { %v502_v46 = vpack.c.bf16 %v440_v43, %v436_v41  ;;  %v498_v47 = vadd.f32 %v5135_v45, %v6401_v31  ;;  %552 = vrot.lane.b32.xlu1 %v501_v42, %s6007_s29  ;;  %v444_v57 = vadd.f32 %v443_v44, %v387_v30 }
 0x291   :  { %v445_v48 = vpop.f32.mrf.mxu0  ;;  %v489_v11 = vpop.f32.mrf.mxu1 }
 0x292   :  { %v6409_v49 = vpack.c.bf16 %v498_v47, %v495_v38  ;;  %555 = vrot.lane.b32.xlu0 %v502_v46, %s6007_s29  ;;  %v508_v50 = vsel %vm503_vm9, %v502_v46, 0  ;;  %v446_v53 = vadd.f32 %v445_v48, %v391_v33  ;;  %v490_v14 = vadd.f32 %v489_v11, %v6401_v31  ;;  %v4809_v11 = vld [vmem:[%s8151_s6 + $0x1] ss:$0 sm:$0xff] }
 0x293   :  { %v447_v51 = vpop.f32.mrf.mxu0  ;;  %5137 = vmatpush3.bf16.xpose.msra.mxu1 %v508_v50 }
 0x294   :  { %606 = vrot.lane.b32.xlu1 %v502_v46, %s6008_s20  ;;  %5148 = vmatprep.subr.bf16.mxu1 %v6005_v17  ;;  %v448_v55 = vadd.f32 %v447_v51, %v387_v30  ;;  %v6456_v20 = vpack.c.bf16 %v490_v14, %v487_v8  ;;  %v4807_v30 = vld [vmem:[%s8151_s6] ss:$0 sm:$0xff] }
 0x295   :  { %v449_v52 = vpop.f32.mrf.mxu0 }
 0x296   :  { %v450_v54 = vadd.f32 %v449_v52, %v391_v33  ;;  %604 = vrot.lane.b32.xlu0 %v501_v42, %s6008_s20  ;;  %v706_v58 = vpack.c.bf16 %v448_v55, %v444_v57 }
 0x298   :  { %v707_v56 = vpack.c.bf16 %v450_v54, %v446_v53  ;;  %657 = vrot.lane.b32.xlu1 %v502_v46, %s6009_s0 }
 0x29a   :  { %5139 = vmatmul.mubr.msk.bf16.vlgmr.msra.gmra.mxu1 %vm503_vm9, %v501_v42  ;;  %759 = vrot.lane.b32.xlu0 %v707_v56, %s6007_s29  ;;  %v712_v5 = vsel %vm503_vm9, %v707_v56, 0 }
 0x29b   :  { %5150 = vmatprep.mubr.msk.bf16.mxu1 %vm6006_vm8, %v6005_v17 }
 0x29c   :  { %655 = vrot.lane.b32.xlu1 %v501_v42, %s6009_s0 }
 0x29e   :  { %756 = vrot.lane.b32.xlu0 %v706_v58, %s6007_s29 }
 0x2a0   :  { %810 = vrot.lane.b32.xlu1 %v707_v56, %s6008_s20 }
 0x2a2   :  { %808 = vrot.lane.b32.xlu0 %v706_v58, %s6008_s20 }
 0x2a4   :  { %861 = vrot.lane.b32.xlu1 %v707_v56, %s6009_s0 }
 0x2a8   :  { %859 = vrot.lane.b32.xlu1 %v706_v58, %s6009_s0 }
 0x302   :  { %v553_v59 = vpop.permute.xlu1 %552 }
 0x304   :  { %v556_v61 = vpop.permute.xlu0 %555 }
 0x305   :  { %v561_v62 = vsel %vm503_vm9, %v556_v61, 0 }
 0x306   :  { %v607_v63 = vpop.permute.xlu1 %606  ;;  %5143 = vmatpush3.bf16.xpose.msra.mxu0 %v561_v62 }
 0x307   :  { %v612_v0 = vsel %vm503_vm9, %v607_v63, 0  ;;  %5154 = vmatprep.subr.bf16.mxu0 %v6005_v17 }
 0x308   :  { %5149 = vmatpush3.bf16.xpose.msra.mxu1 %v612_v0  ;;  %v605_v2 = vpop.permute.xlu0 %604 }
 0x309   :  { %5160 = vmatprep.subr.bf16.mxu1 %v6005_v17 }
 0x30a   :  { %v658_v1 = vpop.permute.xlu1 %657 }
 0x30b   :  { %v663_v3 = vsel %vm503_vm9, %v658_v1, 0 }
 0x30c   :  { %v760_v6 = vpop.permute.xlu0 %759 }
 0x30d   :  { %5145 = vmatmul.mubr.msk.bf16.vlgmr.msra.gmra.mxu0 %vm503_vm9, %v553_v59  ;;  %v765_v10 = vsel %vm503_vm9, %v760_v6, 0 }
 0x30e   :  { %v656_v4 = vpop.permute.xlu1 %655  ;;  %5155 = vmatpush3.bf16.xpose.msra.mxu0 %v663_v3  ;;  %5156 = vmatprep.mubr.msk.bf16.mxu0 %vm6006_vm8, %v6005_v17 }
 0x30f   :  { %5151 = vmatmul.mubr.msk.bf16.vlgmr.msra.gmra.mxu1 %vm503_vm9, %v605_v2  ;;  %5166 = vmatprep.subr.bf16.mxu0 %v6005_v17 }
 0x310   :  { %5161 = vmatpush3.bf16.xpose.msra.mxu1 %v712_v5  ;;  %5162 = vmatprep.mubr.msk.bf16.mxu1 %vm6006_vm8, %v6005_v17  ;;  %v757_v13 = vpop.permute.xlu0 %756 }
 0x311   :  { %5172 = vmatprep.subr.bf16.mxu1 %v6005_v17 }
 0x312   :  { %v811_v7 = vpop.permute.xlu1 %810 }
 0x313   :  { %v816_v12 = vsel %vm503_vm9, %v811_v7, 0 }
 0x314   :  { %v809_v9 = vpop.permute.xlu0 %808 }
 0x315   :  { %5157 = vmatmul.mubr.msk.bf16.vlgmr.msra.gmra.mxu0 %vm503_vm9, %v656_v4 }
 0x316   :  { %5167 = vmatpush3.bf16.xpose.msra.mxu0 %v765_v10  ;;  %5168 = vmatprep.mubr.msk.bf16.mxu0 %vm6006_vm8, %v6005_v17  ;;  %v862_v19 = vpop.permute.xlu1 %861 }
 0x317   :  { %5163 = vmatmul.mubr.msk.bf16.vlgmr.msra.gmra.mxu1 %vm503_vm9, %v706_v58  ;;  %5178 = vmatprep.subr.bf16.mxu0 %v6005_v17  ;;  %v867_v16 = vsel %vm503_vm9, %v862_v19, 0 }
 0x318   :  { %5173 = vmatpush3.bf16.xpose.msra.mxu1 %v816_v12  ;;  %5174 = vmatprep.mubr.msk.bf16.mxu1 %vm6006_vm8, %v6005_v17 }
 0x319   :  { %5184 = vmatprep.subr.bf16.mxu1 %v6005_v17 }
 0x31a   :  { %v860_v27 = vpop.permute.xlu1 %859 }
 0x31d   :  { %5169 = vmatmul.mubr.msk.bf16.vlgmr.msra.gmra.mxu0 %vm503_vm9, %v757_v13 }
 0x31e   :  { %5179 = vmatpush3.bf16.xpose.msra.mxu0 %v867_v16  ;;  %5180 = vmatprep.mubr.msk.bf16.mxu0 %vm6006_vm8, %v6005_v17 }
 0x31f   :  { %5175 = vmatmul.mubr.msk.bf16.vlgmr.msra.gmra.mxu1 %vm503_vm9, %v809_v9  ;;  %5190 = vmatprep.subr.bf16.mxu0 %v6005_v17 }
 0x320   :  { %5185 = vmatpush3.bf16.msra.mxu1 %v6456_v20  ;;  %5186 = vmatprep.mubr.msk.bf16.mxu1 %vm6006_vm8, %v6005_v17 }
 0x321   :  { %5196 = vmatprep.subr.bf16.mxu1 %v6005_v17 }
 0x325   :  { %5181 = vmatmul.mubr.msk.bf16.vlgmr.msra.gmra.mxu0 %vm503_vm9, %v860_v27 }
 0x326   :  { %5192 = vmatprep.mubr.msk.bf16.mxu0 %vm6006_vm8, %v6005_v17 }
 0x35a   :  { %v544_v29 = vpop.f32.mrf.mxu1 }
 0x35b   :  { %v910_v31 = vmul.f32 0.17677669, %v544_v29 }
 0x35c   :  { %v5140_v32 = vpop.f32.mrf.mxu1 }
 0x35d   :  { %v6472_v33 = vadd.f32 %v4807_v30, %v910_v31 }
 0x35e   :  { %v547_v34 = vpop.f32.mrf.mxu1 }
 0x35f   :  { %v911_v35 = vmul.f32 0.17677669, %v547_v34  ;;  %v943_v36 = vsel %vm942_vm10, %v6472_v33, -inf }
 0x360   :  { %v5141_v37 = vpop.f32.mrf.mxu1  ;;  %944 = vmax.xlane.f32.xlu0 %v943_v36 }
 0x361   :  { %v6476_v38 = vadd.f32 %v4807_v30, %v911_v35 }
 0x363   :  { %v946_v39 = vsel %vm942_vm10, %v6476_v38, -inf }
 0x364   :  { %947 = vmax.xlane.f32.xlu1 %v946_v39 }
 0x3cd   :  { %v597_v40 = vpop.f32.mrf.mxu0 }
 0x3ce   :  { %v912_v41 = vmul.f32 0.17677669, %v597_v40 }
 0x3cf   :  { %v5146_v42 = vpop.f32.mrf.mxu0  ;;  %v648_v43 = vpop.f32.mrf.mxu1 }
 0x3d0   :  { %v6480_v44 = vadd.f32 %v4807_v30, %v912_v41  ;;  %v914_v47 = vmul.f32 0.17677669, %v648_v43 }
 0x3d1   :  { %v600_v45 = vpop.f32.mrf.mxu0  ;;  %v5152_v46 = vpop.f32.mrf.mxu1 }
 0x3d2   :  { %v913_v48 = vmul.f32 0.17677669, %v600_v45  ;;  %v949_v50 = vsel %vm942_vm10, %v6480_v44, -inf  ;;  %v6490_v61 = vadd.f32 %v4807_v30, %v914_v47 }
 0x3d3   :  { %950 = vmax.xlane.f32.xlu0 %v949_v50  ;;  %v5147_v51 = vpop.f32.mrf.mxu0  ;;  %v651_v52 = vpop.f32.mrf.mxu1 }
 0x3d4   :  { %v915_v53 = vmul.f32 0.17677669, %v651_v52  ;;  %v6484_v54 = vadd.f32 %v4807_v30, %v913_v48  ;;  %v955_v6 = vsel %vm942_vm10, %v6490_v61, -inf }
 0x3d5   :  { %v5153_v55 = vpop.f32.mrf.mxu1  ;;  %v699_v56 = vpop.f32.mrf.mxu0 }
 0x3d6   :  { %v916_v57 = vmul.f32 0.17677669, %v699_v56  ;;  %v952_v58 = vsel %vm942_vm10, %v6484_v54, -inf  ;;  %v6488_v59 = vadd.f32 %v4807_v30, %v915_v53 }
 0x3d7   :  { %953 = vmax.xlane.f32.xlu0 %v952_v58  ;;  %v5158_v62 = vpop.f32.mrf.mxu0  ;;  %v748_v63 = vpop.f32.mrf.mxu1 }
 0x3d8   :  { %v958_v0 = vsel %vm942_vm10, %v6488_v59, -inf  ;;  %v6494_v3 = vadd.f32 %v4807_v30, %v916_v57  ;;  %v918_v4 = vmul.f32 0.17677669, %v748_v63 }
 0x3d9   :  { %v702_v1 = vpop.f32.mrf.mxu0  ;;  %959 = vmax.xlane.f32.xlu1 %v958_v0  ;;  %v5164_v2 = vpop.f32.mrf.mxu1 }
 0x3da   :  { %v917_v5 = vmul.f32 0.17677669, %v702_v1  ;;  %v961_v8 = vsel %vm942_vm10, %v6494_v3, -inf  ;;  %v6507_v27 = vadd.f32 %v4809_v11, %v918_v4 }
 0x3db   :  { %v5159_v7 = vpop.f32.mrf.mxu0  ;;  %956 = vmax.xlane.f32.xlu0 %v955_v6  ;;  %v751_v10 = vpop.f32.mrf.mxu1 }
 0x3dc   :  { %v919_v12 = vmul.f32 0.17677669, %v751_v10  ;;  %v6501_v13 = vadd.f32 %v4807_v30, %v917_v5  ;;  %v967_v39 = vsel %vm942_vm10, %v6507_v27, -inf }
 0x3dd   :  { %v5165_v14 = vpop.f32.mrf.mxu1  ;;  %v801_v19 = vpop.f32.mrf.mxu0 }
 0x3de   :  { %v920_v16 = vmul.f32 0.17677669, %v801_v19  ;;  %v964_v9 = vsel %vm942_vm10, %v6501_v13, -inf  ;;  %v6509_v29 = vadd.f32 %v4809_v11, %v919_v12 }
 0x3df   :  { %962 = vmax.xlane.f32.xlu0 %v961_v8  ;;  %965 = vmax.xlane.f32.xlu1 %v964_v9  ;;  %v5170_v31 = vpop.f32.mrf.mxu0  ;;  %v852_v32 = vpop.f32.mrf.mxu1 }
 0x3e0   :  { %v6511_v35 = vadd.f32 %v4809_v11, %v920_v16  ;;  %v922_v36 = vmul.f32 0.17677669, %v852_v32  ;;  %v970_v40 = vsel %vm942_vm10, %v6509_v29, -inf }
 0x3e1   :  { %v804_v34 = vpop.f32.mrf.mxu0  ;;  %v5176_v30 = vpop.f32.mrf.mxu1 }
 0x3e2   :  { %v921_v37 = vmul.f32 0.17677669, %v804_v34  ;;  %v973_v48 = vsel %vm942_vm10, %v6511_v35, -inf  ;;  %v6523_v52 = vadd.f32 %v4809_v11, %v922_v36 }
 0x3e3   :  { %968 = vmax.xlane.f32.xlu0 %v967_v39  ;;  %971 = vmax.xlane.f32.xlu1 %v970_v40  ;;  %v5171_v41 = vpop.f32.mrf.mxu0  ;;  %v855_v42 = vpop.f32.mrf.mxu1 }
 0x3e4   :  { %v923_v43 = vmul.f32 0.17677669, %v855_v42  ;;  %v6517_v45 = vadd.f32 %v4809_v11, %v921_v37  ;;  %v979_v57 = vsel %vm942_vm10, %v6523_v52, -inf }
 0x3e5   :  { %v5177_v46 = vpop.f32.mrf.mxu1  ;;  %v903_v47 = vpop.f32.mrf.mxu0 }
 0x3e6   :  { %v924_v50 = vmul.f32 0.17677669, %v903_v47  ;;  %v976_v51 = vsel %vm942_vm10, %v6517_v45, -inf  ;;  %v6525_v53 = vadd.f32 %v4809_v11, %v923_v43 }
 0x3e7   :  { %974 = vmax.xlane.f32.xlu0 %v973_v48  ;;  %977 = vmax.xlane.f32.xlu1 %v976_v51  ;;  %v5182_v55 = vpop.f32.mrf.mxu0 }
 0x3e8   :  { %v982_v58 = vsel %vm942_vm10, %v6525_v53, -inf  ;;  %v6531_v62 = vadd.f32 %v4809_v11, %v924_v50 }
 0x3e9   :  { %v906_v56 = vpop.f32.mrf.mxu0  ;;  %v945_v1 = vpop.xlane.xlu0 %944 }
 0x3ea   :  { %v985_v0 = vsel %vm942_vm10, %v6531_v62, -inf  ;;  %v991_v2 = vsub.f32 %v6472_v33, %v945_v1  ;;  %v925_v5 = vmul.f32 0.17677669, %v906_v56 }
 0x3eb   :  { %v5183_v63 = vpop.f32.mrf.mxu0  ;;  %980 = vmax.xlane.f32.xlu0 %v979_v57  ;;  %983 = vmax.xlane.f32.xlu1 %v982_v58 }
 0x3ec   :  { %v1007_v4 = vmul.f32 1.442695, %v991_v2  ;;  %v6542_v6 = vadd.f32 %v4809_v11, %v925_v5 }
 0x3ee   :  { %5511 = vpow2.f32 %v1007_v4  ;;  %v988_v10 = vsel %vm942_vm10, %v6542_v6, -inf }
 0x3ef   :  { %986 = vmax.xlane.f32.xlu0 %v985_v0 }
 0x3fb   :  { %v6544_v7 = vpop.eup %5511 }
 0x3fc   :  { %1215 = vrot.lane.b32.xlu1 %v6456_v20, %s6008_s20  ;;  %v1039_v12 = vsel %vm942_vm10, %v6544_v7, 0.0 }
 0x400   :  { %1263 = vrot.lane.b32.xlu1 %v6456_v20, %s6009_s0 }
 0x405   :  { %1167 = vrot.lane.b32.xlu0 %v6456_v20, %s6007_s29  ;;  %v948_v20 = vpop.xlane.xlu1 %947 }
 0x406   :  { %v992_v33 = vsub.f32 %v6476_v38, %v948_v20 }
 0x408   :  { %v1009_v14 = vmul.f32 1.442695, %v992_v33 }
 0x40a   :  { %5513 = vpow2.f32 %v1009_v14 }
 0x417   :  { %v6553_v11 = vpop.eup %5513 }
 0x418   :  { %v1042_v19 = vsel %vm942_vm10, %v6553_v11, 0.0 }
 0x424   :  { %989 = vmax.xlane.f32.xlu1 %v988_v10  ;;  %1040 = vadd.xlane.f32.xlu0 %v1039_v12 }
 0x435   :  { %1390 = vrot.lane.b32.xlu1 %v6409_v49, %s6007_s29 }
 0x459   :  { %1043 = vadd.xlane.f32.xlu1 %v1042_v19 }
 0x45c   :  { %v951_v8 = vpop.xlane.xlu0 %950 }
 0x45d   :  { %v993_v16 = vsub.f32 %v6480_v44, %v951_v8 }
 0x45f   :  { %v1011_v9 = vmul.f32 1.442695, %v993_v16 }
 0x460   :  { %v954_v31 = vpop.xlane.xlu0 %953 }
 0x461   :  { %5515 = vpow2.f32 %v1011_v9  ;;  %v994_v32 = vsub.f32 %v6484_v54, %v954_v31 }
 0x462   :  { %v960_v34 = vpop.xlane.xlu1 %959 }
 0x463   :  { %v1013_v30 = vmul.f32 1.442695, %v994_v32  ;;  %v996_v38 = vsub.f32 %v6488_v59, %v960_v34 }
 0x464   :  { %v957_v36 = vpop.xlane.xlu0 %956 }
 0x465   :  { %5517 = vpow2.f32 %v1013_v30  ;;  %v1017_v37 = vmul.f32 1.442695, %v996_v38  ;;  %v995_v39 = vsub.f32 %v6490_v61, %v957_v36 }
 0x467   :  { %5519 = vpow2.f32 %v1017_v37  ;;  %v1015_v40 = vmul.f32 1.442695, %v995_v39 }
 0x468   :  { %v966_v41 = vpop.xlane.xlu1 %965  ;;  %v963_v42 = vpop.xlane.xlu0 %962 }
 0x469   :  { %5521 = vpow2.f32 %v1015_v40  ;;  %v998_v44 = vsub.f32 %v6501_v13, %v966_v41  ;;  %v997_v43 = vsub.f32 %v6494_v3, %v963_v42 }
 0x46b   :  { %v1021_v46 = vmul.f32 1.442695, %v998_v44  ;;  %v1019_v54 = vmul.f32 1.442695, %v997_v43 }
 0x46c   :  { %v972_v47 = vpop.xlane.xlu1 %971  ;;  %v969_v48 = vpop.xlane.xlu0 %968 }
 0x46d   :  { %5523 = vpow2.f32 %v1021_v46  ;;  %v1000_v59 = vsub.f32 %v6509_v29, %v972_v47  ;;  %v999_v50 = vsub.f32 %v6507_v27, %v969_v48 }
 0x46e   :  { %v6565_v51 = vpop.eup %5515  ;;  %5525 = vpow2.f32 %v1019_v54 }
 0x46f   :  { %v1025_v61 = vmul.f32 1.442695, %v1000_v59  ;;  %v1023_v55 = vmul.f32 1.442695, %v999_v50  ;;  %v1045_v56 = vsel %vm942_vm10, %v6565_v51, 0.0 }
 0x470   :  { %v978_v13 = vpop.xlane.xlu1 %977  ;;  %1046 = vadd.xlane.f32.xlu0 %v1045_v56  ;;  %v975_v3 = vpop.xlane.xlu0 %974 }
 0x471   :  { %5527 = vpow2.f32 %v1025_v61  ;;  %v1002_v57 = vsub.f32 %v6517_v45, %v978_v13  ;;  %v1001_v58 = vsub.f32 %v6511_v35, %v975_v3 }
 0x472   :  { %v6571_v63 = vpop.eup %5517  ;;  %5529 = vpow2.f32 %v1023_v55 }
 0x473   :  { %v1029_v27 = vmul.f32 1.442695, %v1002_v57  ;;  %v1027_v29 = vmul.f32 1.442695, %v1001_v58  ;;  %v1048_v0 = vsel %vm942_vm10, %v6571_v63, 0.0 }
 0x474   :  { %v6575_v1 = vpop.eup %5519  ;;  %v984_v2 = vpop.xlane.xlu1 %983  ;;  %1049 = vadd.xlane.f32.xlu1 %v1048_v0 }
 0x475   :  { %v981_v4 = vpop.xlane.xlu0 %980  ;;  %5531 = vpow2.f32 %v1029_v27  ;;  %v1004_v5 = vsub.f32 %v6525_v53, %v984_v2  ;;  %v1054_v20 = vsel %vm942_vm10, %v6575_v1, 0.0 }
 0x476   :  { %v1003_v45 = vsub.f32 %v6523_v52, %v981_v4  ;;  %v6579_v10 = vpop.eup %5521  ;;  %5533 = vpow2.f32 %v1027_v29 }
 0x477   :  { %v1033_v35 = vmul.f32 1.442695, %v1004_v5  ;;  %v1051_v33 = vsel %vm942_vm10, %v6579_v10, 0.0 }
 0x478   :  { %v1031_v12 = vmul.f32 1.442695, %v1003_v45  ;;  %1055 = vadd.xlane.f32.xlu1 %v1054_v20  ;;  %1052 = vadd.xlane.f32.xlu0 %v1051_v33  ;;  %v1216_v54 = vpop.permute.xlu1 %1215 }
 0x479   :  { %v987_v14 = vpop.xlane.xlu0 %986  ;;  %5535 = vpow2.f32 %v1033_v35 }
 0x47a   :  { %v1005_v19 = vsub.f32 %v6531_v62, %v987_v14  ;;  %v6586_v53 = vpop.eup %5523  ;;  %5537 = vpow2.f32 %v1031_v12 }
 0x47b   :  { %v6588_v52 = vpop.eup %5525  ;;  %v1060_v16 = vsel %vm942_vm10, %v6586_v53, 0.0 }
 0x47c   :  { %v1035_v8 = vmul.f32 1.442695, %v1005_v19  ;;  %1061 = vadd.xlane.f32.xlu1 %v1060_v16  ;;  %v1057_v9 = vsel %vm942_vm10, %v6588_v52, 0.0  ;;  %v1264_v47 = vpop.permute.xlu1 %1263 }
 0x47d   :  { %v1168_v31 = vpop.permute.xlu0 %1167  ;;  %1058 = vadd.xlane.f32.xlu0 %v1057_v9 }
 0x47e   :  { %5539 = vpow2.f32 %v1035_v8  ;;  %5191 = vmatpush3.bf16.msra.mxu0 %v1168_v31  ;;  %v6594_v32 = vpop.eup %5527 }
 0x47f   :  { %5202 = vmatprep.subr.bf16.mxu0 %v6005_v17  ;;  %v6597_v62 = vpop.eup %5529  ;;  %v1066_v34 = vsel %vm942_vm10, %v6594_v32, 0.0 }
 0x480   :  { %1067 = vadd.xlane.f32.xlu1 %v1066_v34  ;;  %v1063_v30 = vsel %vm942_vm10, %v6597_v62, 0.0 }
 0x481   :  { %1064 = vadd.xlane.f32.xlu0 %v1063_v30 }
 0x482   :  { %v6603_v38 = vpop.eup %5531 }
 0x483   :  { %v6605_v36 = vpop.eup %5533  ;;  %v1072_v37 = vsel %vm942_vm10, %v6603_v38, 0.0 }
 0x484   :  { %1073 = vadd.xlane.f32.xlu1 %v1072_v37  ;;  %v1069_v39 = vsel %vm942_vm10, %v6605_v36, 0.0 }
 0x485   :  { %1070 = vadd.xlane.f32.xlu0 %v1069_v39 }
 0x486   :  { %v6611_v40 = vpop.eup %5535 }
 0x487   :  { %v6613_v41 = vpop.eup %5537  ;;  %v1078_v42 = vsel %vm942_vm10, %v6611_v40, 0.0 }
 0x488   :  { %1079 = vadd.xlane.f32.xlu1 %v1078_v42  ;;  %v1075_v44 = vsel %vm942_vm10, %v6613_v41, 0.0 }
 0x489   :  { %1076 = vadd.xlane.f32.xlu0 %v1075_v44 }
 0x48b   :  { %v6619_v43 = vpop.eup %5539 }
 0x48c   :  { %v1081_v46 = vsel %vm942_vm10, %v6619_v43, 0.0 }
 0x48d   :  { %1082 = vadd.xlane.f32.xlu0 %v1081_v46 }
 0x4a3   :  { %1438 = vrot.lane.b32.xlu0 %v6409_v49, %s6008_s20 }
 0x4ad   :  { %v990_v48 = vpop.xlane.xlu1 %989  ;;  %v1041_v56 = vpop.xlane.xlu0 %1040 }
 0x4ae   :  { %v1006_v59 = vsub.f32 %v6542_v6, %v990_v48 }
 0x4b0   :  { %v1037_v50 = vmul.f32 1.442695, %v1006_v59 }
 0x4b1   :  { %v6632_v13 = vpop.permute.xlu1 %1390 }
 0x4b2   :  { %5541 = vpow2.f32 %v1037_v50 }
 0x4b3   :  { %5543 = vrcp.f32 %v1041_v56 }
 0x4bf   :  { %v6626_v61 = vpop.eup %5541 }
 0x4c0   :  { %v1084_v55 = vsel %vm942_vm10, %v6626_v61, 0.0  ;;  %v5544_v57 = vpop.eup %5543 }
 0x4c1   :  { %1085 = vadd.xlane.f32.xlu1 %v1084_v55  ;;  %v1103_v6 = vmul.f32 %v5544_v57, %v6544_v7 }
 0x4d2   :  { %1486 = vrot.lane.b32.xlu1 %v6409_v49, %s6009_s0 }
 0x4e2   :  { %v1044_v3 = vpop.xlane.xlu1 %1043 }
 0x4e3   :  { %5545 = vrcp.f32 %v1044_v3 }
 0x4f0   :  { %v5546_v58 = vpop.eup %5545 }
 0x4f1   :  { %v1104_v27 = vmul.f32 %v5546_v58, %v6553_v11 }
 0x4f3   :  { %v1119_v29 = vpack.c.bf16 %v1104_v27, %v1103_v6 }
 0x4f5   :  { %5187 = vmatmul.mubr.msk.bf16.vlgmr.msra.gmra.mxu1 %vm942_vm10, %v1119_v29 }
 0x4f6   :  { %5197 = vmatpush3.bf16.msra.mxu1 %v1216_v54  ;;  %5198 = vmatprep.mubr.msk.bf16.mxu1 %vm6006_vm8, %v6005_v17 }
 0x4f7   :  { %5208 = vmatprep.subr.bf16.mxu1 %v6005_v17 }
 0x4f9   :  { %v1047_v0 = vpop.xlane.xlu0 %1046 }
 0x4fa   :  { %5547 = vrcp.f32 %v1047_v0 }
 0x4fd   :  { %v1050_v2 = vpop.xlane.xlu1 %1049 }
 0x4fe   :  { %5549 = vrcp.f32 %v1050_v2 }
 0x501   :  { %v1056_v4 = vpop.xlane.xlu1 %1055  ;;  %v1053_v5 = vpop.xlane.xlu0 %1052 }
 0x502   :  { %5551 = vrcp.f32 %v1056_v4 }
 0x503   :  { %5553 = vrcp.f32 %v1053_v5 }
 0x505   :  { %v1062_v7 = vpop.xlane.xlu1 %1061 }
 0x506   :  { %5555 = vrcp.f32 %v1062_v7  ;;  %v1059_v11 = vpop.xlane.xlu0 %1058 }
 0x507   :  { %5557 = vrcp.f32 %v1059_v11  ;;  %v5548_v45 = vpop.eup %5547 }
 0x508   :  { %v1105_v33 = vmul.f32 %v5548_v45, %v6565_v51 }
 0x509   :  { %v1068_v35 = vpop.xlane.xlu1 %1067 }
 0x50a   :  { %5559 = vrcp.f32 %v1068_v35  ;;  %v1065_v12 = vpop.xlane.xlu0 %1064 }
 0x50b   :  { %v5550_v20 = vpop.eup %5549  ;;  %5561 = vrcp.f32 %v1065_v12 }
 0x50c   :  { %v1106_v14 = vmul.f32 %v5550_v20, %v6571_v63 }
 0x50d   :  { %v1074_v19 = vpop.xlane.xlu1 %1073 }
 0x50e   :  { %5563 = vrcp.f32 %v1074_v19  ;;  %v1071_v8 = vpop.xlane.xlu0 %1070  ;;  %v1165_v16 = vpack.c.bf16 %v1106_v14, %v1105_v33 }
 0x50f   :  { %v5552_v9 = vpop.eup %5551  ;;  %5565 = vrcp.f32 %v1071_v8 }
 0x510   :  { %v5554_v31 = vpop.eup %5553  ;;  %5193 = vmatmul.mubr.msk.bf16.vlgmr.msra.gmra.mxu0 %vm942_vm10, %v1165_v16  ;;  %v1108_v34 = vmul.f32 %v5552_v9, %v6575_v1 }
 0x511   :  { %5203 = vmatpush3.bf16.msra.mxu0 %v1264_v47  ;;  %v1080_v30 = vpop.xlane.xlu1 %1079  ;;  %v1107_v37 = vmul.f32 %v5554_v31, %v6579_v10  ;;  %5204 = vmatprep.mubr.msk.bf16.mxu0 %vm6006_vm8, %v6005_v17 }
 0x512   :  { %5567 = vrcp.f32 %v1080_v30  ;;  %v1077_v51 = vpop.xlane.xlu0 %1076  ;;  %5214 = vmatprep.subr.bf16.mxu0 %v6005_v17 }
 0x513   :  { %v5556_v63 = vpop.eup %5555  ;;  %5569 = vrcp.f32 %v1077_v51  ;;  %v1214_v39 = vpack.c.bf16 %v1108_v34, %v1107_v37 }
 0x514   :  { %v5558_v42 = vpop.eup %5557  ;;  %v1110_v44 = vmul.f32 %v5556_v63, %v6586_v53  ;;  %v1577_v63 = vld [vmem:[#allocation2 + $0x70] sm:$0xff] }
 0x515   :  { %5199 = vmatmul.mubr.msk.bf16.vlgmr.msra.gmra.mxu1 %vm942_vm10, %v1214_v39  ;;  %v1109_v1 = vmul.f32 %v5558_v42, %v6588_v52  ;;  %v1578_v39 = vld [vmem:[#allocation2 + $0x78] sm:$0xff]  ;;  %v1575_v42 = vld [vmem:[#allocation2 + $0x60] sm:$0xff] }
 0x516   :  { %5209 = vmatpush3.bf16.msra.mxu1 %v6409_v49  ;;  %5210 = vmatprep.mubr.msk.bf16.mxu1 %vm6006_vm8, %v6005_v17  ;;  %v1083_v46 = vpop.xlane.xlu0 %1082 }
 0x517   :  { %v5560_v10 = vpop.eup %5559  ;;  %v1262_v54 = vpack.c.bf16 %v1110_v44, %v1109_v1  ;;  %5220 = vmatprep.subr.bf16.mxu1 %v6005_v17  ;;  %5571 = vrcp.f32 %v1083_v46  ;;  %v1588_v44 = vpack.c.bf16 %v1578_v39, %v1577_v63  ;;  %v1576_v1 = vld [vmem:[#allocation2 + $0x68] sm:$0xff] }
 0x518   :  { %v5562_v47 = vpop.eup %5561  ;;  %v1112_v48 = vmul.f32 %v5560_v10, %v6594_v32 }
 0x519   :  { %5205 = vmatmul.mubr.msk.bf16.vlgmr.msra.gmra.mxu0 %vm942_vm10, %v1262_v54  ;;  %v1111_v53 = vmul.f32 %v5562_v47, %v6597_v62  ;;  %v1587_v54 = vpack.c.bf16 %v1576_v1, %v1575_v42  ;;  %v1573_v47 = vld [vmem:[#allocation2 + $0x50] sm:$0xff] }
 0x51a   :  { %5215 = vmatpush3.bf16.msra.mxu0 %v6632_v13  ;;  %5216 = vmatprep.mubr.msk.bf16.mxu0 %vm6006_vm8, %v6005_v17  ;;  %v1439_v55 = vpop.permute.xlu0 %1438 }
 0x51b   :  { %v5564_v49 = vpop.eup %5563  ;;  %v1342_v52 = vpack.c.bf16 %v1112_v48, %v1111_v53  ;;  %5226 = vmatprep.subr.bf16.mxu0 %v6005_v17  ;;  %v1574_v48 = vld [vmem:[#allocation2 + $0x58] sm:$0xff] }
 0x51c   :  { %v5566_v59 = vpop.eup %5565  ;;  %v1114_v50 = vmul.f32 %v5564_v49, %v6603_v38 }
 0x51d   :  { %5211 = vmatmul.mubr.msk.bf16.vlgmr.msra.gmra.mxu1 %vm942_vm10, %v1342_v52  ;;  %v1113_v32 = vmul.f32 %v5566_v59, %v6605_v36  ;;  %v1586_v59 = vpack.c.bf16 %v1574_v48, %v1573_v47 }
 0x51e   :  { %5221 = vmatpush3.bf16.msra.mxu1 %v1439_v55  ;;  %5222 = vmatprep.mubr.msk.bf16.mxu1 %vm6006_vm8, %v6005_v17 }
 0x51f   :  { %v5568_v62 = vpop.eup %5567  ;;  %v1388_v56 = vpack.c.bf16 %v1114_v50, %v1113_v32  ;;  %5232 = vmatprep.subr.bf16.mxu1 %v1588_v44  ;;  %v1571_v32 = vld [vmem:[#allocation2 + $0x40] sm:$0xff] }
 0x520   :  { %v5570_v13 = vpop.eup %5569  ;;  %v1116_v3 = vmul.f32 %v5568_v62, %v6611_v40  ;;  %v1572_v62 = vld [vmem:[#allocation2 + $0x48] sm:$0xff] }
 0x521   :  { %5217 = vmatmul.mubr.msk.bf16.vlgmr.msra.gmra.mxu0 %vm942_vm10, %v1388_v56  ;;  %v1115_v57 = vmul.f32 %v5570_v13, %v6613_v41 }
 0x522   :  { %5228 = vmatprep.mubr.msk.bf16.mxu0 %vm6006_vm8, %v6005_v17 }
 0x523   :  { %v1437_v38 = vpack.c.bf16 %v1116_v3, %v1115_v57  ;;  %v1585_v3 = vpack.c.bf16 %v1572_v62, %v1571_v32 }
 0x524   :  { %v5572_v6 = vpop.eup %5571 }
 0x525   :  { %5223 = vmatmul.mubr.msk.bf16.vlgmr.msra.gmra.mxu1 %vm942_vm10, %v1437_v38  ;;  %v1117_v29 = vmul.f32 %v5572_v6, %v6619_v43  ;;  %v1569_v38 = vld [vmem:[#allocation2 + $0x30] sm:$0xff]  ;;  %v1567_v6 = vld [vmem:[#allocation2 + $0x20] sm:$0xff] }
 0x526   :  { %5233 = vmatpush3.bf16.msra.mxu1 %v1588_v44 }
 0x527   :  { %5234 = vmatprep.subr.bf16.mxu1 %v1587_v54 }
 0x52a   :  { %5235 = vmatpush3.bf16.msra.mxu1 %v1587_v54 }
 0x52b   :  { %5236 = vmatprep.subr.bf16.mxu1 %v1586_v59 }
 0x52e   :  { %5237 = vmatpush3.bf16.msra.mxu1 %v1586_v59 }
 0x52f   :  { %5238 = vmatprep.subr.bf16.mxu1 %v1585_v3 }
 0x532   :  { %5239 = vmatpush3.bf16.msra.mxu1 %v1585_v3 }
 0x54a   :  { %v1086_v36 = vpop.xlane.xlu1 %1085 }
 0x54b   :  { %5573 = vrcp.f32 %v1086_v36  ;;  %v1570_v36 = vld [vmem:[#allocation2 + $0x38] sm:$0xff] }
 0x54e   :  { %v1487_v58 = vpop.permute.xlu1 %1486 }
 0x54f   :  { %5227 = vmatpush3.bf16.msra.mxu0 %v1487_v58  ;;  %v1584_v58 = vpack.c.bf16 %v1570_v36, %v1569_v38 }
 0x551   :  { %5240 = vmatprep.subr.bf16.mxu1 %v1584_v58 }
 0x552   :  { %5241 = vmatpush3.bf16.msra.mxu1 %v1584_v58 }
 0x558   :  { %v5574_v27 = vpop.eup %5573 }
 0x559   :  { %v1118_v40 = vmul.f32 %v5574_v27, %v6626_v61  ;;  %v1568_v27 = vld [vmem:[#allocation2 + $0x28] sm:$0xff] }
 0x55b   :  { %v1485_v0 = vpack.c.bf16 %v1118_v40, %v1117_v29  ;;  %v1583_v29 = vpack.c.bf16 %v1568_v27, %v1567_v6  ;;  %v1565_v40 = vld [vmem:[#allocation2 + $0x10] sm:$0xff] }
 0x55d   :  { %5229 = vmatmul.mubr.msk.bf16.vlgmr.msra.gmra.mxu0 %vm942_vm10, %v1485_v0  ;;  %v1566_v0 = vld [vmem:[#allocation2 + $0x18] sm:$0xff]  ;;  %5242 = vmatprep.subr.bf16.mxu1 %v1583_v29 }
 0x55e   :  { %1837 = vmatprep.mubr.bf16.mxu0 %v6004_v60  ;;  %5243 = vmatpush3.bf16.msra.mxu1 %v1583_v29 }
 0x5b5   :  { %v6677_v41 = vpop.f32.mrf.mxu1 }
 0x5b7   :  { %v5188_v2 = vpop.f32.mrf.mxu1 }
 0x5b8   :  { %v1582_v2 = vpack.c.bf16 %v1566_v0, %v1565_v40 }
 0x5b9   :  { %v6679_v4 = vpop.f32.mrf.mxu1 }
 0x5ba   :  { %5244 = vmatprep.subr.bf16.mxu1 %v1582_v2 }
 0x5bb   :  { %v5189_v5 = vpop.f32.mrf.mxu1  ;;  %5245 = vmatpush3.bf16.msra.mxu1 %v1582_v2 }
 0x5bc   :  { %v1563_v5 = vld [vmem:[#allocation2] sm:$0xff] }
 0x5d0   :  { %v1207_v7 = vpop.f32.mrf.mxu0 }
 0x5d2   :  { %v5194_v11 = vpop.f32.mrf.mxu0 }
 0x5d4   :  { %v1210_v45 = vpop.f32.mrf.mxu0 }
 0x5d5   :  { %v5433_v35 = vpack.i.bf16 %v1210_v45, %v1207_v7  ;;  %v1255_v12 = vpop.f32.mrf.mxu1  ;;  %v1564_v7 = vld [vmem:[#allocation2 + $0x8] sm:$0xff] }
 0x5d6   :  { %v5195_v20 = vpop.f32.mrf.mxu0  ;;  %v1581_v11 = vpack.c.bf16 %v1564_v7, %v1563_v5 }
 0x5d7   :  { %v5200_v43 = vpop.f32.mrf.mxu1  ;;  %5434 = vrot.lane.b32.xlu0 %v5433_v35, %s6009_s0 }
 0x5d8   :  { %5246 = vmatprep.subr.bf16.mxu1 %v1581_v11 }
 0x5d9   :  { %v1258_v61 = vpop.f32.mrf.mxu1  ;;  %v1303_v33 = vpop.f32.mrf.mxu0  ;;  %5247 = vmatpush3.bf16.msra.mxu1 %v1581_v11 }
 0x5da   :  { %v5438_v14 = vpack.i.bf16 %v1258_v61, %v1255_v12 }
 0x5db   :  { %v5201_v19 = vpop.f32.mrf.mxu1  ;;  %v5206_v8 = vpop.f32.mrf.mxu0 }
 0x5dc   :  { %5439 = vrot.lane.b32.xlu1 %v5438_v14, %s6008_s20 }
 0x5dd   :  { %v1306_v16 = vpop.f32.mrf.mxu0  ;;  %v6683_v9 = vpop.f32.mrf.mxu1 }
 0x5de   :  { %v5443_v31 = vpack.i.bf16 %v1306_v16, %v1303_v33 }
 0x5df   :  { %v5207_v34 = vpop.f32.mrf.mxu0  ;;  %v5212_v30 = vpop.f32.mrf.mxu1 }
 0x5e0   :  { %5444 = vrot.lane.b32.xlu1 %v5443_v31, %s6007_s29 }
 0x5e1   :  { %v6686_v37 = vpop.f32.mrf.mxu1  ;;  %v1430_v51 = vpop.f32.mrf.mxu0 }
 0x5e3   :  { %v5213_v10 = vpop.f32.mrf.mxu1  ;;  %v5218_v46 = vpop.f32.mrf.mxu0 }
 0x5e5   :  { %v1433_v53 = vpop.f32.mrf.mxu0  ;;  %v1478_v49 = vpop.f32.mrf.mxu1 }
 0x5e6   :  { %v5448_v52 = vpack.i.bf16 %v1433_v53, %v1430_v51 }
 0x5e7   :  { %v5219_v50 = vpop.f32.mrf.mxu0  ;;  %v5224_v55 = vpop.f32.mrf.mxu1 }
 0x5e8   :  { %5449 = vrot.lane.b32.xlu0 %v5448_v52, %s6009_s0 }
 0x5e9   :  { %v1481_v56 = vpop.f32.mrf.mxu1 }
 0x5ea   :  { %v5453_v13 = vpack.i.bf16 %v1481_v56, %v1478_v49 }
 0x5eb   :  { %v5225_v57 = vpop.f32.mrf.mxu1 }
 0x5ec   :  { %5454 = vrot.lane.b32.xlu0 %v5453_v13, %s6008_s20 }
 0x61d   :  { %v1526_v45 = vpop.f32.mrf.mxu0 }
 0x61f   :  { %v5230_v35 = vpop.f32.mrf.mxu0 }
 0x621   :  { %v1529_v12 = vpop.f32.mrf.mxu0 }
 0x622   :  { %v5458_v20 = vpack.i.bf16 %v1529_v12, %v1526_v45 }
 0x623   :  { %v5231_v43 = vpop.f32.mrf.mxu0 }
 0x624   :  { %5459 = vrot.lane.b32.xlu1 %v5458_v20, %s6007_s29 }
 0x649   :  { %v5435_v61 = vpop.permute.xlu0 %5434 }
 0x64a   :  { %v5437_v14 = vunpack.i.h.bf16 %v5435_v61  ;;  %v5436_v19 = vunpack.i.l.bf16 %v5435_v61 }
 0x64c   :  { %v1335_v34 = vsel %vm503_vm9, %v6679_v4, %v5437_v14  ;;  %v1334_v30 = vsel %vm503_vm9, %v6677_v41, %v5436_v19 }
 0x64e   :  { %v5440_v33 = vpop.permute.xlu1 %5439 }
 0x64f   :  { %v5442_v8 = vunpack.i.h.bf16 %v5440_v33  ;;  %v5441_v16 = vunpack.i.l.bf16 %v5440_v33 }
 0x651   :  { %v1337_v39 = vsel %vm1336_vm11, %v1334_v30, %v5441_v16  ;;  %v1338_v42 = vsel %vm1336_vm11, %v1335_v34, %v5442_v8  ;;  %v1772_v8 = vld [vmem:[%s8116_s11 + $0xe8] sm:$0xff]  ;;  %v1774_v16 = vld [vmem:[%s8116_s11 + $0xf8] sm:$0xff]  ;;  %v1771_v34 = vld [vmem:[%s8116_s11 + $0xe0] sm:$0xff] }
 0x652   :  { %v5445_v31 = vpop.permute.xlu1 %5444  ;;  %v1773_v30 = vld [vmem:[%s8116_s11 + $0xf0] sm:$0xff] }
 0x653   :  { %v5447_v51 = vunpack.i.h.bf16 %v5445_v31  ;;  %v5446_v63 = vunpack.i.l.bf16 %v5445_v31  ;;  %v1792_v31 = vpack.c.bf16 %v1774_v16, %v1772_v8 }
 0x655   :  { %v1340_v44 = vsel %vm1339_vm12, %v1337_v39, %v5446_v63  ;;  %v1341_v1 = vsel %vm1339_vm12, %v1338_v42, %v5447_v51  ;;  %v1791_v51 = vpack.c.bf16 %v1773_v30, %v1771_v34  ;;  %1805 = vmatprep.subr.bf16.mxu0 %v1792_v31  ;;  %v1768_v63 = vld [vmem:[%s8116_s11 + $0xc8] sm:$0xff]  ;;  %v1770_v39 = vld [vmem:[%s8116_s11 + $0xd8] sm:$0xff] }
 0x656   :  { %v1579_v10 = vpack.c.bf16 %v1341_v1, %v1340_v44  ;;  %v1790_v42 = vpack.c.bf16 %v1770_v39, %v1768_v63  ;;  %v1767_v44 = vld [vmem:[%s8116_s11 + $0xc0] sm:$0xff]  ;;  %v1769_v1 = vld [vmem:[%s8116_s11 + $0xd0] sm:$0xff] }
 0x657   :  { %1806 = vmatpush1.bf16.msra.mxu0 %v1791_v51 }
 0x658   :  { %5248 = vmatprep.mubr.bf16.mxu1 %v1579_v10  ;;  %v1789_v10 = vpack.c.bf16 %v1769_v1, %v1767_v44  ;;  %1807 = vmatprep.subr.bf16.mxu0 %v1790_v42 }
 0x65a   :  { %v5450_v46 = vpop.permute.xlu0 %5449 }
 0x65b   :  { %v5452_v47 = vunpack.i.h.bf16 %v5450_v46  ;;  %v5451_v48 = vunpack.i.l.bf16 %v5450_v46  ;;  %1808 = vmatpush1.bf16.msra.mxu0 %v1789_v10  ;;  %v1764_v46 = vld [vmem:[%s8116_s11 + $0xa8] sm:$0xff] }
 0x65d   :  { %v1558_v41 = vsel %vm503_vm9, %v6686_v37, %v5452_v47  ;;  %v1557_v52 = vsel %vm503_vm9, %v6683_v9, %v5451_v48  ;;  %v4826_v37 = vld [vmem:[%s8152_s5] ss:$0 sm:$0xff] }
 0x65e   :  { %v5455_v54 = vpop.permute.xlu0 %5454  ;;  %v1763_v48 = vld [vmem:[%s8116_s11 + $0xa0] sm:$0xff] }
 0x65f   :  { %v5457_v4 = vunpack.i.h.bf16 %v5455_v54  ;;  %v5456_v53 = vunpack.i.l.bf16 %v5455_v54  ;;  %v1766_v54 = vld [vmem:[%s8116_s11 + $0xb8] sm:$0xff] }
 0x660   :  { %v1788_v47 = vpack.c.bf16 %v1766_v54, %v1764_v46 }
 0x661   :  { %v1559_v55 = vsel %vm1336_vm11, %v1557_v52, %v5456_v53  ;;  %v1560_v32 = vsel %vm1336_vm11, %v1558_v41, %v5457_v4  ;;  %v1765_v4 = vld [vmem:[%s8116_s11 + $0xb0] sm:$0xff]  ;;  %v1762_v41 = vld [vmem:[%s8116_s11 + $0x98] sm:$0xff] }
 0x662   :  { %v1787_v53 = vpack.c.bf16 %v1765_v4, %v1763_v48  ;;  %1809 = vmatprep.subr.bf16.mxu0 %v1788_v47 }
 0x664   :  { %1810 = vmatpush1.bf16.msra.mxu0 %v1787_v53 }
 0x696   :  { %v5460_v49 = vpop.permute.xlu1 %5459 }
 0x697   :  { %v5462_v59 = vunpack.i.h.bf16 %v5460_v49  ;;  %v5461_v50 = vunpack.i.l.bf16 %v5460_v49  ;;  %v1760_v49 = vld [vmem:[%s8116_s11 + $0x88] sm:$0xff] }
 0x698   :  { %v1786_v52 = vpack.c.bf16 %v1762_v41, %v1760_v49 }
 0x699   :  { %v1561_v62 = vsel %vm1339_vm12, %v1559_v55, %v5461_v50  ;;  %v1562_v56 = vsel %vm1339_vm12, %v1560_v32, %v5462_v59  ;;  %v1759_v59 = vld [vmem:[%s8116_s11 + $0x80] sm:$0xff]  ;;  %v1761_v50 = vld [vmem:[%s8116_s11 + $0x90] sm:$0xff]  ;;  %v1756_v32 = vld [vmem:[%s8116_s11 + $0x68] sm:$0xff] }
 0x69a   :  { %v1580_v13 = vpack.c.bf16 %v1562_v56, %v1561_v62  ;;  %v1785_v55 = vpack.c.bf16 %v1761_v50, %v1759_v59  ;;  %1811 = vmatprep.subr.bf16.mxu0 %v1786_v52  ;;  %v1758_v62 = vld [vmem:[%s8116_s11 + $0x78] sm:$0xff]  ;;  %v1755_v56 = vld [vmem:[%s8116_s11 + $0x60] sm:$0xff] }
 0x69c   :  { %5249 = vmatmul.mubr.bf16.vlgmr.msra.gmra.mxu1 %v1580_v13  ;;  %1812 = vmatpush1.bf16.msra.mxu0 %v1785_v55  ;;  %v1784_v13 = vpack.c.bf16 %v1758_v62, %v1756_v32 }
 0x69e   :  { %1813 = vmatprep.subr.bf16.mxu0 %v1784_v13  ;;  %v4827_v13 = vld [vmem:[%s8114_s9] ss:$0 sm:$0xff] }
 0x75c   :  { %v5250_v3 = vpop.f32.mrf.mxu1 }
 0x75d   :  { %v1639_v36 = vadd.f32 %v5250_v3, %v4826_v37  ;;  %v1757_v3 = vld [vmem:[%s8116_s11 + $0x70] sm:$0xff] }
 0x75e   :  { %v1630_v57 = vpop.f32.mrf.mxu1 }
 0x75f   :  { %v1631_v38 = vadd.f32 %v4826_v37, %v1630_v57  ;;  %v1647_v0 = vadd.f32 %v1639_v36, %v6371_v21  ;;  %v1754_v57 = vld [vmem:[%s8116_s11 + $0x58] sm:$0xff]  ;;  %v1751_v36 = vld [vmem:[%s8116_s11 + $0x40] sm:$0xff] }
 0x760   :  { %v5251_v9 = vpop.f32.mrf.mxu1 }
 0x761   :  { %v1645_v58 = vadd.f32 %v1631_v38, %v6365_v15  ;;  %v1642_v29 = vadd.f32 %v5251_v9, %v4826_v37  ;;  %v1783_v38 = vpack.c.bf16 %v1757_v3, %v1755_v56 }
 0x762   :  { %v1633_v6 = vpop.f32.mrf.mxu1 }
 0x763   :  { %v1634_v27 = vadd.f32 %v4826_v37, %v1633_v6  ;;  %1651 = vadd.xlane.f32.xlu0 %v1645_v58  ;;  %v1648_v2 = vadd.f32 %v1642_v29, %v6373_v22  ;;  %v1752_v37 = vld [vmem:[%s8116_s11 + $0x48] sm:$0xff]  ;;  %1814 = vmatpush1.bf16.msra.mxu0 %v1783_v38 }
 0x764   :  { %v1782_v9 = vpack.c.bf16 %v1754_v57, %v1752_v37  ;;  %v1748_v6 = vld [vmem:[%s8116_s11 + $0x28] sm:$0xff] }
 0x765   :  { %v1646_v40 = vadd.f32 %v1634_v27, %v6367_v18  ;;  %v1750_v27 = vld [vmem:[%s8116_s11 + $0x38] sm:$0xff] }
 0x766   :  { %1815 = vmatprep.subr.bf16.mxu0 %v1782_v9 }
 0x767   :  { %1653 = vadd.xlane.f32.xlu1 %v1646_v40  ;;  %1655 = vadd.xlane.f32.xlu0 %v1647_v0 }
 0x76b   :  { %1657 = vadd.xlane.f32.xlu0 %v1648_v2 }
 0x7ec   :  { %v1652_v5 = vpop.xlane.xlu0 %1651 }
 0x7ed   :  { %v1659_v7 = vmul.f32 0.0078125, %v1652_v5  ;;  %v1744_v5 = vld [vmem:[%s8116_s11 + $0x8] sm:$0xff] }
 0x7ef   :  { %v6714_v11 = vsub.f32 %v1645_v58, %v1659_v7  ;;  %v1753_v58 = vld [vmem:[%s8116_s11 + $0x50] sm:$0xff]  ;;  %v1746_v7 = vld [vmem:[%s8116_s11 + $0x18] sm:$0xff] }
 0x7f0   :  { %v1654_v45 = vpop.xlane.xlu1 %1653  ;;  %v1656_v35 = vpop.xlane.xlu0 %1655  ;;  %v1781_v29 = vpack.c.bf16 %v1753_v58, %v1751_v36  ;;  %v4828_v36 = vld [vmem:[%s8115_s10] ss:$0 sm:$0xff] }
 0x7f1   :  { %v1660_v15 = vmul.f32 0.0078125, %v1654_v45  ;;  %v1661_v12 = vmul.f32 0.0078125, %v1656_v35  ;;  %v1667_v20 = vmul.f32 %v6714_v11, %v6714_v11  ;;  %v1778_v35 = vpack.c.bf16 %v1746_v7, %v1744_v5 }
 0x7f2   :  { %1816 = vmatpush1.bf16.msra.mxu0 %v1781_v29  ;;  %v1717_v37 = vmul.f32 %v4827_v13, %v6714_v11 }
 0x7f3   :  { %1671 = vadd.xlane.f32.xlu0 %v1667_v20  ;;  %v6718_v18 = vsub.f32 %v1646_v40, %v1660_v15  ;;  %v6720_v21 = vsub.f32 %v1647_v0, %v1661_v12  ;;  %v1780_v40 = vpack.c.bf16 %v1750_v27, %v1748_v6  ;;  %v1747_v0 = vld [vmem:[%s8116_s11 + $0x20] sm:$0xff]  ;;  %v1745_v12 = vld [vmem:[%s8116_s11 + $0x10] sm:$0xff] }
 0x7f4   :  { %v1658_v43 = vpop.xlane.xlu0 %1657  ;;  %v1743_v15 = vld [vmem:[%s8116_s11] sm:$0xff] }
 0x7f5   :  { %v1662_v61 = vmul.f32 0.0078125, %v1658_v43  ;;  %v1668_v22 = vmul.f32 %v6718_v18, %v6718_v18  ;;  %v1669_v33 = vmul.f32 %v6720_v21, %v6720_v21  ;;  %1817 = vmatprep.subr.bf16.mxu0 %v1780_v40  ;;  %v1777_v20 = vpack.c.bf16 %v1745_v12, %v1743_v15  ;;  %v1944_v12 = vld [vmem:[#allocation4 + $0x70] sm:$0xff] }
 0x7f6   :  { %v1718_v57 = vmul.f32 %v4827_v13, %v6718_v18 }
 0x7f7   :  { %1673 = vadd.xlane.f32.xlu1 %v1668_v22  ;;  %1675 = vadd.xlane.f32.xlu0 %v1669_v33  ;;  %v6726_v14 = vsub.f32 %v1648_v2, %v1662_v61  ;;  %v1749_v2 = vld [vmem:[%s8116_s11 + $0x30] sm:$0xff] }
 0x7f8   :  { %v1779_v45 = vpack.c.bf16 %v1749_v2, %v1747_v0  ;;  %v1719_v2 = vmul.f32 %v4827_v13, %v6720_v21  ;;  %v1961_v21 = vld [vmem:[#allocation4 + $0xf8] sm:$0xff] }
 0x7f9   :  { %v1670_v19 = vmul.f32 %v6726_v14, %v6726_v14  ;;  %v1720_v27 = vmul.f32 %v4827_v13, %v6726_v14 }
 0x7fa   :  { %1818 = vmatpush1.bf16.msra.mxu0 %v1779_v45 }
 0x7fb   :  { %1677 = vadd.xlane.f32.xlu1 %v1670_v19  ;;  %1819 = vmatprep.subr.bf16.mxu0 %v1778_v35  ;;  %v1960_v35 = vld [vmem:[#allocation4 + $0xf0] sm:$0xff] }
 0x7fc   :  { %v1981_v15 = vpack.c.bf16 %v1961_v21, %v1960_v35 }
 0x7fe   :  { %1820 = vmatpush1.bf16.msra.mxu0 %v1777_v20  ;;  %v1945_v20 = vld [vmem:[#allocation4 + $0x78] sm:$0xff]  ;;  %4998 = vmatprep.subr.bf16.mxu1 %v1981_v15 }
 0x87c   :  { %v1672_v43 = vpop.xlane.xlu0 %1671 }
 0x87d   :  { %v1679_v61 = vmul.f32 0.007874016, %v1672_v43  ;;  %v1973_v43 = vpack.c.bf16 %v1945_v20, %v1944_v12 }
 0x87f   :  { %5575 = vrsqrt.f32 %v1679_v61  ;;  %vm1685_vm13 = vcmp.eq.f32.partialorder %v1679_v61, inf  ;;  %v1688_v51 = vand.u32 2147483648, %v1679_v61  ;;  %vm1687_vm14 = vcmp.eq.f32.partialorder %v1679_v61, 0.0  ;;  %4999 = vmatpush3.bf16.msra.mxu1 %v1973_v43 }
 0x880   :  { %v1674_v22 = vpop.xlane.xlu1 %1673  ;;  %v1676_v33 = vpop.xlane.xlu0 %1675 }
 0x881   :  { %v1680_v19 = vmul.f32 0.007874016, %v1674_v22  ;;  %v1681_v8 = vmul.f32 0.007874016, %v1676_v33  ;;  %v1959_v22 = vld [vmem:[#allocation4 + $0xe8] sm:$0xff] }
 0x883   :  { %5577 = vrsqrt.f32 %v1680_v19  ;;  %vm1692_vm15 = vcmp.eq.f32.partialorder %v1680_v19, inf  ;;  %vm1694_vm0 = vcmp.eq.f32.partialorder %v1680_v19, 0.0  ;;  %v1695_v46 = vand.u32 2147483648, %v1680_v19 }
 0x884   :  { %5579 = vrsqrt.f32 %v1681_v8  ;;  %v1678_v16 = vpop.xlane.xlu1 %1677  ;;  %vm1699_vm1 = vcmp.eq.f32.partialorder %v1681_v8, inf  ;;  %v1702_v48 = vand.u32 2147483648, %v1681_v8  ;;  %vm1701_vm2 = vcmp.eq.f32.partialorder %v1681_v8, 0.0 }
 0x885   :  { %v1682_v31 = vmul.f32 0.007874016, %v1678_v16 }
 0x887   :  { %5581 = vrsqrt.f32 %v1682_v31  ;;  %vm1706_vm3 = vcmp.eq.f32.partialorder %v1682_v31, inf  ;;  %v1709_v55 = vand.u32 2147483648, %v1682_v31  ;;  %vm1708_vm4 = vcmp.eq.f32.partialorder %v1682_v31, 0.0 }
 0x88c   :  { %v5576_v34 = vpop.eup %5575 }
 0x88d   :  { %v1684_v30 = vmul.f32 %v5576_v34, %v1679_v61  ;;  %v1957_v34 = vld [vmem:[#allocation4 + $0xd8] sm:$0xff] }
 0x88f   :  { %v1686_v63 = vsel %vm1685_vm13, %v1679_v61, %v1684_v30  ;;  %v1958_v61 = vld [vmem:[#allocation4 + $0xe0] sm:$0xff] }
 0x890   :  { %v5578_v39 = vpop.eup %5577  ;;  %v1689_v42 = vsel %vm1687_vm14, %v1688_v51, %v1686_v63  ;;  %v1980_v33 = vpack.c.bf16 %v1959_v22, %v1958_v61  ;;  %v1940_v51 = vld [vmem:[#allocation4 + $0x50] sm:$0xff]  ;;  %v1941_v63 = vld [vmem:[#allocation4 + $0x58] sm:$0xff] }
 0x891   :  { %v5580_v44 = vpop.eup %5579  ;;  %v1721_v1 = vadd.f32 1e-06, %v1689_v42  ;;  %v1691_v10 = vmul.f32 %v5578_v39, %v1680_v19  ;;  %v1971_v39 = vpack.c.bf16 %v1941_v63, %v1940_v51  ;;  %v1954_v42 = vld [vmem:[#allocation4 + $0xc0] sm:$0xff] }
 0x892   :  { %v1698_v54 = vmul.f32 %v5580_v44, %v1681_v8  ;;  %5000 = vmatprep.subr.bf16.mxu1 %v1980_v33  ;;  %v1955_v44 = vld [vmem:[#allocation4 + $0xc8] sm:$0xff] }
 0x893   :  { %5583 = vrcp.f32 %v1721_v1  ;;  %v1693_v47 = vsel %vm1692_vm15, %v1680_v19, %v1691_v10  ;;  %v1942_v19 = vld [vmem:[#allocation4 + $0x60] sm:$0xff]  ;;  %v1978_v1 = vpack.c.bf16 %v1955_v44, %v1954_v42 }
 0x894   :  { %v5582_v4 = vpop.eup %5581  ;;  %v1696_v53 = vsel %vm1694_vm0, %v1695_v46, %v1693_v47  ;;  %v1700_v49 = vsel %vm1699_vm1, %v1681_v8, %v1698_v54  ;;  %v1943_v8 = vld [vmem:[#allocation4 + $0x68] sm:$0xff]  ;;  %v1938_v10 = vld [vmem:[#allocation4 + $0x40] sm:$0xff]  ;;  %v1952_v47 = vld [vmem:[#allocation4 + $0xb0] sm:$0xff] }
 0x895   :  { %v1722_v41 = vadd.f32 1e-06, %v1696_v53  ;;  %v1703_v52 = vsel %vm1701_vm2, %v1702_v48, %v1700_v49  ;;  %v1705_v59 = vmul.f32 %v5582_v4, %v1682_v31  ;;  %v1972_v16 = vpack.c.bf16 %v1943_v8, %v1942_v19  ;;  %v1939_v46 = vld [vmem:[#allocation4 + $0x48] sm:$0xff]  ;;  %v1953_v48 = vld [vmem:[#allocation4 + $0xb8] sm:$0xff]  ;;  %v1936_v4 = vld [vmem:[#allocation4 + $0x30] sm:$0xff] }
 0x896   :  { %v1723_v50 = vadd.f32 1e-06, %v1703_v52  ;;  %v1970_v54 = vpack.c.bf16 %v1939_v46, %v1938_v10  ;;  %v1977_v53 = vpack.c.bf16 %v1953_v48, %v1952_v47  ;;  %v1937_v49 = vld [vmem:[#allocation4 + $0x38] sm:$0xff]  ;;  %v1951_v52 = vld [vmem:[#allocation4 + $0xa8] sm:$0xff] }
 0x897   :  { %5585 = vrcp.f32 %v1722_v41  ;;  %v1707_v32 = vsel %vm1706_vm3, %v1682_v31, %v1705_v59  ;;  %5001 = vmatpush3.bf16.msra.mxu1 %v1972_v16  ;;  %v1956_v31 = vld [vmem:[#allocation4 + $0xd0] sm:$0xff]  ;;  %v1950_v41 = vld [vmem:[#allocation4 + $0xa0] sm:$0xff]  ;;  %v1969_v59 = vpack.c.bf16 %v1937_v49, %v1936_v4 }
 0x898   :  { %v1710_v62 = vsel %vm1708_vm4, %v1709_v55, %v1707_v32  ;;  %5587 = vrcp.f32 %v1723_v50  ;;  %v1979_v30 = vpack.c.bf16 %v1957_v34, %v1956_v31  ;;  %v1976_v50 = vpack.c.bf16 %v1951_v52, %v1950_v41  ;;  %v1934_v55 = vld [vmem:[#allocation4 + $0x20] sm:$0xff]  ;;  %v1935_v32 = vld [vmem:[#allocation4 + $0x28] sm:$0xff] }
 0x899   :  { %v1724_v56 = vadd.f32 1e-06, %v1710_v62  ;;  %v1948_v62 = vld [vmem:[#allocation4 + $0x90] sm:$0xff]  ;;  %v1968_v13 = vpack.c.bf16 %v1935_v32, %v1934_v55 }
 0x89a   :  { %5002 = vmatprep.subr.bf16.mxu1 %v1979_v30 }
 0x89b   :  { %5589 = vrcp.f32 %v1724_v56  ;;  %5003 = vmatpush3.bf16.msra.mxu1 %v1971_v39  ;;  %v1949_v56 = vld [vmem:[#allocation4 + $0x98] sm:$0xff] }
 0x89c   :  { %5004 = vmatprep.subr.bf16.mxu1 %v1978_v1 }
 0x89f   :  { %5005 = vmatpush3.bf16.msra.mxu1 %v1970_v54 }
 0x8a0   :  { %v5584_v3 = vpop.eup %5583  ;;  %5006 = vmatprep.subr.bf16.mxu1 %v1977_v53 }
 0x8a1   :  { %v1726_v38 = vmul.f32 %v5584_v3, %v1717_v37  ;;  %v1975_v3 = vpack.c.bf16 %v1949_v56, %v1948_v62  ;;  %v1932_v37 = vld [vmem:[#allocation4 + $0x10] sm:$0xff] }
 0x8a3   :  { %v6835_v29 = vadd.f32 %v4828_v36, %v1726_v38  ;;  %5007 = vmatpush3.bf16.msra.mxu1 %v1969_v59  ;;  %v1946_v38 = vld [vmem:[#allocation4 + $0x80] sm:$0xff] }
 0x8a4   :  { %v5586_v9 = vpop.eup %5585  ;;  %5008 = vmatprep.subr.bf16.mxu1 %v1976_v50 }
 0x8a5   :  { %v1728_v58 = vmul.f32 %v5586_v9, %v1718_v57  ;;  %v5588_v6 = vpop.eup %5587  ;;  %v1933_v57 = vld [vmem:[#allocation4 + $0x18] sm:$0xff]  ;;  %v1947_v9 = vld [vmem:[#allocation4 + $0x88] sm:$0xff] }
 0x8a6   :  { %v1730_v5 = vmul.f32 %v5588_v6, %v1719_v2  ;;  %v1930_v6 = vld [vmem:[#allocation4] sm:$0xff] }
 0x8a7   :  { %v6837_v40 = vadd.f32 %v4828_v36, %v1728_v58  ;;  %5009 = vmatpush3.bf16.msra.mxu1 %v1968_v13  ;;  %v1974_v58 = vpack.c.bf16 %v1947_v9, %v1946_v38  ;;  %v1793_v2 = vld [vmem:[%s8117_s12] sm:$0x3] }
 0x8a8   :  { %v5590_v0 = vpop.eup %5589  ;;  %v6845_v45 = vadd.f32 %v4828_v36, %v1730_v5  ;;  %5010 = vmatprep.subr.bf16.mxu1 %v1975_v3 }
 0x8a9   :  { %v1775_v11 = vpack.c.bf16 %v6837_v40, %v6835_v29  ;;  %v1732_v18 = vmul.f32 %v5590_v0, %v1720_v27  ;;  %v1931_v27 = vld [vmem:[#allocation4 + $0x8] sm:$0xff] }
 0x8aa   :  { %v1966_v0 = vpack.c.bf16 %v1931_v27, %v1930_v6 }
 0x8ab   :  { %1838 = vmatmul.mubr.bf16.vlgmr.msra.gmra.mxu0 %v1775_v11  ;;  %v6843_v7 = vadd.f32 %v4828_v36, %v1732_v18  ;;  %v1967_v36 = vpack.c.bf16 %v1933_v57, %v1932_v37  ;;  %v1798_v11 = vrot.slane %v1793_v2, %v6388_v25  ;;  %v1802_v18 = vrot.slane %v1793_v2, %v6397_v28 }
 0x8ac   :  { %1847 = vmatprep.mubr.bf16.mxu0 %v6004_v60 }
 0x8ad   :  { %v1776_v14 = vpack.c.bf16 %v6843_v7, %v6845_v45  ;;  %5011 = vmatpush3.bf16.msra.mxu1 %v1967_v36 }
 0x8ae   :  { %5012 = vmatprep.subr.bf16.mxu1 %v1974_v58 }
 0x8b1   :  { %5013 = vmatpush3.bf16.msra.mxu1 %v1966_v0 }
 0x8b3   :  { %1848 = vmatmul.mubr.bf16.gmra.mxu0 %v1776_v14 }
 0x8b4   :  { %2261 = vmatprep.mubr.bf16.mxu0 %v6004_v60 }
 0x96b   :  { %v1839_v5 = vpop.f32.mrf.mxu0 }
 0x96c   :  { %v6855_v14 = vadd.f32 %v1839_v5, %v1798_v11 }
 0x96d   :  { %v1841_v35 = vpop.f32.mrf.mxu0 }
 0x96e   :  { %v1866_v21 = vmul.f32 0.044715, %v6855_v14  ;;  %v6858_v15 = vadd.f32 %v1841_v35, %v1802_v18 }
 0x96f   :  { %v1843_v12 = vpop.f32.mrf.mxu0 }
 0x970   :  { %v1874_v20 = vmul.f32 %v1866_v21, %v6855_v14  ;;  %v1867_v43 = vmul.f32 0.044715, %v6858_v15  ;;  %v1844_v61 = vadd.f32 %v1843_v12, %v1798_v11 }
 0x971   :  { %v1845_v22 = vpop.f32.mrf.mxu0 }
 0x972   :  { %v1882_v33 = vmul.f32 %v1874_v20, %v6855_v14  ;;  %v1875_v19 = vmul.f32 %v1867_v43, %v6858_v15  ;;  %v1868_v8 = vmul.f32 0.044715, %v1844_v61  ;;  %v1846_v16 = vadd.f32 %v1845_v22, %v1802_v18 }
 0x973   :  { %v1849_v31 = vpop.f32.mrf.mxu0 }
 0x974   :  { %v1890_v34 = vadd.f32 %v1882_v33, %v6855_v14  ;;  %v1883_v30 = vmul.f32 %v1875_v19, %v6858_v15  ;;  %v1876_v51 = vmul.f32 %v1868_v8, %v1844_v61  ;;  %v1869_v63 = vmul.f32 0.044715, %v1846_v16 }
 0x975   :  { %v6866_v39 = vadd.f32 %v1849_v31, %v1798_v11  ;;  %v1851_v42 = vpop.f32.mrf.mxu0  ;;  %v1860_v8 = vmul.f32 0.5, %v1844_v61 }
 0x976   :  { %v1898_v44 = vmul.f32 0.7978846, %v1890_v34  ;;  %v1884_v1 = vmul.f32 %v1876_v51, %v1844_v61  ;;  %v1877_v10 = vmul.f32 %v1869_v63, %v1846_v16  ;;  %v6868_v46 = vadd.f32 %v1851_v42, %v1802_v18 }
 0x977   :  { %v1870_v54 = vmul.f32 0.044715, %v6866_v39  ;;  %v1853_v47 = vpop.f32.mrf.mxu0  ;;  %v1891_v48 = vadd.f32 %v1883_v30, %v6858_v15  ;;  %v1859_v34 = vmul.f32 0.5, %v6858_v15  ;;  %v1861_v30 = vmul.f32 0.5, %v1846_v16 }
 0x978   :  { %v1892_v4 = vadd.f32 %v1884_v1, %v1844_v61  ;;  %v1885_v53 = vmul.f32 %v1877_v10, %v1846_v16  ;;  %v1871_v49 = vmul.f32 0.044715, %v6868_v46  ;;  %5591 = vtanh.f32 %v1898_v44 }
 0x979   :  { %v1878_v41 = vmul.f32 %v1870_v54, %v6866_v39  ;;  %v1854_v52 = vadd.f32 %v1853_v47, %v1798_v11  ;;  %v1855_v59 = vpop.f32.mrf.mxu0  ;;  %v1899_v50 = vmul.f32 0.7978846, %v1891_v48  ;;  %v1858_v63 = vmul.f32 0.5, %v6855_v14 }
 0x97a   :  { %v1900_v55 = vmul.f32 0.7978846, %v1892_v4  ;;  %v1879_v32 = vmul.f32 %v1871_v49, %v6868_v46  ;;  %v1856_v62 = vadd.f32 %v1855_v59, %v1802_v18  ;;  %v1893_v56 = vadd.f32 %v1885_v53, %v1846_v16 }
 0x97b   :  { %v1886_v13 = vmul.f32 %v1878_v41, %v6866_v39  ;;  %v1872_v3 = vmul.f32 0.044715, %v1854_v52  ;;  %5593 = vtanh.f32 %v1899_v50  ;;  %v1864_v61 = vmul.f32 0.5, %v1854_v52 }
 0x97c   :  { %5595 = vtanh.f32 %v1900_v55  ;;  %v1887_v37 = vmul.f32 %v1879_v32, %v6868_v46  ;;  %v1873_v57 = vmul.f32 0.044715, %v1856_v62  ;;  %v1901_v38 = vmul.f32 0.7978846, %v1893_v56 }
 0x97d   :  { %v1880_v9 = vmul.f32 %v1872_v3, %v1854_v52  ;;  %v1894_v36 = vadd.f32 %v1886_v13, %v6866_v39  ;;  %v1863_v16 = vmul.f32 0.5, %v6868_v46  ;;  %v1865_v50 = vmul.f32 0.5, %v1856_v62 }
 0x97e   :  { %v1881_v58 = vmul.f32 %v1873_v57, %v1856_v62  ;;  %5597 = vtanh.f32 %v1901_v38  ;;  %v1895_v6 = vadd.f32 %v1887_v37, %v6868_v46  ;;  %v1862_v55 = vmul.f32 0.5, %v6866_v39 }
 0x97f   :  { %v1888_v27 = vmul.f32 %v1880_v9, %v1854_v52  ;;  %v1902_v0 = vmul.f32 0.7978846, %v1894_v36  ;;  %v4829_v9 = vld [vmem:[#allocation6] ss:$0 sm:$0xff] }
 0x980   :  { %v1889_v2 = vmul.f32 %v1881_v58, %v1856_v62  ;;  %v1903_v11 = vmul.f32 0.7978846, %v1895_v6 }
 0x981   :  { %v1896_v18 = vadd.f32 %v1888_v27, %v1854_v52 }
 0x982   :  { %v1897_v5 = vadd.f32 %v1889_v2, %v1856_v62  ;;  %5599 = vtanh.f32 %v1903_v11 }
 0x983   :  { %v1904_v35 = vmul.f32 0.7978846, %v1896_v18  ;;  %5601 = vtanh.f32 %v1902_v0 }
 0x984   :  { %v1905_v21 = vmul.f32 0.7978846, %v1897_v5 }
 0x985   :  { %5603 = vtanh.f32 %v1904_v35  ;;  %v5592_v12 = vpop.eup %5591 }
 0x986   :  { %5605 = vtanh.f32 %v1905_v21  ;;  %v1914_v31 = vadd.f32 1.0, %v5592_v12 }
 0x988   :  { %v5594_v20 = vpop.eup %5593  ;;  %v1922_v54 = vmul.f32 %v1914_v31, %v1858_v63 }
 0x989   :  { %v5596_v43 = vpop.eup %5595  ;;  %v1915_v22 = vadd.f32 1.0, %v5594_v20 }
 0x98a   :  { %v1916_v33 = vadd.f32 1.0, %v5596_v43 }
 0x98b   :  { %v5598_v19 = vpop.eup %5597  ;;  %v1923_v44 = vmul.f32 %v1915_v22, %v1859_v34 }
 0x98c   :  { %v1917_v51 = vadd.f32 1.0, %v5598_v19  ;;  %v1924_v42 = vmul.f32 %v1916_v33, %v1860_v8 }
 0x98e   :  { %v1925_v1 = vmul.f32 %v1917_v51, %v1861_v30  ;;  %v1962_v4 = vpack.c.bf16 %v1924_v42, %v1922_v54  ;;  %v4875_v54 = vld [vmem:[%s8147_s30 + $0x2d8] sm:$0xff] }
 0x98f   :  { %v5600_v10 = vpop.eup %5599 }
 0x990   :  { %v5602_v47 = vpop.eup %5601  ;;  %v1963_v48 = vpack.c.bf16 %v1925_v1, %v1923_v44  ;;  %v1919_v49 = vadd.f32 1.0, %v5600_v10 }
 0x991   :  { %v1918_v59 = vadd.f32 1.0, %v5602_v47  ;;  %v4878_v47 = vld [vmem:[%s8147_s30 + $0x2f0] sm:$0xff] }
 0x992   :  { %v5604_v53 = vpop.eup %5603  ;;  %2021 = vmatprep.mubr.bf16.mxu1 %v1963_v48  ;;  %v1927_v56 = vmul.f32 %v1919_v49, %v1863_v16  ;;  %v2209_v48 = vpack.c.bf16 %v4878_v47, %v4875_v54  ;;  %v4871_v16 = vld [vmem:[%s8147_s30 + $0x2b8] sm:$0xff]  ;;  %v4838_v54 = vld [vmem:[%s8147_s30 + $0x1b0] sm:$0xff]  ;;  %v4841_v47 = vld [vmem:[%s8147_s30 + $0x1c8] sm:$0xff] }
 0x993   :  { %v5606_v41 = vpop.eup %5605  ;;  %2022 = vmatmul.mubr.bf16.vlgmr.msra.gmra.mxu1 %v1962_v4  ;;  %v1920_v15 = vadd.f32 1.0, %v5604_v53  ;;  %v1926_v3 = vmul.f32 %v1918_v59, %v1862_v55  ;;  %v4874_v4 = vld [vmem:[%s8147_s30 + $0x2d0] sm:$0xff]  ;;  %v4877_v53 = vld [vmem:[%s8147_s30 + $0x2e8] sm:$0xff] }
 0x994   :  { %v1921_v14 = vadd.f32 1.0, %v5606_v41  ;;  %v2208_v49 = vpack.c.bf16 %v4877_v53, %v4874_v4  ;;  %2229 = vmatprep.subr.bf16.mxu0 %v2209_v48  ;;  %v4869_v41 = vld [vmem:[%s8147_s30 + $0x2a8] sm:$0xff]  ;;  %v4866_v55 = vld [vmem:[%s8147_s30 + $0x290] sm:$0xff]  ;;  %v4836_v53 = vld [vmem:[%s8147_s30 + $0x1a0] sm:$0xff] }
 0x995   :  { %v1928_v32 = vmul.f32 %v1920_v15, %v1864_v61  ;;  %v4872_v61 = vld [vmem:[%s8147_s30 + $0x2c0] sm:$0xff]  ;;  %v4833_v4 = vld [vmem:[%s8147_s30 + $0x188] sm:$0xff] }
 0x996   :  { %v1929_v13 = vmul.f32 %v1921_v14, %v1865_v50  ;;  %2230 = vmatpush1.bf16.msra.mxu0 %v2208_v49  ;;  %v2206_v59 = vpack.c.bf16 %v4872_v61, %v4869_v41  ;;  %v4868_v15 = vld [vmem:[%s8147_s30 + $0x2a0] sm:$0xff]  ;;  %v4863_v14 = vld [vmem:[%s8147_s30 + $0x278] sm:$0xff]  ;;  %v4846_v49 = vld [vmem:[%s8147_s30 + $0x1f0] sm:$0xff]  ;;  %v2190_v41 = vpack.c.bf16 %v4841_v47, %v4838_v54 }
 0x997   :  { %v1964_v57 = vpack.c.bf16 %v1928_v32, %v1926_v3  ;;  %v2205_v50 = vpack.c.bf16 %v4871_v16, %v4868_v15  ;;  %v4876_v32 = vld [vmem:[%s8147_s30 + $0x2e0] sm:$0xff]  ;;  %v4862_v3 = vld [vmem:[%s8147_s30 + $0x270] sm:$0xff]  ;;  %v4849_v61 = vld [vmem:[%s8147_s30 + $0x208] sm:$0xff] }
 0x998   :  { %v1965_v37 = vpack.c.bf16 %v1929_v13, %v1927_v56  ;;  %2231 = vmatprep.subr.bf16.mxu0 %v2206_v59  ;;  %v2203_v56 = vpack.c.bf16 %v4866_v55, %v4863_v14  ;;  %v4879_v13 = vld [vmem:[%s8147_s30 + $0x2f8] sm:$0xff]  ;;  %v2188_v59 = vpack.c.bf16 %v4836_v53, %v4833_v4  ;;  %v4832_v15 = vld [vmem:[%s8147_s30 + $0x180] sm:$0xff] }
 0x999   :  { %v4835_v16 = vld [vmem:[%s8147_s30 + $0x198] sm:$0xff]  ;;  %v4840_v55 = vld [vmem:[%s8147_s30 + $0x1c0] sm:$0xff] }
 0x99a   :  { %2029 = vmatprep.mubr.bf16.mxu1 %v1965_v37  ;;  %2232 = vmatpush1.bf16.msra.mxu0 %v2205_v50  ;;  %v4865_v37 = vld [vmem:[%s8147_s30 + $0x288] sm:$0xff]  ;;  %v2195_v50 = vpack.c.bf16 %v4849_v61, %v4846_v49  ;;  %v2187_v14 = vpack.c.bf16 %v4835_v16, %v4832_v15  ;;  %v4831_v53 = vld [vmem:[#allocation9] ss:$0 sm:$0xff] }
 0x99b   :  { %2030 = vmatmul.mubr.bf16.gmra.mxu1 %v1964_v57  ;;  %v2210_v57 = vpack.c.bf16 %v4879_v13, %v4876_v32  ;;  %2233 = vmatprep.subr.bf16.mxu0 %v2203_v56  ;;  %v4843_v32 = vld [vmem:[%s8147_s30 + $0x1d8] sm:$0xff]  ;;  %v4834_v13 = vld [vmem:[%s8147_s30 + $0x190] sm:$0xff] }
 0x99c   :  { %v2192_v56 = vpack.c.bf16 %v4843_v32, %v4840_v55 }
 0x99d   :  { %5252 = vmatprep.subr.bf16.mxu1 %v2210_v57 }
 0x99e   :  { %5253 = vmatpush3.bf16.msra.mxu1 %v2210_v57 }
 0xa53   :  { %v5014_v38 = vpop.f32.mrf.mxu1 }
 0xa55   :  { %v5015_v36 = vpop.f32.mrf.mxu1 }
 0xa56   :  { %v5016_v52 = vadd.f32 %v5015_v36, %v5014_v38  ;;  %v2202_v38 = vpack.c.bf16 %v4865_v37, %v4862_v3  ;;  %v4860_v36 = vld [vmem:[%s8147_s30 + $0x260] sm:$0xff]  ;;  %v4837_v3 = vld [vmem:[%s8147_s30 + $0x1a8] sm:$0xff] }
 0xa57   :  { %v5017_v58 = vpop.f32.mrf.mxu1  ;;  %v2189_v37 = vpack.c.bf16 %v4837_v3, %v4834_v13 }
 0xa58   :  { %v2024_v6 = vadd.f32 %v5016_v52, %v4829_v9  ;;  %2234 = vmatpush1.bf16.msra.mxu0 %v2202_v38  ;;  %v4870_v52 = vld [vmem:[%s8147_s30 + $0x2b0] sm:$0xff] }
 0xa59   :  { %v5018_v27 = vpop.f32.mrf.mxu1 }
 0xa5a   :  { %v5019_v46 = vadd.f32 %v5018_v27, %v5017_v58  ;;  %v2038_v62 = vadd.f32 %v2024_v6, %v6835_v29  ;;  %v4873_v6 = vld [vmem:[%s8147_s30 + $0x2c8] sm:$0xff]  ;;  %v4856_v27 = vld [vmem:[%s8147_s30 + $0x240] sm:$0xff] }
 0xa5b   :  { %v5020_v0 = vpop.f32.mrf.mxu1 }
 0xa5c   :  { %v2027_v39 = vadd.f32 %v5019_v46, %v4829_v9  ;;  %2044 = vadd.xlane.f32.xlu0 %v2038_v62  ;;  %v4859_v46 = vld [vmem:[%s8147_s30 + $0x258] sm:$0xff] }
 0xa5d   :  { %v5021_v2 = vpop.f32.mrf.mxu1 }
 0xa5e   :  { %v5022_v11 = vadd.f32 %v5021_v2, %v5020_v0  ;;  %v2039_v18 = vadd.f32 %v2027_v39, %v6837_v40  ;;  %v2199_v0 = vpack.c.bf16 %v4859_v46, %v4856_v27  ;;  %v4851_v39 = vld [vmem:[%s8147_s30 + $0x218] sm:$0xff]  ;;  %v4854_v2 = vld [vmem:[%s8147_s30 + $0x230] sm:$0xff] }
 0xa5f   :  { %v5023_v5 = vpop.f32.mrf.mxu1 }
 0xa60   :  { %v2032_v35 = vadd.f32 %v5022_v11, %v4829_v9  ;;  %2046 = vadd.xlane.f32.xlu1 %v2039_v18  ;;  %v4864_v11 = vld [vmem:[%s8147_s30 + $0x280] sm:$0xff] }
 0xa61   :  { %v5024_v21 = vpop.f32.mrf.mxu1 }
 0xa62   :  { %v5025_v12 = vadd.f32 %v5024_v21, %v5023_v5  ;;  %v2040_v20 = vadd.f32 %v2032_v35, %v6845_v45  ;;  %v4867_v5 = vld [vmem:[%s8147_s30 + $0x298] sm:$0xff]  ;;  %v4850_v35 = vld [vmem:[%s8147_s30 + $0x210] sm:$0xff]  ;;  %v4853_v21 = vld [vmem:[%s8147_s30 + $0x228] sm:$0xff] }
 0xa64   :  { %v2035_v43 = vadd.f32 %v5025_v12, %v4829_v9  ;;  %2048 = vadd.xlane.f32.xlu0 %v2040_v20  ;;  %v4857_v9 = vld [vmem:[%s8147_s30 + $0x248] sm:$0xff]  ;;  %v2204_v12 = vpack.c.bf16 %v4867_v5, %v4864_v11 }
 0xa65   :  { %v2200_v58 = vpack.c.bf16 %v4860_v36, %v4857_v9 }
 0xa66   :  { %v2041_v22 = vadd.f32 %v2035_v43, %v6843_v7  ;;  %v4845_v43 = vld [vmem:[%s8147_s30 + $0x1e8] sm:$0xff] }
 0xa67   :  { %2235 = vmatprep.subr.bf16.mxu0 %v2200_v58 }
 0xa68   :  { %2050 = vadd.xlane.f32.xlu1 %v2041_v22  ;;  %2236 = vmatpush1.bf16.msra.mxu0 %v2199_v0 }
 0xae5   :  { %v2045_v29 = vpop.xlane.xlu0 %2044 }
 0xae6   :  { %v2052_v33 = vmul.f32 0.0078125, %v2045_v29  ;;  %v4858_v29 = vld [vmem:[%s8147_s30 + $0x250] sm:$0xff] }
 0xae8   :  { %v6887_v19 = vsub.f32 %v2038_v62, %v2052_v33  ;;  %v2207_v62 = vpack.c.bf16 %v4873_v6, %v4870_v52 }
 0xae9   :  { %v2047_v8 = vpop.xlane.xlu1 %2046 }
 0xaea   :  { %v2053_v31 = vmul.f32 0.0078125, %v2047_v8  ;;  %v2060_v40 = vmul.f32 %v6887_v19, %v6887_v19  ;;  %5254 = vmatprep.subr.bf16.mxu1 %v2207_v62  ;;  %v4861_v8 = vld [vmem:[%s8147_s30 + $0x268] sm:$0xff] }
 0xaeb   :  { %5255 = vmatpush3.bf16.msra.mxu1 %v2207_v62 }
 0xaec   :  { %2064 = vadd.xlane.f32.xlu0 %v2060_v40  ;;  %v6891_v34 = vsub.f32 %v2039_v18, %v2053_v31  ;;  %v2197_v18 = vpack.c.bf16 %v4854_v2, %v4851_v39  ;;  %5256 = vmatprep.subr.bf16.mxu1 %v2204_v12  ;;  %v4844_v31 = vld [vmem:[%s8147_s30 + $0x1e0] sm:$0xff]  ;;  %v4847_v40 = vld [vmem:[%s8147_s30 + $0x1f8] sm:$0xff] }
 0xaed   :  { %v2049_v30 = vpop.xlane.xlu0 %2048 }
 0xaee   :  { %v2054_v51 = vmul.f32 0.0078125, %v2049_v30  ;;  %v2061_v45 = vmul.f32 %v6891_v34, %v6891_v34  ;;  %2237 = vmatprep.subr.bf16.mxu0 %v2197_v18  ;;  %v2201_v30 = vpack.c.bf16 %v4861_v8, %v4858_v29 }
 0xaef   :  { %5257 = vmatpush3.bf16.msra.mxu1 %v2204_v12 }
 0xaf0   :  { %2066 = vadd.xlane.f32.xlu1 %v2061_v45  ;;  %v6895_v7 = vsub.f32 %v2040_v20, %v2054_v51  ;;  %v2196_v20 = vpack.c.bf16 %v4853_v21, %v4850_v35  ;;  %v2193_v51 = vpack.c.bf16 %v4847_v40, %v4844_v31  ;;  %v4839_v45 = vld [vmem:[%s8147_s30 + $0x1b8] sm:$0xff]  ;;  %5258 = vmatprep.subr.bf16.mxu1 %v2201_v30 }
 0xaf1   :  { %v2051_v63 = vpop.xlane.xlu1 %2050 }
 0xaf2   :  { %v2055_v42 = vmul.f32 0.0078125, %v2051_v63  ;;  %v2062_v44 = vmul.f32 %v6895_v7, %v6895_v7  ;;  %2238 = vmatpush1.bf16.msra.mxu0 %v2196_v20  ;;  %v4842_v63 = vld [vmem:[%s8147_s30 + $0x1d0] sm:$0xff] }
 0xaf3   :  { %5259 = vmatpush3.bf16.msra.mxu1 %v2201_v30 }
 0xaf4   :  { %2068 = vadd.xlane.f32.xlu0 %v2062_v44  ;;  %v6899_v1 = vsub.f32 %v2041_v22, %v2055_v42  ;;  %v4848_v22 = vld [vmem:[%s8147_s30 + $0x200] sm:$0xff]  ;;  %v2191_v44 = vpack.c.bf16 %v4842_v63, %v4839_v45 }
 0xaf5   :  { %v2194_v33 = vpack.c.bf16 %v4848_v22, %v4845_v43  ;;  %v4852_v42 = vld [vmem:[%s8147_s30 + $0x220] sm:$0xff] }
 0xaf6   :  { %v2063_v10 = vmul.f32 %v6899_v1, %v6899_v1 }
 0xaf7   :  { %2239 = vmatprep.subr.bf16.mxu0 %v2194_v33 }
 0xaf8   :  { %2070 = vadd.xlane.f32.xlu1 %v2063_v10  ;;  %v4855_v10 = vld [vmem:[%s8147_s30 + $0x238] sm:$0xff]  ;;  %2240 = vmatpush1.bf16.msra.mxu0 %v2193_v51 }
 0xaf9   :  { %v2198_v48 = vpack.c.bf16 %v4855_v10, %v4852_v42  ;;  %2241 = vmatprep.subr.bf16.mxu0 %v2191_v44  ;;  %v4830_v44 = vld [vmem:[#allocation7] ss:$0 sm:$0xff] }
 0xafa   :  { %v2110_v54 = vmul.f32 %v4830_v44, %v6887_v19  ;;  %v2111_v47 = vmul.f32 %v4830_v44, %v6891_v34  ;;  %v2112_v15 = vmul.f32 %v4830_v44, %v6895_v7  ;;  %v4880_v7 = vld [vmem:[%s8150_s19 + $0x3] sm:$0x7] }
 0xafb   :  { %5260 = vmatprep.subr.bf16.mxu1 %v2198_v48  ;;  %v2217_v13 = vrot.slane %v4880_v7, %v6388_v25 }
 0xafc   :  { %2242 = vmatpush1.bf16.msra.mxu0 %v2190_v41  ;;  %5261 = vmatpush3.bf16.msra.mxu1 %v2198_v48 }
 0xafd   :  { %2243 = vmatprep.subr.bf16.mxu0 %v2188_v59  ;;  %5262 = vmatprep.subr.bf16.mxu1 %v2195_v50 }
 0xb00   :  { %2244 = vmatpush1.bf16.msra.mxu0 %v2187_v14  ;;  %5263 = vmatpush3.bf16.msra.mxu1 %v2195_v50  ;;  %v2113_v50 = vmul.f32 %v4830_v44, %v6899_v1 }
 0xb01   :  { %5272 = vmatprep.subr.bf16.mxu0 %v6005_v17  ;;  %5264 = vmatprep.subr.bf16.mxu1 %v2192_v56 }
 0xb04   :  { %5265 = vmatpush3.bf16.msra.mxu1 %v2192_v56 }
 0xb05   :  { %5266 = vmatprep.subr.bf16.mxu1 %v2189_v37 }
 0xb08   :  { %5267 = vmatpush3.bf16.msra.mxu1 %v2189_v37  ;;  %v2221_v37 = vrot.slane %v4880_v7, %v6397_v28 }
 0xb09   :  { %5290 = vmatprep.subr.bf16.mxu1 %v6005_v17 }
 0xb75   :  { %v2065_v57 = vpop.xlane.xlu0 %2064 }
 0xb76   :  { %v2072_v38 = vmul.f32 0.007874016, %v2065_v57 }
 0xb78   :  { %5607 = vrsqrt.f32 %v2072_v38  ;;  %vm2078_vm5 = vcmp.eq.f32.partialorder %v2072_v38, inf  ;;  %v2081_v0 = vand.u32 2147483648, %v2072_v38  ;;  %vm2080_vm6 = vcmp.eq.f32.partialorder %v2072_v38, 0.0 }
 0xb79   :  { %v2067_v9 = vpop.xlane.xlu1 %2066 }
 0xb7a   :  { %v2073_v36 = vmul.f32 0.007874016, %v2067_v9 }
 0xb7c   :  { %5609 = vrsqrt.f32 %v2073_v36  ;;  %vm2085_vm7 = vcmp.eq.f32.partialorder %v2073_v36, inf  ;;  %v2088_v35 = vand.u32 2147483648, %v2073_v36  ;;  %vm2087_vm13 = vcmp.eq.f32.partialorder %v2073_v36, 0.0 }
 0xb7d   :  { %v2069_v52 = vpop.xlane.xlu0 %2068 }
 0xb7e   :  { %v2074_v58 = vmul.f32 0.007874016, %v2069_v52 }
 0xb80   :  { %5611 = vrsqrt.f32 %v2074_v58  ;;  %vm2092_vm14 = vcmp.eq.f32.partialorder %v2074_v58, inf  ;;  %v2095_v29 = vand.u32 2147483648, %v2074_v58  ;;  %vm2094_vm15 = vcmp.eq.f32.partialorder %v2074_v58, 0.0 }
 0xb81   :  { %v2071_v6 = vpop.xlane.xlu1 %2070 }
 0xb82   :  { %v2075_v27 = vmul.f32 0.007874016, %v2071_v6 }
 0xb84   :  { %5613 = vrsqrt.f32 %v2075_v27  ;;  %vm2099_vm0 = vcmp.eq.f32.partialorder %v2075_v27, inf  ;;  %v2102_v51 = vand.u32 2147483648, %v2075_v27  ;;  %vm2101_vm1 = vcmp.eq.f32.partialorder %v2075_v27, 0.0 }
 0xb85   :  { %v5608_v46 = vpop.eup %5607 }
 0xb86   :  { %v2077_v62 = vmul.f32 %v5608_v46, %v2072_v38 }
 0xb88   :  { %v2079_v39 = vsel %vm2078_vm5, %v2072_v38, %v2077_v62 }
 0xb89   :  { %v5610_v2 = vpop.eup %5609  ;;  %v2082_v11 = vsel %vm2080_vm6, %v2081_v0, %v2079_v39 }
 0xb8a   :  { %v2114_v18 = vadd.f32 1e-06, %v2082_v11  ;;  %v2084_v5 = vmul.f32 %v5610_v2, %v2073_v36 }
 0xb8c   :  { %5615 = vrcp.f32 %v2114_v18  ;;  %v2086_v21 = vsel %vm2085_vm7, %v2073_v36, %v2084_v5  ;;  %v7076_v36 = vrot.slane %v4880_v7, %v6391_v26 }
 0xb8d   :  { %v5612_v12 = vpop.eup %5611  ;;  %v2089_v20 = vsel %vm2087_vm13, %v2088_v35, %v2086_v21 }
 0xb8e   :  { %v2115_v43 = vadd.f32 1e-06, %v2089_v20  ;;  %v2091_v22 = vmul.f32 %v5612_v12, %v2074_v58 }
 0xb90   :  { %5617 = vrcp.f32 %v2115_v43  ;;  %v2093_v33 = vsel %vm2092_vm14, %v2074_v58, %v2091_v22 }
 0xb91   :  { %v5614_v8 = vpop.eup %5613  ;;  %v2096_v31 = vsel %vm2094_vm15, %v2095_v29, %v2093_v33 }
 0xb92   :  { %v2116_v40 = vadd.f32 1e-06, %v2096_v31  ;;  %v2098_v30 = vmul.f32 %v5614_v8, %v2075_v27 }
 0xb94   :  { %v2100_v45 = vsel %vm2099_vm0, %v2075_v27, %v2098_v30  ;;  %5619 = vrcp.f32 %v2116_v40 }
 0xb95   :  { %v2103_v63 = vsel %vm2101_vm1, %v2102_v51, %v2100_v45 }
 0xb96   :  { %v2117_v42 = vadd.f32 1e-06, %v2103_v63 }
 0xb98   :  { %5621 = vrcp.f32 %v2117_v42 }
 0xb99   :  { %v5616_v10 = vpop.eup %5615 }
 0xb9a   :  { %v2119_v48 = vmul.f32 %v5616_v10, %v2110_v54 }
 0xb9c   :  { %v7051_v41 = vadd.f32 %v4831_v53, %v2119_v48 }
 0xb9d   :  { %v5618_v4 = vpop.eup %5617 }
 0xb9e   :  { %v2121_v49 = vmul.f32 %v5618_v4, %v2111_v47 }
 0xba0   :  { %v7053_v61 = vadd.f32 %v4831_v53, %v2121_v49 }
 0xba1   :  { %v5620_v59 = vpop.eup %5619 }
 0xba2   :  { %v2185_v16 = vpack.c.bf16 %v7053_v61, %v7051_v41  ;;  %v2123_v19 = vmul.f32 %v5620_v59, %v2112_v15 }
 0xba4   :  { %2262 = vmatmul.mubr.bf16.vlgmr.msra.gmra.mxu0 %v2185_v16  ;;  %5268 = vmatprep.mubr.bf16.mxu1 %v2185_v16  ;;  %v7060_v55 = vadd.f32 %v4831_v53, %v2123_v19 }
 0xba5   :  { %v5622_v34 = vpop.eup %5621  ;;  %2271 = vmatprep.mubr.bf16.mxu0 %v6004_v60 }
 0xba6   :  { %v2125_v14 = vmul.f32 %v5622_v34, %v2113_v50 }
 0xba8   :  { %v7062_v32 = vadd.f32 %v4831_v53, %v2125_v14 }
 0xbaa   :  { %v2186_v56 = vpack.c.bf16 %v7062_v32, %v7060_v55 }
 0xbac   :  { %2272 = vmatmul.mubr.bf16.gmra.mxu0 %v2186_v56  ;;  %5269 = vmatmul.mubr.bf16.vlgmr.msra.gmra.mxu1 %v2186_v56 }
 0xbad   :  { %5274 = vmatprep.mubr.msk.bf16.mxu0 %vm6006_vm8, %v6005_v17  ;;  %5292 = vmatprep.mubr.msk.bf16.mxu1 %vm6006_vm8, %v6005_v17 }
 0xc64   :  { %v2263_v1 = vpop.f32.mrf.mxu0 }
 0xc65   :  { %v2264_v38 = vadd.f32 %v2263_v1, %v2217_v13 }
 0xc66   :  { %v2265_v3 = vpop.f32.mrf.mxu0 }
 0xc67   :  { %v2266_v58 = vadd.f32 %v2265_v3, %v2221_v37 }
 0xc68   :  { %v2267_v57 = vpop.f32.mrf.mxu0 }
 0xc69   :  { %v2268_v9 = vadd.f32 %v2267_v57, %v2217_v13 }
 0xc6a   :  { %v2269_v52 = vpop.f32.mrf.mxu0 }
 0xc6b   :  { %v2331_v6 = vpack.c.bf16 %v2268_v9, %v2264_v38  ;;  %v2270_v27 = vadd.f32 %v2269_v52, %v2221_v37 }
 0xc6c   :  { %v2273_v46 = vpop.f32.mrf.mxu0  ;;  %v5270_v62 = vpop.f32.mrf.mxu1 }
 0xc6d   :  { %v2332_v0 = vpack.c.bf16 %v2270_v27, %v2266_v58  ;;  %v2325_v39 = vadd.f32 %v5270_v62, %v7076_v36  ;;  %2381 = vrot.lane.b32.xlu1 %v2331_v6, %s6007_s29  ;;  %v2274_v8 = vadd.f32 %v2273_v46, %v2217_v13 }
 0xc6e   :  { %v2275_v2 = vpop.f32.mrf.mxu0  ;;  %v7080_v11 = vpop.f32.mrf.mxu1 }
 0xc6f   :  { %2384 = vrot.lane.b32.xlu0 %v2332_v0, %s6007_s29  ;;  %v2337_v18 = vsel %vm503_vm9, %v2332_v0, 0  ;;  %v2276_v20 = vadd.f32 %v2275_v2, %v2221_v37  ;;  %v2317_v34 = vadd.f32 %v7080_v11, %v7076_v36 }
 0xc70   :  { %v2277_v5 = vpop.f32.mrf.mxu0  ;;  %v5271_v35 = vpop.f32.mrf.mxu1  ;;  %5273 = vmatpush3.bf16.xpose.msra.mxu0 %v2337_v18 }
 0xc71   :  { %v2328_v21 = vadd.f32 %v5271_v35, %v7076_v36  ;;  %2435 = vrot.lane.b32.xlu1 %v2332_v0, %s6008_s20  ;;  %5278 = vmatprep.subr.bf16.mxu0 %v6005_v17  ;;  %v2278_v29 = vadd.f32 %v2277_v5, %v2217_v13 }
 0xc72   :  { %v2279_v12 = vpop.f32.mrf.mxu0  ;;  %v2319_v16 = vpop.f32.mrf.mxu1 }
 0xc73   :  { %v7087_v43 = vpack.c.bf16 %v2328_v21, %v2325_v39  ;;  %v2280_v22 = vadd.f32 %v2279_v12, %v2221_v37  ;;  %2433 = vrot.lane.b32.xlu0 %v2331_v6, %s6008_s20  ;;  %v2535_v31 = vpack.c.bf16 %v2278_v29, %v2274_v8  ;;  %v2320_v19 = vadd.f32 %v2319_v16, %v7076_v36  ;;  %v5799_v37 = vld [vmem:[%s8151_s6] ss:$0 sm:$0xff] }
 0xc75   :  { %v2536_v33 = vpack.c.bf16 %v2280_v22, %v2276_v20  ;;  %2486 = vrot.lane.b32.xlu1 %v2332_v0, %s6009_s0  ;;  %v7134_v56 = vpack.c.bf16 %v2320_v19, %v2317_v34  ;;  %v5800_v19 = vld [vmem:[%s8151_s6 + $0x1] ss:$0 sm:$0xff] }
 0xc77   :  { %5275 = vmatmul.mubr.msk.bf16.vlgmr.msra.gmra.mxu0 %vm503_vm9, %v2331_v6  ;;  %2588 = vrot.lane.b32.xlu0 %v2536_v33, %s6007_s29  ;;  %v2541_v53 = vsel %vm503_vm9, %v2536_v33, 0 }
 0xc78   :  { %5280 = vmatprep.mubr.msk.bf16.mxu0 %vm6006_vm8, %v6005_v17 }
 0xc79   :  { %2484 = vrot.lane.b32.xlu1 %v2331_v6, %s6009_s0 }
 0xc7b   :  { %2585 = vrot.lane.b32.xlu0 %v2535_v31, %s6007_s29 }
 0xc7d   :  { %2639 = vrot.lane.b32.xlu1 %v2536_v33, %s6008_s20 }
 0xc7f   :  { %2637 = vrot.lane.b32.xlu0 %v2535_v31, %s6008_s20 }
 0xc81   :  { %2690 = vrot.lane.b32.xlu1 %v2536_v33, %s6009_s0 }
 0xc85   :  { %2688 = vrot.lane.b32.xlu1 %v2535_v31, %s6009_s0 }
 0xcdf   :  { %v2382_v40 = vpop.permute.xlu1 %2381 }
 0xce1   :  { %v2385_v30 = vpop.permute.xlu0 %2384 }
 0xce2   :  { %v2390_v51 = vsel %vm503_vm9, %v2385_v30, 0 }
 0xce3   :  { %v2436_v45 = vpop.permute.xlu1 %2435  ;;  %5279 = vmatpush3.bf16.xpose.msra.mxu0 %v2390_v51 }
 0xce4   :  { %5284 = vmatprep.subr.bf16.mxu0 %v6005_v17  ;;  %v2441_v10 = vsel %vm503_vm9, %v2436_v45, 0 }
 0xce5   :  { %v2434_v63 = vpop.permute.xlu0 %2433 }
 0xce7   :  { %v2487_v42 = vpop.permute.xlu1 %2486 }
 0xce8   :  { %v2492_v44 = vsel %vm503_vm9, %v2487_v42, 0 }
 0xce9   :  { %5291 = vmatpush3.bf16.xpose.msra.mxu1 %v2492_v44  ;;  %v2589_v47 = vpop.permute.xlu0 %2588 }
 0xcea   :  { %5281 = vmatmul.mubr.msk.bf16.vlgmr.msra.gmra.mxu0 %vm503_vm9, %v2382_v40  ;;  %5302 = vmatprep.subr.bf16.mxu1 %v6005_v17  ;;  %v2594_v4 = vsel %vm503_vm9, %v2589_v47, 0 }
 0xceb   :  { %v2485_v54 = vpop.permute.xlu1 %2484  ;;  %5285 = vmatpush3.bf16.xpose.msra.mxu0 %v2441_v10  ;;  %5286 = vmatprep.mubr.msk.bf16.mxu0 %vm6006_vm8, %v6005_v17 }
 0xcec   :  { %5296 = vmatprep.subr.bf16.mxu0 %v6005_v17 }
 0xced   :  { %v2586_v59 = vpop.permute.xlu0 %2585 }
 0xcef   :  { %v2640_v48 = vpop.permute.xlu1 %2639 }
 0xcf0   :  { %5293 = vmatmul.mubr.msk.bf16.vlgmr.msra.gmra.mxu1 %vm503_vm9, %v2485_v54  ;;  %v2645_v50 = vsel %vm503_vm9, %v2640_v48, 0 }
 0xcf1   :  { %5303 = vmatpush3.bf16.xpose.msra.mxu1 %v2594_v4  ;;  %5304 = vmatprep.mubr.msk.bf16.mxu1 %vm6006_vm8, %v6005_v17  ;;  %v2638_v7 = vpop.permute.xlu0 %2637 }
 0xcf2   :  { %5287 = vmatmul.mubr.msk.bf16.vlgmr.msra.gmra.mxu0 %vm503_vm9, %v2434_v63  ;;  %5314 = vmatprep.subr.bf16.mxu1 %v6005_v17 }
 0xcf3   :  { %5297 = vmatpush3.bf16.xpose.msra.mxu0 %v2541_v53  ;;  %5298 = vmatprep.mubr.msk.bf16.mxu0 %vm6006_vm8, %v6005_v17  ;;  %v2691_v49 = vpop.permute.xlu1 %2690 }
 0xcf4   :  { %5308 = vmatprep.subr.bf16.mxu0 %v6005_v17  ;;  %v2696_v15 = vsel %vm503_vm9, %v2691_v49, 0 }
 0xcf7   :  { %v2689_v14 = vpop.permute.xlu1 %2688 }
 0xcf8   :  { %5305 = vmatmul.mubr.msk.bf16.vlgmr.msra.gmra.mxu1 %vm503_vm9, %v2586_v59 }
 0xcf9   :  { %5315 = vmatpush3.bf16.xpose.msra.mxu1 %v2696_v15  ;;  %5316 = vmatprep.mubr.msk.bf16.mxu1 %vm6006_vm8, %v6005_v17 }
 0xcfa   :  { %5299 = vmatmul.mubr.msk.bf16.vlgmr.msra.gmra.mxu0 %vm503_vm9, %v2535_v31  ;;  %5326 = vmatprep.subr.bf16.mxu1 %v6005_v17 }
 0xcfb   :  { %5309 = vmatpush3.bf16.xpose.msra.mxu0 %v2645_v50  ;;  %5310 = vmatprep.mubr.msk.bf16.mxu0 %vm6006_vm8, %v6005_v17 }
 0xcfc   :  { %5320 = vmatprep.subr.bf16.mxu0 %v6005_v17 }
 0xd00   :  { %5317 = vmatmul.mubr.msk.bf16.vlgmr.msra.gmra.mxu1 %vm503_vm9, %v2689_v14 }
 0xd01   :  { %5328 = vmatprep.mubr.msk.bf16.mxu1 %vm6006_vm8, %v6005_v17 }
 0xd02   :  { %5311 = vmatmul.mubr.msk.bf16.vlgmr.msra.gmra.mxu0 %vm503_vm9, %v2638_v7 }
 0xd03   :  { %5321 = vmatpush3.bf16.msra.mxu0 %v7134_v56  ;;  %5322 = vmatprep.mubr.msk.bf16.mxu0 %vm6006_vm8, %v6005_v17 }
 0xd04   :  { %5332 = vmatprep.subr.bf16.mxu0 %v6005_v17 }
 0xd37   :  { %v2373_v1 = vpop.f32.mrf.mxu0 }
 0xd38   :  { %v2739_v13 = vmul.f32 0.17677669, %v2373_v1 }
 0xd39   :  { %v5276_v3 = vpop.f32.mrf.mxu0 }
 0xd3a   :  { %v7146_v57 = vadd.f32 %v5799_v37, %v2739_v13 }
 0xd3b   :  { %v2376_v38 = vpop.f32.mrf.mxu0 }
 0xd3c   :  { %v2740_v9 = vmul.f32 0.17677669, %v2376_v38  ;;  %v2771_v36 = vsel %vm942_vm10, %v7146_v57, -inf }
 0xd3d   :  { %v5277_v52 = vpop.f32.mrf.mxu0  ;;  %2772 = vmax.xlane.f32.xlu0 %v2771_v36 }
 0xd3e   :  { %v7150_v58 = vadd.f32 %v5799_v37, %v2740_v9 }
 0xd40   :  { %v2774_v6 = vsel %vm942_vm10, %v7150_v58, -inf }
 0xd41   :  { %2775 = vmax.xlane.f32.xlu1 %v2774_v6 }
 0xdaa   :  { %v2426_v27 = vpop.f32.mrf.mxu0 }
 0xdab   :  { %v2741_v46 = vmul.f32 0.17677669, %v2426_v27 }
 0xdac   :  { %v5282_v62 = vpop.f32.mrf.mxu0 }
 0xdad   :  { %v7154_v0 = vadd.f32 %v5799_v37, %v2741_v46 }
 0xdae   :  { %v2429_v39 = vpop.f32.mrf.mxu0 }
 0xdaf   :  { %v2742_v2 = vmul.f32 0.17677669, %v2429_v39  ;;  %v2777_v11 = vsel %vm942_vm10, %v7154_v0, -inf }
 0xdb0   :  { %v2528_v18 = vpop.f32.mrf.mxu1  ;;  %2778 = vmax.xlane.f32.xlu0 %v2777_v11  ;;  %v5283_v5 = vpop.f32.mrf.mxu0 }
 0xdb1   :  { %v7158_v35 = vadd.f32 %v5799_v37, %v2742_v2  ;;  %v2745_v20 = vmul.f32 0.17677669, %v2528_v18 }
 0xdb2   :  { %v2477_v21 = vpop.f32.mrf.mxu0  ;;  %v5294_v12 = vpop.f32.mrf.mxu1 }
 0xdb3   :  { %v2743_v22 = vmul.f32 0.17677669, %v2477_v21  ;;  %v2780_v29 = vsel %vm942_vm10, %v7158_v35, -inf  ;;  %v7164_v45 = vadd.f32 %v5799_v37, %v2745_v20 }
 0xdb4   :  { %v2531_v33 = vpop.f32.mrf.mxu1  ;;  %2781 = vmax.xlane.f32.xlu0 %v2780_v29  ;;  %v5288_v8 = vpop.f32.mrf.mxu0 }
 0xdb5   :  { %v2746_v31 = vmul.f32 0.17677669, %v2531_v33  ;;  %v7162_v40 = vadd.f32 %v5799_v37, %v2743_v22  ;;  %v2789_v15 = vsel %vm942_vm10, %v7164_v45, -inf }
 0xdb6   :  { %v2480_v30 = vpop.f32.mrf.mxu0  ;;  %v5295_v51 = vpop.f32.mrf.mxu1 }
 0xdb7   :  { %v2744_v63 = vmul.f32 0.17677669, %v2480_v30  ;;  %v2783_v42 = vsel %vm942_vm10, %v7162_v40, -inf  ;;  %v7168_v44 = vadd.f32 %v5799_v37, %v2746_v31 }
 0xdb8   :  { %2784 = vmax.xlane.f32.xlu0 %v2783_v42  ;;  %v5289_v10 = vpop.f32.mrf.mxu0  ;;  %v2630_v54 = vpop.f32.mrf.mxu1 }
 0xdb9   :  { %v7170_v47 = vadd.f32 %v5799_v37, %v2744_v63  ;;  %v2792_v48 = vsel %vm942_vm10, %v7168_v44, -inf  ;;  %v2749_v49 = vmul.f32 0.17677669, %v2630_v54 }
 0xdba   :  { %2793 = vmax.xlane.f32.xlu1 %v2792_v48  ;;  %v2577_v4 = vpop.f32.mrf.mxu0  ;;  %v5306_v53 = vpop.f32.mrf.mxu1 }
 0xdbb   :  { %v2747_v59 = vmul.f32 0.17677669, %v2577_v4  ;;  %v2786_v7 = vsel %vm942_vm10, %v7170_v47, -inf  ;;  %v7183_v3 = vadd.f32 %v5800_v19, %v2749_v49 }
 0xdbc   :  { %2790 = vmax.xlane.f32.xlu0 %v2789_v15  ;;  %v5300_v16 = vpop.f32.mrf.mxu0  ;;  %v2633_v50 = vpop.f32.mrf.mxu1 }
 0xdbd   :  { %v7179_v34 = vadd.f32 %v5800_v19, %v2747_v59  ;;  %v2750_v14 = vmul.f32 0.17677669, %v2633_v50  ;;  %v2801_v11 = vsel %vm942_vm10, %v7183_v3, -inf }
 0xdbe   :  { %2787 = vmax.xlane.f32.xlu1 %v2786_v7  ;;  %v2580_v1 = vpop.f32.mrf.mxu0  ;;  %v5307_v13 = vpop.f32.mrf.mxu1 }
 0xdbf   :  { %v7185_v37 = vadd.f32 %v5800_v19, %v2750_v14  ;;  %v2748_v38 = vmul.f32 0.17677669, %v2580_v1  ;;  %v2795_v9 = vsel %vm942_vm10, %v7179_v34, -inf }
 0xdc0   :  { %2796 = vmax.xlane.f32.xlu0 %v2795_v9  ;;  %v5301_v36 = vpop.f32.mrf.mxu0  ;;  %v2732_v52 = vpop.f32.mrf.mxu1 }
 0xdc1   :  { %v7189_v6 = vadd.f32 %v5800_v19, %v2748_v38  ;;  %v2804_v27 = vsel %vm942_vm10, %v7185_v37, -inf  ;;  %v2753_v39 = vmul.f32 0.17677669, %v2732_v52 }
 0xdc2   :  { %2805 = vmax.xlane.f32.xlu1 %v2804_v27  ;;  %v2681_v46 = vpop.f32.mrf.mxu0  ;;  %v5318_v62 = vpop.f32.mrf.mxu1 }
 0xdc3   :  { %v2751_v2 = vmul.f32 0.17677669, %v2681_v46  ;;  %v2798_v20 = vsel %vm942_vm10, %v7189_v6, -inf  ;;  %v7199_v33 = vadd.f32 %v5800_v19, %v2753_v39 }
 0xdc4   :  { %2802 = vmax.xlane.f32.xlu0 %v2801_v11  ;;  %v5312_v18 = vpop.f32.mrf.mxu0  ;;  %v2735_v5 = vpop.f32.mrf.mxu1 }
 0xdc5   :  { %v7195_v21 = vadd.f32 %v5800_v19, %v2751_v2  ;;  %v2754_v12 = vmul.f32 0.17677669, %v2735_v5  ;;  %v2813_v63 = vsel %vm942_vm10, %v7199_v33, -inf }
 0xdc6   :  { %2799 = vmax.xlane.f32.xlu1 %v2798_v20  ;;  %v2684_v22 = vpop.f32.mrf.mxu0  ;;  %v5319_v29 = vpop.f32.mrf.mxu1 }
 0xdc7   :  { %v7201_v8 = vadd.f32 %v5800_v19, %v2754_v12  ;;  %v2807_v31 = vsel %vm942_vm10, %v7195_v21, -inf  ;;  %v2773_v42 = vpop.xlane.xlu0 %2772  ;;  %v2752_v48 = vmul.f32 0.17677669, %v2684_v22 }
 0xdc8   :  { %2808 = vmax.xlane.f32.xlu0 %v2807_v31  ;;  %v5313_v30 = vpop.f32.mrf.mxu0  ;;  %v2819_v10 = vsub.f32 %v7146_v57, %v2773_v42 }
 0xdc9   :  { %v2816_v51 = vsel %vm942_vm10, %v7201_v8, -inf  ;;  %v7218_v53 = vadd.f32 %v5800_v19, %v2752_v48 }
 0xdca   :  { %2817 = vmax.xlane.f32.xlu1 %v2816_v51  ;;  %v2835_v54 = vmul.f32 1.442695, %v2819_v10 }
 0xdcb   :  { %v2810_v59 = vsel %vm942_vm10, %v7218_v53, -inf }
 0xdcc   :  { %2814 = vmax.xlane.f32.xlu0 %v2813_v63  ;;  %5623 = vpow2.f32 %v2835_v54 }
 0xdd9   :  { %v7216_v4 = vpop.eup %5623 }
 0xdda   :  { %v2867_v49 = vsel %vm942_vm10, %v7216_v4, 0.0 }
 0xddb   :  { %3043 = vrot.lane.b32.xlu1 %v7134_v56, %s6008_s20 }
 0xddf   :  { %3091 = vrot.lane.b32.xlu1 %v7134_v56, %s6009_s0 }
 0xde2   :  { %2995 = vrot.lane.b32.xlu0 %v7134_v56, %s6007_s29  ;;  %v2776_v56 = vpop.xlane.xlu1 %2775 }
 0xde3   :  { %v2820_v57 = vsub.f32 %v7150_v58, %v2776_v56 }
 0xde5   :  { %v2837_v15 = vmul.f32 1.442695, %v2820_v57 }
 0xde7   :  { %5625 = vpow2.f32 %v2837_v15 }
 0xdf4   :  { %v7227_v16 = vpop.eup %5625 }
 0xdf5   :  { %v2870_v50 = vsel %vm942_vm10, %v7227_v16, 0.0 }
 0xe01   :  { %2868 = vadd.xlane.f32.xlu0 %v2867_v49 }
 0xe03   :  { %2811 = vmax.xlane.f32.xlu1 %v2810_v59 }
 0xe14   :  { %3216 = vrot.lane.b32.xlu1 %v7087_v43, %s6007_s29 }
 0xe38   :  { %2871 = vadd.xlane.f32.xlu1 %v2870_v50 }
 0xe39   :  { %v2779_v19 = vpop.xlane.xlu0 %2778 }
 0xe3a   :  { %v2821_v14 = vsub.f32 %v7154_v0, %v2779_v19 }
 0xe3c   :  { %v2839_v7 = vmul.f32 1.442695, %v2821_v14 }
 0xe3d   :  { %v2782_v1 = vpop.xlane.xlu0 %2781 }
 0xe3e   :  { %5627 = vpow2.f32 %v2839_v7  ;;  %v2822_v13 = vsub.f32 %v7158_v35, %v2782_v1 }
 0xe40   :  { %v2841_v38 = vmul.f32 1.442695, %v2822_v13 }
 0xe41   :  { %v2785_v9 = vpop.xlane.xlu0 %2784 }
 0xe42   :  { %5629 = vpow2.f32 %v2841_v38  ;;  %v2823_v58 = vsub.f32 %v7162_v40, %v2785_v9 }
 0xe43   :  { %v2794_v36 = vpop.xlane.xlu1 %2793 }
 0xe44   :  { %v2826_v52 = vsub.f32 %v7168_v44, %v2794_v36  ;;  %v2843_v39 = vmul.f32 1.442695, %v2823_v58 }
 0xe45   :  { %v2791_v27 = vpop.xlane.xlu0 %2790 }
 0xe46   :  { %v2849_v46 = vmul.f32 1.442695, %v2826_v52  ;;  %v2825_v62 = vsub.f32 %v7164_v45, %v2791_v27 }
 0xe47   :  { %v2788_v2 = vpop.xlane.xlu1 %2787 }
 0xe48   :  { %5631 = vpow2.f32 %v2849_v46  ;;  %v2847_v0 = vmul.f32 1.442695, %v2825_v62  ;;  %v2824_v11 = vsub.f32 %v7170_v47, %v2788_v2 }
 0xe49   :  { %v2797_v18 = vpop.xlane.xlu0 %2796 }
 0xe4a   :  { %5633 = vpow2.f32 %v2847_v0  ;;  %v2845_v35 = vmul.f32 1.442695, %v2824_v11  ;;  %v2827_v40 = vsub.f32 %v7179_v34, %v2797_v18 }
 0xe4b   :  { %v7237_v5 = vpop.eup %5627  ;;  %5635 = vpow2.f32 %v2843_v39  ;;  %v2806_v12 = vpop.xlane.xlu1 %2805 }
 0xe4c   :  { %5637 = vpow2.f32 %v2845_v35  ;;  %v2830_v44 = vsub.f32 %v7185_v37, %v2806_v12  ;;  %v2873_v45 = vsel %vm942_vm10, %v7237_v5, 0.0  ;;  %v2851_v31 = vmul.f32 1.442695, %v2827_v40 }
 0xe4d   :  { %2874 = vadd.xlane.f32.xlu0 %v2873_v45  ;;  %v2803_v20 = vpop.xlane.xlu0 %2802 }
 0xe4e   :  { %v2857_v22 = vmul.f32 1.442695, %v2830_v44  ;;  %v2829_v47 = vsub.f32 %v7183_v3, %v2803_v20 }
 0xe4f   :  { %v7244_v29 = vpop.eup %5629  ;;  %v2800_v30 = vpop.xlane.xlu1 %2799 }
 0xe50   :  { %5639 = vpow2.f32 %v2857_v22  ;;  %v2855_v51 = vmul.f32 1.442695, %v2829_v47  ;;  %v2828_v34 = vsub.f32 %v7189_v6, %v2800_v30  ;;  %v2876_v63 = vsel %vm942_vm10, %v7244_v29, 0.0 }
 0xe51   :  { %2877 = vadd.xlane.f32.xlu1 %v2876_v63  ;;  %v2809_v37 = vpop.xlane.xlu0 %2808 }
 0xe52   :  { %5641 = vpow2.f32 %v2855_v51  ;;  %v2853_v42 = vmul.f32 1.442695, %v2828_v34  ;;  %v2831_v3 = vsub.f32 %v7195_v21, %v2809_v37 }
 0xe53   :  { %5643 = vpow2.f32 %v2851_v31  ;;  %v2818_v10 = vpop.xlane.xlu1 %2817 }
 0xe54   :  { %5645 = vpow2.f32 %v2853_v42  ;;  %v2834_v54 = vsub.f32 %v7201_v8, %v2818_v10  ;;  %v2859_v50 = vmul.f32 1.442695, %v2831_v3 }
 0xe55   :  { %v7251_v48 = vpop.eup %5631  ;;  %v2815_v49 = vpop.xlane.xlu0 %2814 }
 0xe56   :  { %v2865_v59 = vmul.f32 1.442695, %v2834_v54  ;;  %v2833_v6 = vsub.f32 %v7199_v33, %v2815_v49  ;;  %v2888_v56 = vsel %vm942_vm10, %v7251_v48, 0.0 }
 0xe57   :  { %v7256_v57 = vpop.eup %5633  ;;  %2889 = vadd.xlane.f32.xlu1 %v2888_v56  ;;  %v3044_v18 = vpop.permute.xlu1 %3043 }
 0xe58   :  { %v7258_v15 = vpop.eup %5635  ;;  %5647 = vpow2.f32 %v2865_v59  ;;  %v2863_v19 = vmul.f32 1.442695, %v2833_v6  ;;  %v2885_v21 = vsel %vm942_vm10, %v7256_v57, 0.0 }
 0xe59   :  { %v7262_v8 = vpop.eup %5637  ;;  %2886 = vadd.xlane.f32.xlu0 %v2885_v21  ;;  %v2996_v14 = vpop.permute.xlu0 %2995  ;;  %v2879_v7 = vsel %vm942_vm10, %v7258_v15, 0.0 }
 0xe5a   :  { %5649 = vpow2.f32 %v2863_v19  ;;  %5327 = vmatpush3.bf16.msra.mxu1 %v2996_v14  ;;  %v2882_v33 = vsel %vm942_vm10, %v7262_v8, 0.0 }
 0xe5b   :  { %2883 = vadd.xlane.f32.xlu1 %v2882_v33  ;;  %5338 = vmatprep.subr.bf16.mxu1 %v6005_v17  ;;  %5651 = vpow2.f32 %v2859_v50  ;;  %v3092_v35 = vpop.permute.xlu1 %3091 }
 0xe5d   :  { %v7269_v1 = vpop.eup %5639  ;;  %2880 = vadd.xlane.f32.xlu0 %v2879_v7 }
 0xe5e   :  { %v2900_v13 = vsel %vm942_vm10, %v7269_v1, 0.0 }
 0xe5f   :  { %v7273_v38 = vpop.eup %5641  ;;  %2901 = vadd.xlane.f32.xlu1 %v2900_v13 }
 0xe60   :  { %v7275_v9 = vpop.eup %5643  ;;  %v2897_v58 = vsel %vm942_vm10, %v7273_v38, 0.0 }
 0xe61   :  { %v7279_v36 = vpop.eup %5645  ;;  %2898 = vadd.xlane.f32.xlu0 %v2897_v58  ;;  %v2891_v27 = vsel %vm942_vm10, %v7275_v9, 0.0 }
 0xe62   :  { %v2894_v52 = vsel %vm942_vm10, %v7279_v36, 0.0 }
 0xe63   :  { %2895 = vadd.xlane.f32.xlu1 %v2894_v52 }
 0xe65   :  { %v7285_v46 = vpop.eup %5647  ;;  %2892 = vadd.xlane.f32.xlu0 %v2891_v27 }
 0xe66   :  { %v2912_v62 = vsel %vm942_vm10, %v7285_v46, 0.0 }
 0xe67   :  { %v7289_v39 = vpop.eup %5649  ;;  %2913 = vadd.xlane.f32.xlu1 %v2912_v62 }
 0xe68   :  { %v2909_v2 = vsel %vm942_vm10, %v7289_v39, 0.0  ;;  %v7293_v0 = vpop.eup %5651 }
 0xe69   :  { %2910 = vadd.xlane.f32.xlu0 %v2909_v2  ;;  %v2903_v11 = vsel %vm942_vm10, %v7293_v0, 0.0 }
 0xe6d   :  { %2904 = vadd.xlane.f32.xlu0 %v2903_v11 }
 0xe83   :  { %3264 = vrot.lane.b32.xlu0 %v7087_v43, %s6008_s20 }
 0xe8a   :  { %v2869_v22 = vpop.xlane.xlu0 %2868 }
 0xe8c   :  { %v2812_v40 = vpop.xlane.xlu1 %2811 }
 0xe8d   :  { %v2832_v12 = vsub.f32 %v7218_v53, %v2812_v40 }
 0xe8f   :  { %v2861_v44 = vmul.f32 1.442695, %v2832_v12 }
 0xe90   :  { %v3217_v47 = vpop.permute.xlu1 %3216 }
 0xe91   :  { %5653 = vpow2.f32 %v2861_v44 }
 0xe92   :  { %5655 = vrcp.f32 %v2869_v22 }
 0xe9e   :  { %v7300_v45 = vpop.eup %5653 }
 0xe9f   :  { %v2906_v20 = vsel %vm942_vm10, %v7300_v45, 0.0  ;;  %v5656_v30 = vpop.eup %5655 }
 0xea0   :  { %2907 = vadd.xlane.f32.xlu1 %v2906_v20  ;;  %v2931_v53 = vmul.f32 %v5656_v30, %v7216_v4 }
 0xeb1   :  { %3312 = vrot.lane.b32.xlu1 %v7087_v43, %s6009_s0 }
 0xec1   :  { %v2872_v31 = vpop.xlane.xlu1 %2871 }
 0xec2   :  { %5657 = vrcp.f32 %v2872_v31 }
 0xecf   :  { %v5658_v51 = vpop.eup %5657 }
 0xed0   :  { %v2932_v34 = vmul.f32 %v5658_v51, %v7227_v16 }
 0xed2   :  { %v2947_v63 = vpack.c.bf16 %v2932_v34, %v2931_v53 }
 0xed4   :  { %5323 = vmatmul.mubr.msk.bf16.vlgmr.msra.gmra.mxu0 %vm942_vm10, %v2947_v63 }
 0xed5   :  { %5333 = vmatpush3.bf16.msra.mxu0 %v3044_v18  ;;  %5334 = vmatprep.mubr.msk.bf16.mxu0 %vm6006_vm8, %v6005_v17 }
 0xed6   :  { %v2875_v37 = vpop.xlane.xlu0 %2874  ;;  %5344 = vmatprep.subr.bf16.mxu0 %v6005_v17 }
 0xed7   :  { %5659 = vrcp.f32 %v2875_v37 }
 0xeda   :  { %v2878_v42 = vpop.xlane.xlu1 %2877 }
 0xedb   :  { %5661 = vrcp.f32 %v2878_v42 }
 0xee0   :  { %v2890_v10 = vpop.xlane.xlu1 %2889 }
 0xee1   :  { %5663 = vrcp.f32 %v2890_v10 }
 0xee2   :  { %v2887_v3 = vpop.xlane.xlu0 %2886 }
 0xee3   :  { %5665 = vrcp.f32 %v2887_v3 }
 0xee4   :  { %v2884_v4 = vpop.xlane.xlu1 %2883  ;;  %v5660_v16 = vpop.eup %5659 }
 0xee5   :  { %5667 = vrcp.f32 %v2884_v4  ;;  %v2933_v6 = vmul.f32 %v5660_v16, %v7237_v5 }
 0xee6   :  { %v2881_v54 = vpop.xlane.xlu0 %2880 }
 0xee7   :  { %5669 = vrcp.f32 %v2881_v54 }
 0xee8   :  { %v5662_v49 = vpop.eup %5661  ;;  %v2902_v59 = vpop.xlane.xlu1 %2901 }
 0xee9   :  { %5671 = vrcp.f32 %v2902_v59  ;;  %v2934_v56 = vmul.f32 %v5662_v49, %v7244_v29 }
 0xeea   :  { %v2899_v50 = vpop.xlane.xlu0 %2898 }
 0xeeb   :  { %5673 = vrcp.f32 %v2899_v50  ;;  %v2993_v19 = vpack.c.bf16 %v2934_v56, %v2933_v6 }
 0xeec   :  { %v2896_v21 = vpop.xlane.xlu1 %2895 }
 0xeed   :  { %5675 = vrcp.f32 %v2896_v21  ;;  %5329 = vmatmul.mubr.msk.bf16.vlgmr.msra.gmra.mxu1 %vm942_vm10, %v2993_v19  ;;  %v3404_v21 = vld [vmem:[#allocation2 + $0xf0] sm:$0xff] }
 0xeee   :  { %v5664_v14 = vpop.eup %5663  ;;  %5339 = vmatpush3.bf16.msra.mxu1 %v3092_v35  ;;  %v2893_v33 = vpop.xlane.xlu0 %2892  ;;  %5340 = vmatprep.mubr.msk.bf16.mxu1 %vm6006_vm8, %v6005_v17 }
 0xeef   :  { %5677 = vrcp.f32 %v2893_v33  ;;  %5350 = vmatprep.subr.bf16.mxu1 %v6005_v17  ;;  %v2938_v29 = vmul.f32 %v5664_v14, %v7251_v48  ;;  %v3405_v14 = vld [vmem:[#allocation2 + $0xf8] sm:$0xff]  ;;  %v3402_v33 = vld [vmem:[#allocation2 + $0xe0] sm:$0xff] }
 0xef0   :  { %v5666_v7 = vpop.eup %5665 }
 0xef1   :  { %v2937_v5 = vmul.f32 %v5666_v7, %v7256_v57 }
 0xef2   :  { %v5668_v13 = vpop.eup %5667  ;;  %v2911_v27 = vpop.xlane.xlu0 %2910 }
 0xef3   :  { %v3090_v58 = vpack.c.bf16 %v2938_v29, %v2937_v5  ;;  %v2936_v2 = vmul.f32 %v5668_v13, %v7262_v8  ;;  %5679 = vrcp.f32 %v2911_v27  ;;  %v3415_v29 = vpack.c.bf16 %v3405_v14, %v3404_v21  ;;  %v3403_v13 = vld [vmem:[#allocation2 + $0xe8] sm:$0xff] }
 0xef4   :  { %v5670_v52 = vpop.eup %5669 }
 0xef5   :  { %5341 = vmatmul.mubr.msk.bf16.vlgmr.msra.gmra.mxu1 %vm942_vm10, %v3090_v58  ;;  %v2935_v62 = vmul.f32 %v5670_v52, %v7258_v15  ;;  %v3414_v52 = vpack.c.bf16 %v3403_v13, %v3402_v33 }
 0xef6   :  { %v5672_v11 = vpop.eup %5671  ;;  %5351 = vmatpush3.bf16.msra.mxu1 %v3217_v47  ;;  %5352 = vmatprep.mubr.msk.bf16.mxu1 %vm6006_vm8, %v6005_v17  ;;  %v2905_v15 = vpop.xlane.xlu0 %2904 }
 0xef7   :  { %v3042_v18 = vpack.c.bf16 %v2936_v2, %v2935_v62  ;;  %5362 = vmatprep.subr.bf16.mxu1 %v6005_v17  ;;  %v2942_v35 = vmul.f32 %v5672_v11, %v7269_v1  ;;  %v3400_v2 = vld [vmem:[#allocation2 + $0xd0] sm:$0xff]  ;;  %v3401_v11 = vld [vmem:[#allocation2 + $0xd8] sm:$0xff] }
 0xef8   :  { %v5674_v57 = vpop.eup %5673 }
 0xef9   :  { %5335 = vmatmul.mubr.msk.bf16.vlgmr.msra.gmra.mxu0 %vm942_vm10, %v3042_v18  ;;  %v2941_v48 = vmul.f32 %v5674_v57, %v7273_v38 }
 0xefa   :  { %v5676_v40 = vpop.eup %5675  ;;  %5345 = vmatpush3.bf16.msra.mxu0 %v7087_v43  ;;  %5346 = vmatprep.mubr.msk.bf16.mxu0 %vm6006_vm8, %v6005_v17  ;;  %v3265_v38 = vpop.permute.xlu0 %3264 }
 0xefb   :  { %v3214_v8 = vpack.c.bf16 %v2942_v35, %v2941_v48  ;;  %5356 = vmatprep.subr.bf16.mxu0 %v6005_v17  ;;  %v2940_v20 = vmul.f32 %v5676_v40, %v7279_v36  ;;  %v2914_v43 = vpop.xlane.xlu1 %2913  ;;  %v3413_v40 = vpack.c.bf16 %v3401_v11, %v3400_v2 }
 0xefc   :  { %v5678_v12 = vpop.eup %5677  ;;  %5681 = vrcp.f32 %v2914_v43  ;;  %v3396_v43 = vld [vmem:[#allocation2 + $0xb0] sm:$0xff] }
 0xefd   :  { %5353 = vmatmul.mubr.msk.bf16.vlgmr.msra.gmra.mxu1 %vm942_vm10, %v3214_v8  ;;  %v2939_v44 = vmul.f32 %v5678_v12, %v7275_v9  ;;  %5683 = vrcp.f32 %v2905_v15  ;;  %v3398_v12 = vld [vmem:[#allocation2 + $0xc0] sm:$0xff] }
 0xefe   :  { %5364 = vmatprep.mubr.msk.bf16.mxu1 %vm6006_vm8, %v6005_v17 }
 0xeff   :  { %v3168_v1 = vpack.c.bf16 %v2940_v20, %v2939_v44  ;;  %v3399_v44 = vld [vmem:[#allocation2 + $0xc8] sm:$0xff] }
 0xf00   :  { %v5680_v22 = vpop.eup %5679 }
 0xf01   :  { %5347 = vmatmul.mubr.msk.bf16.vlgmr.msra.gmra.mxu0 %vm942_vm10, %v3168_v1  ;;  %v2945_v36 = vmul.f32 %v5680_v22, %v7289_v39  ;;  %v3412_v1 = vpack.c.bf16 %v3399_v44, %v3398_v12  ;;  %v3397_v22 = vld [vmem:[#allocation2 + $0xb8] sm:$0xff] }
 0xf02   :  { %5357 = vmatpush3.bf16.msra.mxu0 %v3265_v38  ;;  %5358 = vmatprep.mubr.msk.bf16.mxu0 %vm6006_vm8, %v6005_v17 }
 0xf03   :  { %5368 = vmatprep.subr.bf16.mxu0 %v3415_v29 }
 0xf09   :  { %v5682_v9 = vpop.eup %5681 }
 0xf0a   :  { %v2946_v30 = vmul.f32 %v5682_v9, %v7285_v46  ;;  %v5684_v53 = vpop.eup %5683  ;;  %v3411_v9 = vpack.c.bf16 %v3397_v22, %v3396_v43 }
 0xf0b   :  { %v2943_v63 = vmul.f32 %v5684_v53, %v7293_v0 }
 0xf0c   :  { %v3311_v51 = vpack.c.bf16 %v2946_v30, %v2945_v36  ;;  %v3395_v36 = vld [vmem:[#allocation2 + $0xa8] sm:$0xff]  ;;  %v3392_v30 = vld [vmem:[#allocation2 + $0x90] sm:$0xff] }
 0xf29   :  { %v2908_v47 = vpop.xlane.xlu1 %2907 }
 0xf2a   :  { %5685 = vrcp.f32 %v2908_v47  ;;  %v3394_v47 = vld [vmem:[#allocation2 + $0xa0] sm:$0xff] }
 0xf2d   :  { %v3313_v31 = vpop.permute.xlu1 %3312 }
 0xf2e   :  { %5363 = vmatpush3.bf16.msra.mxu1 %v3313_v31  ;;  %v3410_v31 = vpack.c.bf16 %v3395_v36, %v3394_v47 }
 0xf31   :  { %5365 = vmatmul.mubr.msk.bf16.vlgmr.msra.gmra.mxu1 %vm942_vm10, %v3311_v51  ;;  %v3393_v51 = vld [vmem:[#allocation2 + $0x98] sm:$0xff] }
 0xf32   :  { %3669 = vmatprep.mubr.bf16.mxu1 %v6004_v60  ;;  %v3409_v53 = vpack.c.bf16 %v3393_v51, %v3392_v30 }
 0xf37   :  { %v5686_v34 = vpop.eup %5685 }
 0xf38   :  { %v2944_v37 = vmul.f32 %v5686_v34, %v7300_v45 }
 0xf3a   :  { %v3263_v42 = vpack.c.bf16 %v2944_v37, %v2943_v63 }
 0xf3c   :  { %5359 = vmatmul.mubr.msk.bf16.vlgmr.msra.gmra.mxu0 %vm942_vm10, %v3263_v42 }
 0xf3d   :  { %5369 = vmatpush3.bf16.msra.mxu0 %v3415_v29 }
 0xf3e   :  { %5370 = vmatprep.subr.bf16.mxu0 %v3414_v52 }
 0xf41   :  { %5371 = vmatpush3.bf16.msra.mxu0 %v3414_v52 }
 0xf42   :  { %5372 = vmatprep.subr.bf16.mxu0 %v3413_v40 }
 0xf45   :  { %5373 = vmatpush3.bf16.msra.mxu0 %v3413_v40 }
 0xf46   :  { %5374 = vmatprep.subr.bf16.mxu0 %v3412_v1 }
 0xf49   :  { %5375 = vmatpush3.bf16.msra.mxu0 %v3412_v1 }
 0xf4a   :  { %5376 = vmatprep.subr.bf16.mxu0 %v3411_v9 }
 0xf4d   :  { %5377 = vmatpush3.bf16.msra.mxu0 %v3411_v9 }
 0xf4e   :  { %5378 = vmatprep.subr.bf16.mxu0 %v3410_v31 }
 0xf51   :  { %5379 = vmatpush3.bf16.msra.mxu0 %v3410_v31 }
 0xf52   :  { %5380 = vmatprep.subr.bf16.mxu0 %v3409_v53 }
 0xf55   :  { %5381 = vmatpush3.bf16.msra.mxu0 %v3409_v53 }
 0xf94   :  { %v7348_v10 = vpop.f32.mrf.mxu0 }
 0xf96   :  { %v5324_v39 = vpop.f32.mrf.mxu0 }
 0xf98   :  { %v7350_v3 = vpop.f32.mrf.mxu0 }
 0xf9a   :  { %v5325_v46 = vpop.f32.mrf.mxu0 }
 0xf9b   :  { %v3390_v46 = vld [vmem:[#allocation2 + $0x80] sm:$0xff] }
 0xfad   :  { %v3035_v4 = vpop.f32.mrf.mxu1 }
 0xfaf   :  { %v5330_v16 = vpop.f32.mrf.mxu1 }
 0xfb1   :  { %v3038_v54 = vpop.f32.mrf.mxu1 }
 0xfb2   :  { %v5463_v49 = vpack.i.bf16 %v3038_v54, %v3035_v4  ;;  %v3391_v4 = vld [vmem:[#allocation2 + $0x88] sm:$0xff] }
 0xfb3   :  { %v5331_v59 = vpop.f32.mrf.mxu1  ;;  %v3408_v16 = vpack.c.bf16 %v3391_v4, %v3390_v46 }
 0xfb4   :  { %5464 = vrot.lane.b32.xlu0 %v5463_v49, %s6009_s0 }
 0xfb5   :  { %v3131_v6 = vpop.f32.mrf.mxu1  ;;  %5382 = vmatprep.subr.bf16.mxu0 %v3408_v16 }
 0xfb6   :  { %5383 = vmatpush3.bf16.msra.mxu0 %v3408_v16 }
 0xfb7   :  { %v5342_v0 = vpop.f32.mrf.mxu1 }
 0xfb9   :  { %v3083_v56 = vpop.f32.mrf.mxu0  ;;  %v3134_v45 = vpop.f32.mrf.mxu1 }
 0xfba   :  { %v5473_v48 = vpack.i.bf16 %v3134_v45, %v3131_v6 }
 0xfbb   :  { %v5336_v50 = vpop.f32.mrf.mxu0  ;;  %v5343_v19 = vpop.f32.mrf.mxu1 }
 0xfbd   :  { %v3086_v7 = vpop.f32.mrf.mxu0  ;;  %v3256_v5 = vpop.f32.mrf.mxu1 }
 0xfbe   :  { %v5468_v58 = vpack.i.bf16 %v3086_v7, %v3083_v56 }
 0xfbf   :  { %v5337_v27 = vpop.f32.mrf.mxu0  ;;  %v5354_v62 = vpop.f32.mrf.mxu1 }
 0xfc0   :  { %5469 = vrot.lane.b32.xlu1 %v5468_v58, %s6008_s20 }
 0xfc1   :  { %v7354_v18 = vpop.f32.mrf.mxu0  ;;  %v3259_v57 = vpop.f32.mrf.mxu1 }
 0xfc2   :  { %v5478_v35 = vpack.i.bf16 %v3259_v57, %v3256_v5 }
 0xfc3   :  { %v5348_v15 = vpop.f32.mrf.mxu0  ;;  %v5355_v8 = vpop.f32.mrf.mxu1 }
 0xfc4   :  { %5474 = vrot.lane.b32.xlu1 %v5473_v48, %s6007_s29  ;;  %5479 = vrot.lane.b32.xlu0 %v5478_v35, %s6009_s0 }
 0xfc5   :  { %v7358_v20 = vpop.f32.mrf.mxu0 }
 0xfc7   :  { %v5349_v38 = vpop.f32.mrf.mxu0 }
 0xff1   :  { %v3352_v34 = vpop.f32.mrf.mxu1 }
 0xff3   :  { %v5366_v63 = vpop.f32.mrf.mxu1 }
 0xff5   :  { %v3355_v37 = vpop.f32.mrf.mxu1 }
 0xff6   :  { %v5488_v42 = vpack.i.bf16 %v3355_v37, %v3352_v34 }
 0xff7   :  { %v5367_v39 = vpop.f32.mrf.mxu1 }
 0xff8   :  { %5489 = vrot.lane.b32.xlu1 %v5488_v42, %s6007_s29 }
 0xffc   :  { %v3304_v54 = vpop.f32.mrf.mxu0 }
 0xffe   :  { %v5360_v49 = vpop.f32.mrf.mxu0 }
0x1000   :  { %v3307_v59 = vpop.f32.mrf.mxu0 }
0x1001   :  { %v5483_v6 = vpack.i.bf16 %v3307_v59, %v3304_v54 }
0x1002   :  { %v5361_v0 = vpop.f32.mrf.mxu0 }
0x1003   :  { %5484 = vrot.lane.b32.xlu0 %v5483_v6, %s6008_s20 }
0x1026   :  { %v5465_v56 = vpop.permute.xlu0 %5464 }
0x1027   :  { %v5467_v50 = vunpack.i.h.bf16 %v5465_v56  ;;  %v5466_v19 = vunpack.i.l.bf16 %v5465_v56 }
0x1029   :  { %v3163_v7 = vsel %vm503_vm9, %v7350_v3, %v5467_v50  ;;  %v3162_v5 = vsel %vm503_vm9, %v7348_v10, %v5466_v19 }
0x1032   :  { %v5470_v45 = vpop.permute.xlu1 %5469 }
0x1033   :  { %v5472_v21 = vunpack.i.h.bf16 %v5470_v45  ;;  %v5471_v14 = vunpack.i.l.bf16 %v5470_v45 }
0x1035   :  { %v3164_v58 = vsel %vm1336_vm11, %v3162_v5, %v5471_v14  ;;  %v3165_v52 = vsel %vm1336_vm11, %v3163_v7, %v5472_v21  ;;  %v4932_v21 = vld [vmem:[%s8116_s11 + $0x1e8] sm:$0xff]  ;;  %v4934_v14 = vld [vmem:[%s8116_s11 + $0x1f8] sm:$0xff]  ;;  %v4931_v7 = vld [vmem:[%s8116_s11 + $0x1e0] sm:$0xff] }
0x1036   :  { %v5475_v33 = vpop.permute.xlu1 %5474  ;;  %v5480_v11 = vpop.permute.xlu0 %5479  ;;  %v4933_v5 = vld [vmem:[%s8116_s11 + $0x1f0] sm:$0xff] }
0x1037   :  { %v5477_v29 = vunpack.i.h.bf16 %v5475_v33  ;;  %v5476_v13 = vunpack.i.l.bf16 %v5475_v33  ;;  %v5482_v57 = vunpack.i.h.bf16 %v5480_v11  ;;  %v5481_v48 = vunpack.i.l.bf16 %v5480_v11  ;;  %v4924_v11 = vld [vmem:[%s8116_s11 + $0x1a8] sm:$0xff] }
0x1038   :  { %v3623_v33 = vpack.c.bf16 %v4934_v14, %v4932_v21 }
0x1039   :  { %v3166_v27 = vsel %vm1339_vm12, %v3164_v58, %v5476_v13  ;;  %v3167_v62 = vsel %vm1339_vm12, %v3165_v52, %v5477_v29  ;;  %v3384_v10 = vsel %vm503_vm9, %v7358_v20, %v5482_v57  ;;  %v3383_v8 = vsel %vm503_vm9, %v7354_v18, %v5481_v48  ;;  %v4898_v20 = vld [vmem:[%s8152_s5 + $0x1] ss:$0 sm:$0xff]  ;;  %v4928_v13 = vld [vmem:[%s8116_s11 + $0x1c8] sm:$0xff]  ;;  %v4930_v58 = vld [vmem:[%s8116_s11 + $0x1d8] sm:$0xff] }
0x103a   :  { %v3406_v2 = vpack.c.bf16 %v3167_v62, %v3166_v27  ;;  %v3622_v29 = vpack.c.bf16 %v4933_v5, %v4931_v7  ;;  %3637 = vmatprep.subr.bf16.mxu1 %v3623_v33  ;;  %v3621_v52 = vpack.c.bf16 %v4930_v58, %v4928_v13  ;;  %v4927_v27 = vld [vmem:[%s8116_s11 + $0x1c0] sm:$0xff]  ;;  %v4929_v62 = vld [vmem:[%s8116_s11 + $0x1d0] sm:$0xff]  ;;  %v4926_v57 = vld [vmem:[%s8116_s11 + $0x1b8] sm:$0xff] }
0x103b   :  { %v3619_v48 = vpack.c.bf16 %v4926_v57, %v4924_v11 }
0x103c   :  { %5384 = vmatprep.mubr.bf16.mxu0 %v3406_v2  ;;  %3638 = vmatpush1.bf16.msra.mxu1 %v3622_v29  ;;  %v3620_v2 = vpack.c.bf16 %v4929_v62, %v4927_v27 }
0x103d   :  { %3639 = vmatprep.subr.bf16.mxu1 %v3621_v52 }
0x1040   :  { %3640 = vmatpush1.bf16.msra.mxu1 %v3620_v2 }
0x1041   :  { %3641 = vmatprep.subr.bf16.mxu1 %v3619_v48 }
0x106a   :  { %v5490_v35 = vpop.permute.xlu1 %5489 }
0x106b   :  { %v5492_v12 = vunpack.i.h.bf16 %v5490_v35  ;;  %v5491_v44 = vunpack.i.l.bf16 %v5490_v35  ;;  %v4923_v35 = vld [vmem:[%s8116_s11 + $0x1a0] sm:$0xff] }
0x1075   :  { %v5485_v3 = vpop.permute.xlu0 %5484 }
0x1076   :  { %v5487_v40 = vunpack.i.h.bf16 %v5485_v3  ;;  %v5486_v15 = vunpack.i.l.bf16 %v5485_v3  ;;  %v4925_v3 = vld [vmem:[%s8116_s11 + $0x1b0] sm:$0xff] }
0x1078   :  { %v3385_v1 = vsel %vm1336_vm11, %v3383_v8, %v5486_v15  ;;  %v3386_v38 = vsel %vm1336_vm11, %v3384_v10, %v5487_v40  ;;  %v3618_v40 = vpack.c.bf16 %v4925_v3, %v4923_v35  ;;  %v4920_v15 = vld [vmem:[%s8116_s11 + $0x188] sm:$0xff]  ;;  %v4922_v10 = vld [vmem:[%s8116_s11 + $0x198] sm:$0xff] }
0x1079   :  { %v3387_v43 = vsel %vm1339_vm12, %v3385_v1, %v5491_v44  ;;  %v3388_v22 = vsel %vm1339_vm12, %v3386_v38, %v5492_v12  ;;  %v3617_v8 = vpack.c.bf16 %v4922_v10, %v4920_v15  ;;  %v4919_v12 = vld [vmem:[%s8116_s11 + $0x180] sm:$0xff]  ;;  %v4921_v44 = vld [vmem:[%s8116_s11 + $0x190] sm:$0xff]  ;;  %v4916_v38 = vld [vmem:[%s8116_s11 + $0x168] sm:$0xff] }
0x107a   :  { %v3407_v47 = vpack.c.bf16 %v3388_v22, %v3387_v43  ;;  %3642 = vmatpush1.bf16.msra.mxu1 %v3618_v40  ;;  %v3616_v1 = vpack.c.bf16 %v4921_v44, %v4919_v12  ;;  %v4918_v43 = vld [vmem:[%s8116_s11 + $0x178] sm:$0xff] }
0x107b   :  { %3643 = vmatprep.subr.bf16.mxu1 %v3617_v8  ;;  %v3615_v22 = vpack.c.bf16 %v4918_v43, %v4916_v38 }
0x107c   :  { %5385 = vmatmul.mubr.bf16.vlgmr.msra.gmra.mxu0 %v3407_v47  ;;  %v4915_v47 = vld [vmem:[%s8116_s11 + $0x160] sm:$0xff] }
0x107e   :  { %3644 = vmatpush1.bf16.msra.mxu1 %v3616_v1 }
0x107f   :  { %3645 = vmatprep.subr.bf16.mxu1 %v3615_v22 }
0x113c   :  { %v5386_v9 = vpop.f32.mrf.mxu0 }
0x113d   :  { %v3467_v30 = vadd.f32 %v5386_v9, %v4898_v20  ;;  %v4917_v9 = vld [vmem:[%s8116_s11 + $0x170] sm:$0xff] }
0x113e   :  { %v3458_v36 = vpop.f32.mrf.mxu0 }
0x113f   :  { %v3459_v31 = vadd.f32 %v4898_v20, %v3458_v36  ;;  %v3475_v63 = vadd.f32 %v3467_v30, %v7060_v55  ;;  %v3614_v36 = vpack.c.bf16 %v4917_v9, %v4915_v47  ;;  %v4913_v30 = vld [vmem:[%s8116_s11 + $0x150] sm:$0xff]  ;;  %v4901_v47 = vld [vmem:[%s8114_s9 + $0x1] ss:$0 sm:$0xff]  ;;  %s8153_s9 = sld [smem:[#allocation23_spill]] }
0x1140   :  { %v5387_v18 = vpop.f32.mrf.mxu0 }
0x1141   :  { %v3473_v51 = vadd.f32 %v3459_v31, %v7051_v41  ;;  %v3470_v37 = vadd.f32 %v5387_v18, %v4898_v20  ;;  %v4914_v31 = vld [vmem:[%s8116_s11 + $0x158] sm:$0xff]  ;;  %v4911_v18 = vld [vmem:[%s8116_s11 + $0x140] sm:$0xff]  ;;  %3646 = vmatpush1.bf16.msra.mxu1 %v3614_v36 }
0x1142   :  { %v3461_v53 = vpop.f32.mrf.mxu0 }
0x1143   :  { %v3462_v34 = vadd.f32 %v4898_v20, %v3461_v53  ;;  %3481 = vadd.xlane.f32.xlu0 %v3473_v51  ;;  %v3476_v39 = vadd.f32 %v3470_v37, %v7062_v32  ;;  %v4912_v20 = vld [vmem:[%s8116_s11 + $0x148] sm:$0xff] }
0x1144   :  { %v4908_v53 = vld [vmem:[%s8116_s11 + $0x128] sm:$0xff] }
0x1145   :  { %v3474_v42 = vadd.f32 %v3462_v34, %v7053_v61  ;;  %v4910_v34 = vld [vmem:[%s8116_s11 + $0x138] sm:$0xff] }
0x1146   :  { %v3611_v37 = vpack.c.bf16 %v4910_v34, %v4908_v53 }
0x1147   :  { %3483 = vadd.xlane.f32.xlu1 %v3474_v42  ;;  %3485 = vadd.xlane.f32.xlu0 %v3475_v63 }
0x114b   :  { %3487 = vadd.xlane.f32.xlu0 %v3476_v39 }
0x11cc   :  { %v3482_v46 = vpop.xlane.xlu0 %3481 }
0x11cd   :  { %v3489_v4 = vmul.f32 0.0078125, %v3482_v46  ;;  %v4904_v46 = vld [vmem:[%s8116_s11 + $0x108] sm:$0xff] }
0x11cf   :  { %v7385_v16 = vsub.f32 %v3473_v51, %v3489_v4  ;;  %v3613_v51 = vpack.c.bf16 %v4914_v31, %v4912_v20  ;;  %v4906_v4 = vld [vmem:[%s8116_s11 + $0x118] sm:$0xff] }
0x11d0   :  { %v3484_v54 = vpop.xlane.xlu1 %3483  ;;  %v3486_v49 = vpop.xlane.xlu0 %3485 }
0x11d1   :  { %v3490_v41 = vmul.f32 0.0078125, %v3484_v54  ;;  %v3491_v59 = vmul.f32 0.0078125, %v3486_v49  ;;  %v3497_v6 = vmul.f32 %v7385_v16, %v7385_v16  ;;  %3647 = vmatprep.subr.bf16.mxu1 %v3613_v51  ;;  %v3609_v49 = vpack.c.bf16 %v4906_v4, %v4904_v46 }
0x11d2   :  { %v3547_v20 = vmul.f32 %v4901_v47, %v7385_v16 }
0x11d3   :  { %v7389_v55 = vsub.f32 %v3474_v42, %v3490_v41  ;;  %v7391_v0 = vsub.f32 %v3475_v63, %v3491_v59  ;;  %3501 = vadd.xlane.f32.xlu0 %v3497_v6  ;;  %v3612_v63 = vpack.c.bf16 %v4913_v30, %v4911_v18  ;;  %v4907_v42 = vld [vmem:[%s8116_s11 + $0x120] sm:$0xff]  ;;  %v4905_v59 = vld [vmem:[%s8116_s11 + $0x110] sm:$0xff] }
0x11d4   :  { %v3488_v61 = vpop.xlane.xlu0 %3487  ;;  %v4903_v41 = vld [vmem:[%s8116_s11 + $0x100] sm:$0xff] }
0x11d5   :  { %v3492_v56 = vmul.f32 0.0078125, %v3488_v61  ;;  %v3498_v32 = vmul.f32 %v7389_v55, %v7389_v55  ;;  %v3499_v45 = vmul.f32 %v7391_v0, %v7391_v0  ;;  %3648 = vmatpush1.bf16.msra.mxu1 %v3612_v63  ;;  %v3608_v6 = vpack.c.bf16 %v4905_v59, %v4903_v41  ;;  %v4902_v30 = vld [vmem:[%s8115_s10 + $0x1] ss:$0 sm:$0xff]  ;;  %v3794_v41 = vld [vmem:[#allocation4 + $0x1f8] sm:$0xff] }
0x11d6   :  { %3649 = vmatprep.subr.bf16.mxu1 %v3611_v37  ;;  %v3548_v36 = vmul.f32 %v4901_v47, %v7389_v55 }
0x11d7   :  { %v7397_v50 = vsub.f32 %v3476_v39, %v3492_v56  ;;  %3503 = vadd.xlane.f32.xlu1 %v3498_v32  ;;  %3505 = vadd.xlane.f32.xlu0 %v3499_v45  ;;  %v4909_v39 = vld [vmem:[%s8116_s11 + $0x130] sm:$0xff] }
0x11d8   :  { %v3610_v54 = vpack.c.bf16 %v4909_v39, %v4907_v42  ;;  %v3549_v39 = vmul.f32 %v4901_v47, %v7391_v0  ;;  %v3777_v0 = vld [vmem:[#allocation4 + $0x170] sm:$0xff] }
0x11d9   :  { %v3500_v19 = vmul.f32 %v7397_v50, %v7397_v50  ;;  %v3550_v34 = vmul.f32 %v4901_v47, %v7397_v50 }
0x11da   :  { %3650 = vmatpush1.bf16.msra.mxu1 %v3610_v54 }
0x11db   :  { %3507 = vadd.xlane.f32.xlu1 %v3500_v19  ;;  %3651 = vmatprep.subr.bf16.mxu1 %v3609_v49  ;;  %v3793_v49 = vld [vmem:[#allocation4 + $0x1f0] sm:$0xff] }
0x11dc   :  { %v3814_v59 = vpack.c.bf16 %v3794_v41, %v3793_v49 }
0x11de   :  { %3652 = vmatpush1.bf16.msra.mxu1 %v3608_v6  ;;  %v3778_v6 = vld [vmem:[#allocation4 + $0x178] sm:$0xff]  ;;  %5078 = vmatprep.subr.bf16.mxu0 %v3814_v59 }
0x125c   :  { %v3502_v61 = vpop.xlane.xlu0 %3501 }
0x125d   :  { %v3509_v56 = vmul.f32 0.007874016, %v3502_v61  ;;  %v3806_v61 = vpack.c.bf16 %v3778_v6, %v3777_v0 }
0x125f   :  { %5687 = vrsqrt.f32 %v3509_v56  ;;  %vm3515_vm8 = vcmp.eq.f32.partialorder %v3509_v56, inf  ;;  %v3518_v29 = vand.u32 2147483648, %v3509_v56  ;;  %vm3517_vm9 = vcmp.eq.f32.partialorder %v3509_v56, 0.0  ;;  %5079 = vmatpush3.bf16.msra.mxu0 %v3806_v61 }
0x1260   :  { %v3504_v32 = vpop.xlane.xlu1 %3503  ;;  %v3506_v19 = vpop.xlane.xlu0 %3505 }
0x1261   :  { %v3510_v45 = vmul.f32 0.007874016, %v3504_v32  ;;  %v3511_v21 = vmul.f32 0.007874016, %v3506_v19  ;;  %v3792_v32 = vld [vmem:[#allocation4 + $0x1e8] sm:$0xff]  ;;  %v3775_v19 = vld [vmem:[#allocation4 + $0x160] sm:$0xff] }
0x1263   :  { %5689 = vrsqrt.f32 %v3510_v45  ;;  %vm3522_vm10 = vcmp.eq.f32.partialorder %v3510_v45, inf  ;;  %vm3524_vm11 = vcmp.eq.f32.partialorder %v3510_v45, 0.0  ;;  %v3525_v11 = vand.u32 2147483648, %v3510_v45 }
0x1264   :  { %5691 = vrsqrt.f32 %v3511_v21  ;;  %v3508_v14 = vpop.xlane.xlu1 %3507  ;;  %vm3529_vm12 = vcmp.eq.f32.partialorder %v3511_v21, inf  ;;  %v3532_v35 = vand.u32 2147483648, %v3511_v21  ;;  %vm3531_vm2 = vcmp.eq.f32.partialorder %v3511_v21, 0.0 }
0x1265   :  { %v3512_v33 = vmul.f32 0.007874016, %v3508_v14 }
0x1267   :  { %5693 = vrsqrt.f32 %v3512_v33  ;;  %vm3536_vm3 = vcmp.eq.f32.partialorder %v3512_v33, inf  ;;  %v3539_v1 = vand.u32 2147483648, %v3512_v33  ;;  %vm3538_vm4 = vcmp.eq.f32.partialorder %v3512_v33, 0.0 }
0x126c   :  { %v5688_v7 = vpop.eup %5687 }
0x126d   :  { %v3514_v5 = vmul.f32 %v5688_v7, %v3509_v56  ;;  %v3790_v7 = vld [vmem:[#allocation4 + $0x1d8] sm:$0xff] }
0x126f   :  { %v3516_v13 = vsel %vm3515_vm8, %v3509_v56, %v3514_v5  ;;  %v3791_v56 = vld [vmem:[#allocation4 + $0x1e0] sm:$0xff] }
0x1270   :  { %v5690_v58 = vpop.eup %5689  ;;  %v3519_v52 = vsel %vm3517_vm9, %v3518_v29, %v3516_v13  ;;  %v3773_v29 = vld [vmem:[#allocation4 + $0x150] sm:$0xff]  ;;  %v3774_v13 = vld [vmem:[#allocation4 + $0x158] sm:$0xff] }
0x1271   :  { %v5692_v27 = vpop.eup %5691  ;;  %v3551_v62 = vadd.f32 1e-06, %v3519_v52  ;;  %v3521_v2 = vmul.f32 %v5690_v58, %v3510_v45  ;;  %v3804_v58 = vpack.c.bf16 %v3774_v13, %v3773_v29  ;;  %v3787_v52 = vld [vmem:[#allocation4 + $0x1c0] sm:$0xff] }
0x1272   :  { %v3528_v57 = vmul.f32 %v5692_v27, %v3511_v21  ;;  %v3788_v27 = vld [vmem:[#allocation4 + $0x1c8] sm:$0xff] }
0x1273   :  { %5695 = vrcp.f32 %v3551_v62  ;;  %v3523_v48 = vsel %vm3522_vm10, %v3510_v45, %v3521_v2  ;;  %v3813_v45 = vpack.c.bf16 %v3792_v32, %v3791_v56  ;;  %v3811_v62 = vpack.c.bf16 %v3788_v27, %v3787_v52  ;;  %v3771_v2 = vld [vmem:[#allocation4 + $0x140] sm:$0xff] }
0x1274   :  { %v5694_v3 = vpop.eup %5693  ;;  %v3526_v40 = vsel %vm3524_vm11, %v3525_v11, %v3523_v48  ;;  %v3530_v15 = vsel %vm3529_vm12, %v3511_v21, %v3528_v57  ;;  %v3776_v21 = vld [vmem:[#allocation4 + $0x168] sm:$0xff]  ;;  %v3785_v48 = vld [vmem:[#allocation4 + $0x1b0] sm:$0xff] }
0x1275   :  { %v3552_v10 = vadd.f32 1e-06, %v3526_v40  ;;  %v3533_v8 = vsel %vm3531_vm2, %v3532_v35, %v3530_v15  ;;  %v3535_v12 = vmul.f32 %v5694_v3, %v3512_v33  ;;  %v3805_v14 = vpack.c.bf16 %v3776_v21, %v3775_v19  ;;  %5080 = vmatprep.subr.bf16.mxu0 %v3813_v45  ;;  %v3772_v11 = vld [vmem:[#allocation4 + $0x148] sm:$0xff]  ;;  %v3786_v35 = vld [vmem:[#allocation4 + $0x1b8] sm:$0xff]  ;;  %v3769_v3 = vld [vmem:[#allocation4 + $0x130] sm:$0xff] }
0x1276   :  { %v3553_v44 = vadd.f32 1e-06, %v3533_v8  ;;  %v3803_v57 = vpack.c.bf16 %v3772_v11, %v3771_v2  ;;  %v3810_v40 = vpack.c.bf16 %v3786_v35, %v3785_v48  ;;  %v3770_v15 = vld [vmem:[#allocation4 + $0x138] sm:$0xff]  ;;  %v3784_v8 = vld [vmem:[#allocation4 + $0x1a8] sm:$0xff] }
0x1277   :  { %5697 = vrcp.f32 %v3552_v10  ;;  %v3537_v38 = vsel %vm3536_vm3, %v3512_v33, %v3535_v12  ;;  %5081 = vmatpush3.bf16.msra.mxu0 %v3805_v14  ;;  %v3789_v33 = vld [vmem:[#allocation4 + $0x1d0] sm:$0xff]  ;;  %v3783_v10 = vld [vmem:[#allocation4 + $0x1a0] sm:$0xff]  ;;  %v3802_v12 = vpack.c.bf16 %v3770_v15, %v3769_v3 }
0x1278   :  { %v3540_v43 = vsel %vm3538_vm4, %v3539_v1, %v3537_v38  ;;  %5699 = vrcp.f32 %v3553_v44  ;;  %v3812_v5 = vpack.c.bf16 %v3790_v7, %v3789_v33  ;;  %v3809_v44 = vpack.c.bf16 %v3784_v8, %v3783_v10  ;;  %v3767_v1 = vld [vmem:[#allocation4 + $0x120] sm:$0xff]  ;;  %v3768_v38 = vld [vmem:[#allocation4 + $0x128] sm:$0xff] }
0x1279   :  { %v3554_v22 = vadd.f32 1e-06, %v3540_v43  ;;  %v3781_v43 = vld [vmem:[#allocation4 + $0x190] sm:$0xff]  ;;  %v3801_v47 = vpack.c.bf16 %v3768_v38, %v3767_v1 }
0x127a   :  { %5082 = vmatprep.subr.bf16.mxu0 %v3812_v5 }
0x127b   :  { %5701 = vrcp.f32 %v3554_v22  ;;  %5083 = vmatpush3.bf16.msra.mxu0 %v3804_v58  ;;  %v3782_v22 = vld [vmem:[#allocation4 + $0x198] sm:$0xff] }
0x127c   :  { %5084 = vmatprep.subr.bf16.mxu0 %v3811_v62 }
0x127f   :  { %5085 = vmatpush3.bf16.msra.mxu0 %v3803_v57 }
0x1280   :  { %v5696_v9 = vpop.eup %5695  ;;  %5086 = vmatprep.subr.bf16.mxu0 %v3810_v40 }
0x1281   :  { %v3556_v31 = vmul.f32 %v5696_v9, %v3547_v20  ;;  %v3808_v9 = vpack.c.bf16 %v3782_v22, %v3781_v43  ;;  %v3765_v20 = vld [vmem:[#allocation4 + $0x110] sm:$0xff] }
0x1283   :  { %v7506_v63 = vadd.f32 %v4902_v30, %v3556_v31  ;;  %5087 = vmatpush3.bf16.msra.mxu0 %v3802_v12  ;;  %v3779_v31 = vld [vmem:[#allocation4 + $0x180] sm:$0xff] }
0x1284   :  { %v5698_v18 = vpop.eup %5697  ;;  %5088 = vmatprep.subr.bf16.mxu0 %v3809_v44 }
0x1285   :  { %v3558_v51 = vmul.f32 %v5698_v18, %v3548_v36  ;;  %v5700_v53 = vpop.eup %5699  ;;  %v3766_v36 = vld [vmem:[#allocation4 + $0x118] sm:$0xff]  ;;  %v3780_v18 = vld [vmem:[#allocation4 + $0x188] sm:$0xff] }
0x1286   :  { %v3560_v46 = vmul.f32 %v5700_v53, %v3549_v39  ;;  %v3763_v53 = vld [vmem:[#allocation4 + $0x100] sm:$0xff] }
0x1287   :  { %v7508_v37 = vadd.f32 %v4902_v30, %v3558_v51  ;;  %5089 = vmatpush3.bf16.msra.mxu0 %v3801_v47  ;;  %v3807_v51 = vpack.c.bf16 %v3780_v18, %v3779_v31  ;;  %v4935_v39 = vld [vmem:[%s8117_s12 + $0x2] sm:$0x3] }
0x1288   :  { %v5702_v42 = vpop.eup %5701  ;;  %v7516_v54 = vadd.f32 %v4902_v30, %v3560_v46  ;;  %5090 = vmatprep.subr.bf16.mxu0 %v3808_v9 }
0x1289   :  { %v3606_v16 = vpack.c.bf16 %v7508_v37, %v7506_v63  ;;  %v3562_v55 = vmul.f32 %v5702_v42, %v3550_v34  ;;  %v3764_v34 = vld [vmem:[#allocation4 + $0x108] sm:$0xff] }
0x128a   :  { %v3799_v42 = vpack.c.bf16 %v3764_v34, %v3763_v53 }
0x128b   :  { %3670 = vmatmul.mubr.bf16.vlgmr.msra.gmra.mxu1 %v3606_v16  ;;  %v7514_v4 = vadd.f32 %v4902_v30, %v3562_v55  ;;  %v3800_v30 = vpack.c.bf16 %v3766_v36, %v3765_v20  ;;  %v3630_v16 = vrot.slane %v4935_v39, %v6388_v25  ;;  %v3634_v55 = vrot.slane %v4935_v39, %v6397_v28 }
0x128c   :  { %3679 = vmatprep.mubr.bf16.mxu1 %v6004_v60 }
0x128d   :  { %v3607_v50 = vpack.c.bf16 %v7514_v4, %v7516_v54  ;;  %5091 = vmatpush3.bf16.msra.mxu0 %v3800_v30 }
0x128e   :  { %5092 = vmatprep.subr.bf16.mxu0 %v3807_v51 }
0x1291   :  { %5093 = vmatpush3.bf16.msra.mxu0 %v3799_v42 }
0x1293   :  { %3680 = vmatmul.mubr.bf16.gmra.mxu1 %v3607_v50 }
0x134b   :  { %v3671_v46 = vpop.f32.mrf.mxu1 }
0x134c   :  { %v7525_v50 = vadd.f32 %v3671_v46, %v3630_v16 }
0x134d   :  { %v3673_v49 = vpop.f32.mrf.mxu1 }
0x134e   :  { %v3698_v41 = vmul.f32 0.044715, %v7525_v50  ;;  %v7528_v59 = vadd.f32 %v3673_v49, %v3634_v55 }
0x134f   :  { %v3675_v0 = vpop.f32.mrf.mxu1 }
0x1350   :  { %v3706_v6 = vmul.f32 %v3698_v41, %v7525_v50  ;;  %v3699_v61 = vmul.f32 0.044715, %v7528_v59  ;;  %v3676_v56 = vadd.f32 %v3675_v0, %v3630_v16 }
0x1351   :  { %v3677_v32 = vpop.f32.mrf.mxu1 }
0x1352   :  { %v3714_v45 = vmul.f32 %v3706_v6, %v7525_v50  ;;  %v3707_v19 = vmul.f32 %v3699_v61, %v7528_v59  ;;  %v3700_v21 = vmul.f32 0.044715, %v3676_v56  ;;  %v3678_v14 = vadd.f32 %v3677_v32, %v3634_v55 }
0x1353   :  { %v3681_v33 = vpop.f32.mrf.mxu1 }
0x1354   :  { %v3722_v7 = vadd.f32 %v3714_v45, %v7525_v50  ;;  %v3715_v5 = vmul.f32 %v3707_v19, %v7528_v59  ;;  %v3708_v29 = vmul.f32 %v3700_v21, %v3676_v56  ;;  %v3701_v13 = vmul.f32 0.044715, %v3678_v14 }
0x1355   :  { %v7536_v58 = vadd.f32 %v3681_v33, %v3630_v16  ;;  %v3683_v52 = vpop.f32.mrf.mxu1  ;;  %v3692_v21 = vmul.f32 0.5, %v3676_v56 }
0x1356   :  { %v3730_v27 = vmul.f32 0.7978846, %v3722_v7  ;;  %v3716_v62 = vmul.f32 %v3708_v29, %v3676_v56  ;;  %v3709_v2 = vmul.f32 %v3701_v13, %v3678_v14  ;;  %v7538_v11 = vadd.f32 %v3683_v52, %v3634_v55 }
0x1357   :  { %v3702_v57 = vmul.f32 0.044715, %v7536_v58  ;;  %v3685_v48 = vpop.f32.mrf.mxu1  ;;  %v3723_v35 = vadd.f32 %v3715_v5, %v7528_v59  ;;  %v3691_v7 = vmul.f32 0.5, %v7528_v59  ;;  %v3693_v5 = vmul.f32 0.5, %v3678_v14 }
0x1358   :  { %v3724_v3 = vadd.f32 %v3716_v62, %v3676_v56  ;;  %v3717_v40 = vmul.f32 %v3709_v2, %v3678_v14  ;;  %v3703_v15 = vmul.f32 0.044715, %v7538_v11  ;;  %5703 = vtanh.f32 %v3730_v27 }
0x1359   :  { %v3710_v10 = vmul.f32 %v3702_v57, %v7536_v58  ;;  %v3686_v8 = vadd.f32 %v3685_v48, %v3630_v16  ;;  %v3687_v12 = vpop.f32.mrf.mxu1  ;;  %v3731_v44 = vmul.f32 0.7978846, %v3723_v35  ;;  %v3690_v13 = vmul.f32 0.5, %v7525_v50 }
0x135a   :  { %v3732_v1 = vmul.f32 0.7978846, %v3724_v3  ;;  %v3711_v38 = vmul.f32 %v3703_v15, %v7538_v11  ;;  %v3688_v43 = vadd.f32 %v3687_v12, %v3634_v55  ;;  %v3725_v22 = vadd.f32 %v3717_v40, %v3678_v14 }
0x135b   :  { %v3718_v47 = vmul.f32 %v3710_v10, %v7536_v58  ;;  %v3704_v9 = vmul.f32 0.044715, %v3686_v8  ;;  %5705 = vtanh.f32 %v3731_v44  ;;  %v3696_v56 = vmul.f32 0.5, %v3686_v8 }
0x135c   :  { %5707 = vtanh.f32 %v3732_v1  ;;  %v3719_v20 = vmul.f32 %v3711_v38, %v7538_v11  ;;  %v3705_v36 = vmul.f32 0.044715, %v3688_v43  ;;  %v3733_v31 = vmul.f32 0.7978846, %v3725_v22 }
0x135d   :  { %v3712_v18 = vmul.f32 %v3704_v9, %v3686_v8  ;;  %v3726_v30 = vadd.f32 %v3718_v47, %v7536_v58  ;;  %v3695_v14 = vmul.f32 0.5, %v7538_v11  ;;  %v3697_v44 = vmul.f32 0.5, %v3688_v43 }
0x135e   :  { %v3713_v51 = vmul.f32 %v3705_v36, %v3688_v43  ;;  %5709 = vtanh.f32 %v3733_v31  ;;  %v3727_v53 = vadd.f32 %v3719_v20, %v7538_v11  ;;  %v3694_v1 = vmul.f32 0.5, %v7536_v58 }
0x135f   :  { %v3720_v34 = vmul.f32 %v3712_v18, %v3686_v8  ;;  %v3734_v42 = vmul.f32 0.7978846, %v3726_v30 }
0x1360   :  { %v3721_v39 = vmul.f32 %v3713_v51, %v3688_v43  ;;  %v3735_v16 = vmul.f32 0.7978846, %v3727_v53 }
0x1361   :  { %v3728_v55 = vadd.f32 %v3720_v34, %v3686_v8  ;;  %v4936_v8 = vld [vmem:[#allocation6 + $0x1] ss:$0 sm:$0xff] }
0x1362   :  { %v3729_v46 = vadd.f32 %v3721_v39, %v3688_v43  ;;  %5711 = vtanh.f32 %v3735_v16 }
0x1363   :  { %v3736_v49 = vmul.f32 0.7978846, %v3728_v55  ;;  %5713 = vtanh.f32 %v3734_v42 }
0x1364   :  { %v3737_v41 = vmul.f32 0.7978846, %v3729_v46 }
0x1365   :  { %5715 = vtanh.f32 %v3736_v49  ;;  %v5704_v0 = vpop.eup %5703 }
0x1366   :  { %5717 = vtanh.f32 %v3737_v41  ;;  %v3746_v33 = vadd.f32 1.0, %v5704_v0 }
0x1368   :  { %v5706_v6 = vpop.eup %5705  ;;  %v3754_v57 = vmul.f32 %v3746_v33, %v3690_v13 }
0x1369   :  { %v5708_v61 = vpop.eup %5707  ;;  %v3747_v32 = vadd.f32 1.0, %v5706_v6 }
0x136a   :  { %v3748_v45 = vadd.f32 1.0, %v5708_v61 }
0x136b   :  { %v5710_v19 = vpop.eup %5709  ;;  %v3755_v27 = vmul.f32 %v3747_v32, %v3691_v7 }
0x136c   :  { %v3749_v29 = vadd.f32 1.0, %v5710_v19  ;;  %v3756_v52 = vmul.f32 %v3748_v45, %v3692_v21 }
0x136e   :  { %v3757_v62 = vmul.f32 %v3749_v29, %v3693_v5  ;;  %v3795_v3 = vpack.c.bf16 %v3756_v52, %v3754_v57  ;;  %v3990_v57 = vld [vmem:[#allocation10 + $0x70] sm:$0xff] }
0x136f   :  { %v5712_v2 = vpop.eup %5711 }
0x1370   :  { %v5714_v48 = vpop.eup %5713  ;;  %v3796_v35 = vpack.c.bf16 %v3757_v62, %v3755_v27  ;;  %v3751_v15 = vadd.f32 1.0, %v5712_v2 }
0x1371   :  { %v3750_v12 = vadd.f32 1.0, %v5714_v48  ;;  %v3991_v48 = vld [vmem:[#allocation10 + $0x78] sm:$0xff] }
0x1372   :  { %v5716_v40 = vpop.eup %5715  ;;  %3855 = vmatprep.mubr.bf16.mxu0 %v3796_v35  ;;  %v3759_v22 = vmul.f32 %v3751_v15, %v3695_v14  ;;  %v4001_v35 = vpack.c.bf16 %v3991_v48, %v3990_v57  ;;  %v3985_v14 = vld [vmem:[#allocation10 + $0x48] sm:$0xff]  ;;  %v4937_v48 = vld [vmem:[#allocation7 + $0x1] ss:$0 sm:$0xff] }
0x1373   :  { %v5718_v10 = vpop.eup %5717  ;;  %3856 = vmatmul.mubr.bf16.vlgmr.msra.gmra.mxu0 %v3795_v3  ;;  %v3752_v59 = vadd.f32 1.0, %v5716_v40  ;;  %v3758_v9 = vmul.f32 %v3750_v12, %v3694_v1  ;;  %v3988_v3 = vld [vmem:[#allocation10 + $0x60] sm:$0xff]  ;;  %v3989_v40 = vld [vmem:[#allocation10 + $0x68] sm:$0xff]  ;;  %v3983_v1 = vld [vmem:[#allocation10 + $0x38] sm:$0xff] }
0x1374   :  { %v3753_v50 = vadd.f32 1.0, %v5718_v10  ;;  %5388 = vmatprep.subr.bf16.mxu1 %v4001_v35  ;;  %v4000_v15 = vpack.c.bf16 %v3989_v40, %v3988_v3  ;;  %v3986_v10 = vld [vmem:[#allocation10 + $0x50] sm:$0xff] }
0x1375   :  { %v3760_v38 = vmul.f32 %v3752_v59, %v3696_v56  ;;  %5389 = vmatpush3.bf16.msra.mxu1 %v4001_v35  ;;  %v3987_v56 = vld [vmem:[#allocation10 + $0x58] sm:$0xff]  ;;  %v3984_v59 = vld [vmem:[#allocation10 + $0x40] sm:$0xff] }
0x1376   :  { %v3761_v47 = vmul.f32 %v3753_v50, %v3697_v44  ;;  %5390 = vmatprep.subr.bf16.mxu1 %v4000_v15  ;;  %v3999_v12 = vpack.c.bf16 %v3987_v56, %v3986_v10  ;;  %v3998_v44 = vpack.c.bf16 %v3985_v14, %v3984_v59  ;;  %v3982_v50 = vld [vmem:[#allocation10 + $0x30] sm:$0xff]  ;;  %v4938_v10 = vld [vmem:[#allocation9 + $0x1] ss:$0 sm:$0xff] }
0x1377   :  { %v3797_v36 = vpack.c.bf16 %v3760_v38, %v3758_v9  ;;  %v3997_v38 = vpack.c.bf16 %v3983_v1, %v3982_v50 }
0x1378   :  { %v3798_v20 = vpack.c.bf16 %v3761_v47, %v3759_v22  ;;  %v3980_v22 = vld [vmem:[#allocation10 + $0x20] sm:$0xff]  ;;  %v3981_v47 = vld [vmem:[#allocation10 + $0x28] sm:$0xff] }
0x1379   :  { %5391 = vmatpush3.bf16.msra.mxu1 %v4000_v15  ;;  %v3996_v9 = vpack.c.bf16 %v3981_v47, %v3980_v22 }
0x137a   :  { %3863 = vmatprep.mubr.bf16.mxu0 %v3798_v20  ;;  %5392 = vmatprep.subr.bf16.mxu1 %v3999_v12  ;;  %v3978_v20 = vld [vmem:[#allocation10 + $0x10] sm:$0xff] }
0x137b   :  { %3864 = vmatmul.mubr.bf16.gmra.mxu0 %v3797_v36  ;;  %v3979_v36 = vld [vmem:[#allocation10 + $0x18] sm:$0xff] }
0x137c   :  { %4340 = vmatprep.mubr.bf16.mxu0 %v6004_v60 }
0x137d   :  { %5393 = vmatpush3.bf16.msra.mxu1 %v3999_v12 }
0x137e   :  { %5394 = vmatprep.subr.bf16.mxu1 %v3998_v44 }
0x1381   :  { %5395 = vmatpush3.bf16.msra.mxu1 %v3998_v44 }
0x1382   :  { %5396 = vmatprep.subr.bf16.mxu1 %v3997_v38 }
0x1385   :  { %5397 = vmatpush3.bf16.msra.mxu1 %v3997_v38 }
0x1386   :  { %5398 = vmatprep.subr.bf16.mxu1 %v3996_v9 }
0x1389   :  { %5399 = vmatpush3.bf16.msra.mxu1 %v3996_v9 }
0x1433   :  { %v5094_v31 = vpop.f32.mrf.mxu0 }
0x1435   :  { %v5095_v18 = vpop.f32.mrf.mxu0 }
0x1436   :  { %v5096_v30 = vadd.f32 %v5095_v18, %v5094_v31  ;;  %v3995_v31 = vpack.c.bf16 %v3979_v36, %v3978_v20  ;;  %v3977_v18 = vld [vmem:[#allocation10 + $0x8] sm:$0xff] }
0x1437   :  { %v5097_v51 = vpop.f32.mrf.mxu0 }
0x1438   :  { %v3858_v11 = vadd.f32 %v5096_v30, %v4936_v8  ;;  %5400 = vmatprep.subr.bf16.mxu1 %v3995_v31 }
0x1439   :  { %v5098_v43 = vpop.f32.mrf.mxu0  ;;  %5401 = vmatpush3.bf16.msra.mxu1 %v3995_v31  ;;  %v4939_v31 = vld [vmem:[#allocation12] ss:$0 sm:$0xff] }
0x143a   :  { %v5099_v53 = vadd.f32 %v5098_v43, %v5097_v51  ;;  %v3872_v58 = vadd.f32 %v3858_v11, %v7506_v63 }
0x143b   :  { %v5100_v34 = vpop.f32.mrf.mxu0 }
0x143c   :  { %v3861_v42 = vadd.f32 %v5099_v53, %v4936_v8  ;;  %3880 = vadd.xlane.f32.xlu0 %v3872_v58 }
0x143d   :  { %v5101_v39 = vpop.f32.mrf.mxu0 }
0x143e   :  { %v5102_v16 = vadd.f32 %v5101_v39, %v5100_v34  ;;  %v3873_v55 = vadd.f32 %v3861_v42, %v7508_v37 }
0x143f   :  { %v5103_v46 = vpop.f32.mrf.mxu0 }
0x1440   :  { %v3866_v49 = vadd.f32 %v5102_v16, %v4936_v8  ;;  %3882 = vadd.xlane.f32.xlu1 %v3873_v55 }
0x1441   :  { %v5104_v41 = vpop.f32.mrf.mxu0 }
0x1442   :  { %v5105_v0 = vadd.f32 %v5104_v41, %v5103_v46  ;;  %v3874_v6 = vadd.f32 %v3866_v49, %v7516_v54 }
0x1444   :  { %v3869_v61 = vadd.f32 %v5105_v0, %v4936_v8  ;;  %3884 = vadd.xlane.f32.xlu0 %v3874_v6  ;;  %v3976_v8 = vld [vmem:[#allocation10] sm:$0xff] }
0x1445   :  { %v3994_v30 = vpack.c.bf16 %v3977_v18, %v3976_v8 }
0x1446   :  { %v3875_v32 = vadd.f32 %v3869_v61, %v7514_v4 }
0x1447   :  { %5402 = vmatprep.subr.bf16.mxu1 %v3994_v30 }
0x1448   :  { %3886 = vadd.xlane.f32.xlu1 %v3875_v32  ;;  %5403 = vmatpush3.bf16.msra.mxu1 %v3994_v30 }
0x14c5   :  { %v3881_v63 = vpop.xlane.xlu0 %3880 }
0x14c6   :  { %v3888_v45 = vmul.f32 0.0078125, %v3881_v63 }
0x14c8   :  { %v7558_v19 = vsub.f32 %v3872_v58, %v3888_v45 }
0x14c9   :  { %v3883_v21 = vpop.xlane.xlu1 %3882 }
0x14ca   :  { %v3889_v33 = vmul.f32 0.0078125, %v3883_v21  ;;  %v3896_v37 = vmul.f32 %v7558_v19, %v7558_v19  ;;  %v3946_v40 = vmul.f32 %v4937_v48, %v7558_v19 }
0x14cc   :  { %v7562_v7 = vsub.f32 %v3873_v55, %v3889_v33  ;;  %3900 = vadd.xlane.f32.xlu0 %v3896_v37 }
0x14cd   :  { %v3885_v5 = vpop.xlane.xlu0 %3884 }
0x14ce   :  { %v3890_v29 = vmul.f32 0.0078125, %v3885_v5  ;;  %v3897_v54 = vmul.f32 %v7562_v7, %v7562_v7  ;;  %v3947_v12 = vmul.f32 %v4937_v48, %v7562_v7 }
0x14d0   :  { %v7566_v13 = vsub.f32 %v3874_v6, %v3890_v29  ;;  %3902 = vadd.xlane.f32.xlu1 %v3897_v54 }
0x14d1   :  { %v3887_v4 = vpop.xlane.xlu1 %3886 }
0x14d2   :  { %v3891_v52 = vmul.f32 0.0078125, %v3887_v4  ;;  %v3898_v27 = vmul.f32 %v7566_v13, %v7566_v13  ;;  %v3948_v50 = vmul.f32 %v4937_v48, %v7566_v13 }
0x14d4   :  { %v7570_v62 = vsub.f32 %v3875_v32, %v3891_v52  ;;  %3904 = vadd.xlane.f32.xlu0 %v3898_v27 }
0x14d6   :  { %v3899_v2 = vmul.f32 %v7570_v62, %v7570_v62  ;;  %v3949_v47 = vmul.f32 %v4937_v48, %v7570_v62 }
0x14d8   :  { %3906 = vadd.xlane.f32.xlu1 %v3899_v2 }
0x1555   :  { %v3901_v51 = vpop.xlane.xlu0 %3900 }
0x1556   :  { %v3908_v11 = vmul.f32 0.007874016, %v3901_v51 }
0x1558   :  { %5719 = vrsqrt.f32 %v3908_v11  ;;  %vm3914_vm5 = vcmp.eq.f32.partialorder %v3908_v11, inf  ;;  %v3917_v46 = vand.u32 2147483648, %v3908_v11  ;;  %vm3916_vm6 = vcmp.eq.f32.partialorder %v3908_v11, 0.0 }
0x1559   :  { %v3903_v43 = vpop.xlane.xlu1 %3902 }
0x155a   :  { %v3909_v53 = vmul.f32 0.007874016, %v3903_v43 }
0x155c   :  { %5721 = vrsqrt.f32 %v3909_v53  ;;  %vm3921_vm7 = vcmp.eq.f32.partialorder %v3909_v53, inf  ;;  %v3924_v32 = vand.u32 2147483648, %v3909_v53  ;;  %vm3923_vm13 = vcmp.eq.f32.partialorder %v3909_v53, 0.0 }
0x155d   :  { %v3905_v58 = vpop.xlane.xlu0 %3904 }
0x155e   :  { %v3910_v34 = vmul.f32 0.007874016, %v3905_v58 }
0x1560   :  { %5723 = vrsqrt.f32 %v3910_v34  ;;  %vm3928_vm14 = vcmp.eq.f32.partialorder %v3910_v34, inf  ;;  %v3931_v5 = vand.u32 2147483648, %v3910_v34  ;;  %vm3930_vm15 = vcmp.eq.f32.partialorder %v3910_v34, 0.0 }
0x1561   :  { %v3907_v42 = vpop.xlane.xlu1 %3906 }
0x1562   :  { %v3911_v39 = vmul.f32 0.007874016, %v3907_v42 }
0x1564   :  { %5725 = vrsqrt.f32 %v3911_v39  ;;  %vm3935_vm0 = vcmp.eq.f32.partialorder %v3911_v39, inf  ;;  %v3938_v2 = vand.u32 2147483648, %v3911_v39  ;;  %vm3937_vm1 = vcmp.eq.f32.partialorder %v3911_v39, 0.0 }
0x1565   :  { %v5720_v16 = vpop.eup %5719 }
0x1566   :  { %v3913_v55 = vmul.f32 %v5720_v16, %v3908_v11 }
0x1568   :  { %v3915_v49 = vsel %vm3914_vm5, %v3908_v11, %v3913_v55 }
0x1569   :  { %v5722_v41 = vpop.eup %5721  ;;  %v3918_v0 = vsel %vm3916_vm6, %v3917_v46, %v3915_v49 }
0x156a   :  { %v3950_v6 = vadd.f32 1e-06, %v3918_v0  ;;  %v3920_v61 = vmul.f32 %v5722_v41, %v3909_v53 }
0x156c   :  { %5727 = vrcp.f32 %v3950_v6  ;;  %v3922_v63 = vsel %vm3921_vm7, %v3909_v53, %v3920_v61 }
0x156d   :  { %v5724_v45 = vpop.eup %5723  ;;  %v3925_v21 = vsel %vm3923_vm13, %v3924_v32, %v3922_v63 }
0x156e   :  { %v3951_v33 = vadd.f32 1e-06, %v3925_v21  ;;  %v3927_v37 = vmul.f32 %v5724_v45, %v3910_v34 }
0x1570   :  { %5729 = vrcp.f32 %v3951_v33  ;;  %v3929_v29 = vsel %vm3928_vm14, %v3910_v34, %v3927_v37 }
0x1571   :  { %v5726_v54 = vpop.eup %5725  ;;  %v3932_v4 = vsel %vm3930_vm15, %v3931_v5, %v3929_v29 }
0x1572   :  { %v3952_v52 = vadd.f32 1e-06, %v3932_v4  ;;  %v3934_v27 = vmul.f32 %v5726_v54, %v3911_v39 }
0x1574   :  { %5731 = vrcp.f32 %v3952_v52  ;;  %v3936_v57 = vsel %vm3935_vm0, %v3911_v39, %v3934_v27 }
0x1575   :  { %v3939_v35 = vsel %vm3937_vm1, %v3938_v2, %v3936_v57 }
0x1576   :  { %v3953_v3 = vadd.f32 1e-06, %v3939_v35 }
0x1578   :  { %5733 = vrcp.f32 %v3953_v3 }
0x1579   :  { %v5728_v15 = vpop.eup %5727 }
0x157a   :  { %v3955_v56 = vmul.f32 %v5728_v15, %v3946_v40 }
0x157c   :  { %v3968_v59 = vadd.f32 %v4938_v10, %v3955_v56 }
0x157d   :  { %v5730_v14 = vpop.eup %5729 }
0x157e   :  { %v3957_v44 = vmul.f32 %v5730_v14, %v3947_v12  ;;  %3972 = vst [vmem:[%s8128_s23] sm:$0xff] %v3968_v59 }
0x1580   :  { %v3969_v1 = vadd.f32 %v4938_v10, %v3957_v44 }
0x1581   :  { %v5732_v38 = vpop.eup %5731 }
0x1582   :  { %3973 = vst [vmem:[%s8128_s23 + $0x8] sm:$0xff] %v3969_v1  ;;  %v3992_v19 = vpack.c.bf16 %v3969_v1, %v3968_v59  ;;  %v3959_v22 = vmul.f32 %v5732_v38, %v3948_v50 }
0x1584   :  { %5404 = vmatprep.mubr.bf16.mxu1 %v3992_v19  ;;  %v3970_v7 = vadd.f32 %v4938_v10, %v3959_v22 }
0x1585   :  { %v5734_v9 = vpop.eup %5733 }
0x1586   :  { %v3961_v20 = vmul.f32 %v5734_v9, %v3949_v47  ;;  %3974 = vst [vmem:[%s8128_s23 + $0x10] sm:$0xff] %v3970_v7 }
0x1588   :  { %v3971_v36 = vadd.f32 %v4938_v10, %v3961_v20 }
0x158a   :  { %3975 = vst [vmem:[%s8128_s23 + $0x18] sm:$0xff] %v3971_v36  ;;  %v3993_v13 = vpack.c.bf16 %v3971_v36, %v3970_v7 }
0x158c   :  { %5405 = vmatmul.mubr.bf16.vlgmr.msra.gmra.mxu1 %v3993_v13 }
0x158d   :  { %4393 = vmatprep.mubr.bf16.mxu1 %v6004_v60 }
0x164c   :  { %v5406_v8 = vpop.f32.mrf.mxu1 }
0x164d   :  { %v4052_v62 = vadd.f32 %v5406_v8, %v4939_v31 }
0x164e   :  { %v4043_v18 = vpop.f32.mrf.mxu1 }
0x164f   :  { %v4064_v30 = vmul.f32 0.044715, %v4052_v62  ;;  %v4044_v51 = vadd.f32 %v4939_v31, %v4043_v18  ;;  %v4060_v15 = vmul.f32 0.5, %v4052_v62 }
0x1650   :  { %v5407_v11 = vpop.f32.mrf.mxu1 }
0x1651   :  { %v4068_v43 = vmul.f32 %v4064_v30, %v4052_v62  ;;  %v4062_v53 = vmul.f32 0.044715, %v4044_v51  ;;  %v4055_v58 = vadd.f32 %v5407_v11, %v4939_v31  ;;  %v4058_v52 = vmul.f32 0.5, %v4044_v51  ;;  %v4245_v30 = vld [vmem:[%s8126_s21 + $0x1c8] sm:$0xff]  ;;  %v4247_v11 = vld [vmem:[%s8126_s21 + $0x1d8] sm:$0xff] }
0x1652   :  { %v4046_v34 = vpop.f32.mrf.mxu1 }
0x1653   :  { %v4066_v42 = vmul.f32 %v4062_v53, %v4044_v51  ;;  %v4065_v39 = vmul.f32 0.044715, %v4055_v58  ;;  %v4047_v16 = vadd.f32 %v4939_v31, %v4046_v34  ;;  %v4072_v55 = vmul.f32 %v4068_v43, %v4052_v62  ;;  %v4251_v53 = vld [vmem:[%s8126_s21 + $0x1f8] sm:$0xff]  ;;  %v4248_v34 = vld [vmem:[%s8126_s21 + $0x1e0] sm:$0xff] }
0x1654   :  { %v4061_v59 = vmul.f32 0.5, %v4055_v58 }
0x1655   :  { %v4069_v46 = vmul.f32 %v4065_v39, %v4055_v58  ;;  %v4063_v49 = vmul.f32 0.044715, %v4047_v16  ;;  %v4070_v41 = vmul.f32 %v4066_v42, %v4044_v51  ;;  %v4076_v0 = vadd.f32 %v4072_v55, %v4052_v62  ;;  %v4250_v55 = vld [vmem:[%s8126_s21 + $0x1f0] sm:$0xff] }
0x1656   :  { %v4059_v3 = vmul.f32 0.5, %v4047_v16  ;;  %v4285_v42 = vpack.c.bf16 %v4251_v53, %v4247_v11  ;;  %v4214_v53 = vld [vmem:[%s8126_s21 + $0xd0] sm:$0xff] }
0x1657   :  { %v4067_v6 = vmul.f32 %v4063_v49, %v4047_v16  ;;  %v4074_v61 = vadd.f32 %v4070_v41, %v4044_v51  ;;  %v4073_v32 = vmul.f32 %v4069_v46, %v4055_v58  ;;  %v4080_v63 = vmul.f32 0.7978846, %v4076_v0  ;;  %v4249_v51 = vld [vmem:[%s8126_s21 + $0x1e8] sm:$0xff]  ;;  %v4239_v0 = vld [vmem:[%s8126_s21 + $0x198] sm:$0xff] }
0x1658   :  { %v4283_v43 = vpack.c.bf16 %v4249_v51, %v4245_v30  ;;  %4361 = vmatprep.subr.bf16.mxu1 %v4285_v42  ;;  %v4237_v49 = vld [vmem:[%s8126_s21 + $0x188] sm:$0xff]  ;;  %v4212_v30 = vld [vmem:[%s8126_s21 + $0xc0] sm:$0xff] }
0x1659   :  { %v4078_v45 = vmul.f32 0.7978846, %v4074_v61  ;;  %v4071_v21 = vmul.f32 %v4067_v6, %v4047_v16  ;;  %v4077_v33 = vadd.f32 %v4073_v32, %v4055_v58  ;;  %5735 = vtanh.f32 %v4080_v63  ;;  %v4244_v58 = vld [vmem:[%s8126_s21 + $0x1c0] sm:$0xff]  ;;  %v4241_v41 = vld [vmem:[%s8126_s21 + $0x1a8] sm:$0xff]  ;;  %v4243_v61 = vld [vmem:[%s8126_s21 + $0x1b8] sm:$0xff] }
0x165a   :  { %v4282_v39 = vpack.c.bf16 %v4248_v34, %v4244_v58  ;;  %4308 = vmatprep.subr.bf16.mxu0 %v4283_v43  ;;  %v4279_v6 = vpack.c.bf16 %v4241_v41, %v4237_v49  ;;  %v4236_v32 = vld [vmem:[%s8126_s21 + $0x180] sm:$0xff]  ;;  %v4218_v58 = vld [vmem:[%s8126_s21 + $0xf0] sm:$0xff]  ;;  %v4205_v34 = vld [vmem:[%s8126_s21 + $0x88] sm:$0xff] }
0x165b   :  { %5737 = vtanh.f32 %v4078_v45  ;;  %v4075_v37 = vadd.f32 %v4071_v21, %v4047_v16  ;;  %v4081_v5 = vmul.f32 0.7978846, %v4077_v33  ;;  %v4246_v16 = vld [vmem:[%s8126_s21 + $0x1d0] sm:$0xff]  ;;  %v4240_v63 = vld [vmem:[%s8126_s21 + $0x1a0] sm:$0xff]  ;;  %v4281_v45 = vpack.c.bf16 %v4243_v61, %v4239_v0 }
0x165c   :  { %v4284_v46 = vpack.c.bf16 %v4250_v55, %v4246_v16  ;;  %4309 = vmatpush1.bf16.msra.mxu0 %v4282_v39  ;;  %v4278_v21 = vpack.c.bf16 %v4240_v63, %v4236_v32  ;;  %v4238_v33 = vld [vmem:[%s8126_s21 + $0x190] sm:$0xff]  ;;  %v4216_v51 = vld [vmem:[%s8126_s21 + $0xe0] sm:$0xff]  ;;  %v4268_v42 = vpack.c.bf16 %v4218_v58, %v4214_v53  ;;  %v4209_v39 = vld [vmem:[%s8126_s21 + $0xa8] sm:$0xff] }
0x165d   :  { %v4079_v29 = vmul.f32 0.7978846, %v4075_v37  ;;  %5739 = vtanh.f32 %v4081_v5  ;;  %v4242_v37 = vld [vmem:[%s8126_s21 + $0x1b0] sm:$0xff]  ;;  %4310 = vmatprep.subr.bf16.mxu0 %v4279_v6  ;;  %v4266_v43 = vpack.c.bf16 %v4216_v51, %v4212_v30  ;;  %v4207_v16 = vld [vmem:[%s8126_s21 + $0x98] sm:$0xff]  ;;  %v4204_v41 = vld [vmem:[%s8126_s21 + $0x80] sm:$0xff] }
0x165e   :  { %4362 = vmatpush1.bf16.msra.mxu1 %v4284_v46  ;;  %v4280_v5 = vpack.c.bf16 %v4242_v37, %v4238_v33  ;;  %v4211_v55 = vld [vmem:[%s8126_s21 + $0xb8] sm:$0xff]  ;;  %v4263_v46 = vpack.c.bf16 %v4209_v39, %v4205_v34  ;;  %v4208_v0 = vld [vmem:[%s8126_s21 + $0xa0] sm:$0xff]  ;;  %v4206_v6 = vld [vmem:[%s8126_s21 + $0x90] sm:$0xff] }
0x165f   :  { %5741 = vtanh.f32 %v4079_v29  ;;  %4363 = vmatprep.subr.bf16.mxu1 %v4281_v45  ;;  %v4229_v29 = vld [vmem:[%s8126_s21 + $0x148] sm:$0xff]  ;;  %v4265_v49 = vpack.c.bf16 %v4211_v55, %v4207_v16  ;;  %v4262_v61 = vpack.c.bf16 %v4208_v0, %v4204_v41  ;;  %v4210_v32 = vld [vmem:[%s8126_s21 + $0xb0] sm:$0xff]  ;;  %v4199_v37 = vld [vmem:[%s8126_s21 + $0x58] sm:$0xff] }
0x1660   :  { %4311 = vmatpush1.bf16.msra.mxu0 %v4278_v21  ;;  %v4197_v63 = vld [vmem:[%s8126_s21 + $0x48] sm:$0xff]  ;;  %v4264_v21 = vpack.c.bf16 %v4210_v32, %v4206_v6 }
0x1661   :  { %v4201_v45 = vld [vmem:[%s8126_s21 + $0x68] sm:$0xff] }
0x1662   :  { %4364 = vmatpush1.bf16.msra.mxu1 %v4280_v5  ;;  %v4259_v33 = vpack.c.bf16 %v4201_v45, %v4197_v63  ;;  %v4203_v5 = vld [vmem:[%s8126_s21 + $0x78] sm:$0xff] }
0x1666   :  { %v5736_v54 = vpop.eup %5735 }
0x1667   :  { %v4088_v48 = vadd.f32 1.0, %v5736_v54  ;;  %v4233_v54 = vld [vmem:[%s8126_s21 + $0x168] sm:$0xff] }
0x1668   :  { %v5738_v4 = vpop.eup %5737 }
0x1669   :  { %v4086_v27 = vadd.f32 1.0, %v5738_v4  ;;  %v4092_v56 = vmul.f32 %v4088_v48, %v4060_v15  ;;  %v4231_v4 = vld [vmem:[%s8126_s21 + $0x158] sm:$0xff] }
0x166a   :  { %v5740_v2 = vpop.eup %5739 }
0x166b   :  { %v4090_v57 = vmul.f32 %v4086_v27, %v4058_v52  ;;  %v4089_v12 = vadd.f32 1.0, %v5740_v2  ;;  %v4275_v52 = vpack.c.bf16 %v4233_v54, %v4229_v29  ;;  %v4235_v27 = vld [vmem:[%s8126_s21 + $0x178] sm:$0xff]  ;;  %v4228_v2 = vld [vmem:[%s8126_s21 + $0x140] sm:$0xff]  ;;  %v4261_v54 = vpack.c.bf16 %v4203_v5, %v4199_v37  ;;  %v4940_v37 = vld [vmem:[#allocation13] ss:$0 sm:$0xff] }
0x166c   :  { %v5742_v35 = vpop.eup %5741  ;;  %v4277_v48 = vpack.c.bf16 %v4235_v27, %v4231_v4  ;;  %v4196_v29 = vld [vmem:[%s8126_s21 + $0x40] sm:$0xff]  ;;  %v4202_v27 = vld [vmem:[%s8126_s21 + $0x70] sm:$0xff] }
0x166d   :  { %4096 = vadd.xlane.f32.xlu0 %v4090_v57  ;;  %v4087_v40 = vadd.f32 1.0, %v5742_v35  ;;  %v4093_v14 = vmul.f32 %v4089_v12, %v4061_v59  ;;  %4312 = vmatprep.subr.bf16.mxu0 %v4275_v52  ;;  %v4223_v12 = vld [vmem:[%s8126_s21 + $0x118] sm:$0xff]  ;;  %v4200_v4 = vld [vmem:[%s8126_s21 + $0x60] sm:$0xff]  ;;  %v4198_v52 = vld [vmem:[%s8126_s21 + $0x50] sm:$0xff] }
0x166e   :  { %4365 = vmatprep.subr.bf16.mxu1 %v4277_v48  ;;  %v4193_v48 = vld [vmem:[%s8126_s21 + $0x28] sm:$0xff] }
0x166f   :  { %v4091_v10 = vmul.f32 %v4087_v40, %v4059_v3  ;;  %v4230_v3 = vld [vmem:[%s8126_s21 + $0x150] sm:$0xff] }
0x1670   :  { %v4234_v40 = vld [vmem:[%s8126_s21 + $0x170] sm:$0xff] }
0x1671   :  { %4098 = vadd.xlane.f32.xlu1 %v4091_v10  ;;  %4100 = vadd.xlane.f32.xlu0 %v4092_v56  ;;  %v4276_v15 = vpack.c.bf16 %v4234_v40, %v4230_v3  ;;  %v4260_v3 = vpack.c.bf16 %v4202_v27, %v4198_v52  ;;  %v4941_v27 = vld [vmem:[#allocation15] ss:$0 sm:$0xff] }
0x1673   :  { %4366 = vmatpush1.bf16.msra.mxu1 %v4276_v15  ;;  %v4195_v15 = vld [vmem:[%s8126_s21 + $0x38] sm:$0xff] }
0x1675   :  { %4102 = vadd.xlane.f32.xlu1 %v4093_v14 }
0x16f6   :  { %v4097_v44 = vpop.xlane.xlu0 %4096 }
0x16f7   :  { %v4104_v50 = vmul.f32 0.0078125, %v4097_v44  ;;  %v4220_v44 = vld [vmem:[%s8126_s21 + $0x100] sm:$0xff] }
0x16f9   :  { %v7591_v1 = vsub.f32 %v4090_v57, %v4104_v50  ;;  %v4232_v57 = vld [vmem:[%s8126_s21 + $0x160] sm:$0xff] }
0x16fa   :  { %v4099_v38 = vpop.xlane.xlu1 %4098  ;;  %v4101_v19 = vpop.xlane.xlu0 %4100  ;;  %v4274_v35 = vpack.c.bf16 %v4232_v57, %v4228_v2  ;;  %v4224_v50 = vld [vmem:[%s8126_s21 + $0x120] sm:$0xff]  ;;  %v4258_v2 = vpack.c.bf16 %v4200_v4, %v4196_v29  ;;  %v4189_v57 = vld [vmem:[%s8126_s21 + $0x8] sm:$0xff] }
0x16fb   :  { %v4105_v22 = vmul.f32 0.0078125, %v4099_v38  ;;  %v4106_v47 = vmul.f32 0.0078125, %v4101_v19  ;;  %v4112_v7 = vmul.f32 %v7591_v1, %v7591_v1  ;;  %v4270_v19 = vpack.c.bf16 %v4224_v50, %v4220_v44 }
0x16fc   :  { %4313 = vmatpush1.bf16.msra.mxu0 %v4274_v35  ;;  %v4191_v35 = vld [vmem:[%s8126_s21 + $0x18] sm:$0xff]  ;;  %v4255_v40 = vpack.c.bf16 %v4193_v48, %v4189_v57  ;;  %v4162_v29 = vmul.f32 %v4940_v37, %v7591_v1 }
0x16fd   :  { %v7595_v9 = vsub.f32 %v4091_v10, %v4105_v22  ;;  %v7597_v20 = vsub.f32 %v4092_v56, %v4106_v47  ;;  %4116 = vadd.xlane.f32.xlu0 %v4112_v7  ;;  %v4221_v10 = vld [vmem:[%s8126_s21 + $0x108] sm:$0xff]  ;;  %v4222_v22 = vld [vmem:[%s8126_s21 + $0x110] sm:$0xff] }
0x16fe   :  { %v4103_v36 = vpop.xlane.xlu1 %4102  ;;  %v4225_v56 = vld [vmem:[%s8126_s21 + $0x128] sm:$0xff]  ;;  %v4226_v47 = vld [vmem:[%s8126_s21 + $0x130] sm:$0xff] }
0x16ff   :  { %v4107_v13 = vmul.f32 0.0078125, %v4103_v36  ;;  %v4113_v31 = vmul.f32 %v7595_v9, %v7595_v9  ;;  %v4114_v8 = vmul.f32 %v7597_v20, %v7597_v20  ;;  %v4271_v59 = vpack.c.bf16 %v4225_v56, %v4221_v10  ;;  %v4213_v36 = vld [vmem:[%s8126_s21 + $0xc8] sm:$0xff]  ;;  %v4188_v10 = vld [vmem:[%s8126_s21] sm:$0xff] }
0x1700   :  { %v4272_v7 = vpack.c.bf16 %v4226_v47, %v4222_v22  ;;  %v4192_v56 = vld [vmem:[%s8126_s21 + $0x20] sm:$0xff]  ;;  %v4164_v57 = vmul.f32 %v4940_v37, %v7597_v20 }
0x1701   :  { %v7603_v62 = vsub.f32 %v4093_v14, %v4107_v13  ;;  %4118 = vadd.xlane.f32.xlu1 %v4113_v31  ;;  %4120 = vadd.xlane.f32.xlu0 %v4114_v8  ;;  %v4227_v14 = vld [vmem:[%s8126_s21 + $0x138] sm:$0xff]  ;;  %v4217_v13 = vld [vmem:[%s8126_s21 + $0xe8] sm:$0xff]  ;;  %v4254_v44 = vpack.c.bf16 %v4192_v56, %v4188_v10  ;;  %v4286_v20 = vld [vmem:[%s8127_s22] sm:$0xf] }
0x1702   :  { %v4273_v38 = vpack.c.bf16 %v4227_v14, %v4223_v12  ;;  %4314 = vmatprep.subr.bf16.mxu0 %v4271_v59  ;;  %v4215_v31 = vld [vmem:[%s8126_s21 + $0xd8] sm:$0xff]  ;;  %v4267_v8 = vpack.c.bf16 %v4217_v13, %v4213_v36  ;;  %v4257_v12 = vpack.c.bf16 %v4195_v15, %v4191_v35  ;;  %v4190_v59 = vld [vmem:[%s8126_s21 + $0x10] sm:$0xff] }
0x1703   :  { %v4115_v18 = vmul.f32 %v7603_v62, %v7603_v62  ;;  %4315 = vmatpush1.bf16.msra.mxu0 %v4270_v19  ;;  %v4194_v14 = vld [vmem:[%s8126_s21 + $0x30] sm:$0xff]  ;;  %v4165_v35 = vmul.f32 %v4940_v37, %v7603_v62  ;;  %v4291_v62 = vrot.slane %v4286_v20, %v6388_v25 }
0x1704   :  { %4367 = vmatprep.subr.bf16.mxu1 %v4273_v38  ;;  %4316 = vmatprep.subr.bf16.mxu0 %v4267_v8  ;;  %v4256_v50 = vpack.c.bf16 %v4194_v14, %v4190_v59  ;;  %v4295_v14 = vrot.slane %v4286_v20, %v6397_v28 }
0x1705   :  { %4122 = vadd.xlane.f32.xlu1 %v4115_v18  ;;  %4368 = vmatpush1.bf16.msra.mxu1 %v4272_v7  ;;  %v4219_v18 = vld [vmem:[%s8126_s21 + $0xf8] sm:$0xff] }
0x1706   :  { %v4269_v11 = vpack.c.bf16 %v4219_v18, %v4215_v31 }
0x1707   :  { %4317 = vmatpush1.bf16.msra.mxu0 %v4266_v43 }
0x1708   :  { %4369 = vmatprep.subr.bf16.mxu1 %v4269_v11  ;;  %4318 = vmatprep.subr.bf16.mxu0 %v4263_v46 }
0x1709   :  { %4370 = vmatpush1.bf16.msra.mxu1 %v4268_v42 }
0x170a   :  { %4371 = vmatprep.subr.bf16.mxu1 %v4265_v49 }
0x170b   :  { %4319 = vmatpush1.bf16.msra.mxu0 %v4262_v61 }
0x170c   :  { %4320 = vmatprep.subr.bf16.mxu0 %v4259_v33 }
0x170d   :  { %4372 = vmatpush1.bf16.msra.mxu1 %v4264_v21 }
0x170e   :  { %4373 = vmatprep.subr.bf16.mxu1 %v4261_v54  ;;  %v4163_v54 = vmul.f32 %v4940_v37, %v7595_v9 }
0x170f   :  { %4321 = vmatpush1.bf16.msra.mxu0 %v4258_v2 }
0x1710   :  { %4322 = vmatprep.subr.bf16.mxu0 %v4255_v40 }
0x1711   :  { %4374 = vmatpush1.bf16.msra.mxu1 %v4260_v3 }
0x1712   :  { %4375 = vmatprep.subr.bf16.mxu1 %v4257_v12 }
0x1713   :  { %4323 = vmatpush1.bf16.msra.mxu0 %v4254_v44  ;;  %v4302_v44 = vsub.s32 3, %v6385_v24 }
0x1715   :  { %4376 = vmatpush1.bf16.msra.mxu1 %v4256_v50 }
0x1786   :  { %v4117_v38 = vpop.xlane.xlu0 %4116 }
0x1787   :  { %v4124_v19 = vmul.f32 0.007874016, %v4117_v38 }
0x1789   :  { %5743 = vrsqrt.f32 %v4124_v19  ;;  %vm4130_vm8 = vcmp.eq.f32.partialorder %v4124_v19, inf  ;;  %v4133_v30 = vand.u32 2147483648, %v4124_v19  ;;  %vm4132_vm9 = vcmp.eq.f32.partialorder %v4124_v19, 0.0 }
0x178a   :  { %v4119_v22 = vpop.xlane.xlu1 %4118  ;;  %v4121_v7 = vpop.xlane.xlu0 %4120 }
0x178b   :  { %v4125_v47 = vmul.f32 0.007874016, %v4119_v22  ;;  %v4126_v36 = vmul.f32 0.007874016, %v4121_v7 }
0x178d   :  { %5745 = vrsqrt.f32 %v4125_v47  ;;  %vm4137_vm10 = vcmp.eq.f32.partialorder %v4125_v47, inf  ;;  %vm4139_vm11 = vcmp.eq.f32.partialorder %v4125_v47, 0.0  ;;  %v4140_v42 = vand.u32 2147483648, %v4125_v47 }
0x178e   :  { %5747 = vrsqrt.f32 %v4126_v36  ;;  %v4123_v13 = vpop.xlane.xlu1 %4122  ;;  %vm4144_vm12 = vcmp.eq.f32.partialorder %v4126_v36, inf  ;;  %v4147_v55 = vand.u32 2147483648, %v4126_v36  ;;  %vm4146_vm2 = vcmp.eq.f32.partialorder %v4126_v36, 0.0 }
0x178f   :  { %v4127_v31 = vmul.f32 0.007874016, %v4123_v13 }
0x1791   :  { %5749 = vrsqrt.f32 %v4127_v31  ;;  %vm4151_vm3 = vcmp.eq.f32.partialorder %v4127_v31, inf  ;;  %v4154_v63 = vand.u32 2147483648, %v4127_v31  ;;  %vm4153_vm4 = vcmp.eq.f32.partialorder %v4127_v31, 0.0 }
0x1796   :  { %v5744_v8 = vpop.eup %5743 }
0x1797   :  { %v4129_v18 = vmul.f32 %v5744_v8, %v4124_v19 }
0x1799   :  { %v4131_v51 = vsel %vm4130_vm8, %v4124_v19, %v4129_v18  ;;  %v4299_v19 = vrot.slane %v4286_v20, %v6391_v26 }
0x179a   :  { %v5746_v11 = vpop.eup %5745  ;;  %v4134_v43 = vsel %vm4132_vm9, %v4133_v30, %v4131_v51 }
0x179b   :  { %v5748_v53 = vpop.eup %5747  ;;  %v4166_v58 = vadd.f32 1e-06, %v4134_v43  ;;  %v4136_v34 = vmul.f32 %v5746_v11, %v4125_v47 }
0x179c   :  { %v4143_v39 = vmul.f32 %v5748_v53, %v4126_v36 }
0x179d   :  { %5751 = vrcp.f32 %v4166_v58  ;;  %v4138_v16 = vsel %vm4137_vm10, %v4125_v47, %v4136_v34 }
0x179e   :  { %v5750_v46 = vpop.eup %5749  ;;  %v4141_v49 = vsel %vm4139_vm11, %v4140_v42, %v4138_v16  ;;  %v4145_v41 = vsel %vm4144_vm12, %v4126_v36, %v4143_v39  ;;  %v4303_v36 = vrot.slane %v4286_v20, %v4302_v44 }
0x179f   :  { %v4167_v0 = vadd.f32 1e-06, %v4141_v49  ;;  %v4148_v6 = vsel %vm4146_vm2, %v4147_v55, %v4145_v41  ;;  %v4150_v61 = vmul.f32 %v5750_v46, %v4127_v31 }
0x17a0   :  { %v4168_v32 = vadd.f32 1e-06, %v4148_v6 }
0x17a1   :  { %5753 = vrcp.f32 %v4167_v0  ;;  %v4152_v45 = vsel %vm4151_vm3, %v4127_v31, %v4150_v61 }
0x17a2   :  { %5755 = vrcp.f32 %v4168_v32  ;;  %v4155_v21 = vsel %vm4153_vm4, %v4154_v63, %v4152_v45 }
0x17a3   :  { %v4169_v33 = vadd.f32 1e-06, %v4155_v21 }
0x17a5   :  { %5757 = vrcp.f32 %v4169_v33 }
0x17aa   :  { %v5752_v5 = vpop.eup %5751 }
0x17ab   :  { %v4171_v4 = vmul.f32 %v5752_v5, %v4162_v29 }
0x17ad   :  { %v4184_v3 = vadd.f32 %v4941_v27, %v4171_v4 }
0x17ae   :  { %v5754_v52 = vpop.eup %5753 }
0x17af   :  { %v5756_v2 = vpop.eup %5755  ;;  %v4173_v48 = vmul.f32 %v5754_v52, %v4163_v54 }
0x17b0   :  { %v4175_v15 = vmul.f32 %v5756_v2, %v4164_v57  ;;  %v7861_v57 = vand.u32 127, %v384_v23 }
0x17b1   :  { %v4185_v40 = vadd.f32 %v4941_v27, %v4173_v48 }
0x17b2   :  { %v5758_v10 = vpop.eup %5757  ;;  %v4186_v1 = vadd.f32 %v4941_v27, %v4175_v15  ;;  %v7864_v48 = vadd.s32 128, %v7861_v57  ;;  %v7878_v23 = vadd.s32 384, %v7861_v57 }
0x17b3   :  { %v4252_v56 = vpack.c.bf16 %v4185_v40, %v4184_v3  ;;  %v4177_v12 = vmul.f32 %v5758_v10, %v4165_v35  ;;  %v7869_v3 = vadd.s32 256, %v7861_v57 }
0x17b5   :  { %4341 = vmatmul.mubr.bf16.vlgmr.msra.gmra.mxu0 %v4252_v56  ;;  %4394 = vmatmul.mubr.bf16.vlgmr.msra.gmra.mxu1 %v4252_v56  ;;  %v4187_v59 = vadd.f32 %v4941_v27, %v4177_v12 }
0x17b6   :  { %4350 = vmatprep.mubr.bf16.mxu0 %v6004_v60  ;;  %4403 = vmatprep.mubr.bf16.mxu1 %v6004_v60 }
0x17b7   :  { %v4253_v9 = vpack.c.bf16 %v4187_v59, %v4186_v1 }
0x17bd   :  { %4351 = vmatmul.mubr.bf16.gmra.mxu0 %v4253_v9  ;;  %4404 = vmatmul.mubr.bf16.gmra.mxu1 %v4253_v9 }
0x1875   :  { %v4342_v50 = vpop.f32.mrf.mxu0  ;;  %v4395_v38 = vpop.f32.mrf.mxu1 }
0x1876   :  { %v7812_v60 = vadd.f32 %v4342_v50, %v4291_v62  ;;  %v7816_v8 = vadd.f32 %v4395_v38, %v4299_v19 }
0x1877   :  { %v4344_v22 = vpop.f32.mrf.mxu0  ;;  %v4397_v47 = vpop.f32.mrf.mxu1 }
0x1878   :  { %v7814_v7 = vadd.f32 %v4344_v22, %v4295_v14  ;;  %v7820_v18 = vadd.f32 %v4397_v47, %v4303_v36 }
0x1879   :  { %v4346_v13 = vpop.f32.mrf.mxu0  ;;  %v4399_v31 = vpop.f32.mrf.mxu1 }
0x187a   :  { %v4418_v25 = vmax.f32 %v7812_v60, %v7814_v7  ;;  %v7822_v30 = vadd.f32 %v4346_v13, %v4291_v62  ;;  %v7827_v53 = vadd.f32 %v4399_v31, %v4299_v19 }
0x187b   :  { %v4348_v28 = vpop.f32.mrf.mxu0  ;;  %v4401_v24 = vpop.f32.mrf.mxu1 }
0x187c   :  { %v7824_v26 = vadd.f32 %v4348_v28, %v4295_v14  ;;  %v4419_v51 = vmax.f32 %v4418_v25, %v7816_v8  ;;  %v7832_v16 = vadd.f32 %v4401_v24, %v4303_v36 }
0x187d   :  { %v4352_v11 = vpop.f32.mrf.mxu0  ;;  %v4405_v43 = vpop.f32.mrf.mxu1 }
0x187e   :  { %v4420_v58 = vmax.f32 %v4419_v51, %v7820_v18  ;;  %v4423_v34 = vmax.f32 %v7822_v30, %v7824_v26  ;;  %v7834_v55 = vadd.f32 %v4352_v11, %v4291_v62  ;;  %v7839_v6 = vadd.f32 %v4405_v43, %v4299_v19 }
0x187f   :  { %v4354_v42 = vpop.f32.mrf.mxu0  ;;  %v4407_v39 = vpop.f32.mrf.mxu1 }
0x1880   :  { %v7836_v46 = vadd.f32 %v4354_v42, %v4295_v14  ;;  %4421 = vmax.xlane.f32.xlu0 %v4420_v58  ;;  %v4424_v49 = vmax.f32 %v4423_v34, %v7827_v53  ;;  %v7844_v45 = vadd.f32 %v4407_v39, %v4303_v36  ;;  %v7935_v39 = vld [vmem:[%s8153_s9 + $0x8] sm:$0xff] }
0x1881   :  { %v4356_v41 = vpop.f32.mrf.mxu0  ;;  %v4409_v0 = vpop.f32.mrf.mxu1 }
0x1882   :  { %v4425_v61 = vmax.f32 %v4424_v49, %v7832_v16  ;;  %v4428_v32 = vmax.f32 %v7834_v55, %v7836_v46  ;;  %v7846_v21 = vadd.f32 %v4356_v41, %v4291_v62  ;;  %v7851_v29 = vadd.f32 %v4409_v0, %v4299_v19  ;;  %v7941_v49 = vld [vmem:[%s8153_s9 + $0x10] sm:$0xff] }
0x1883   :  { %v4358_v63 = vpop.f32.mrf.mxu0  ;;  %v4411_v5 = vpop.f32.mrf.mxu1 }
0x1884   :  { %v7848_v33 = vadd.f32 %v4358_v63, %v4295_v14  ;;  %4426 = vmax.xlane.f32.xlu1 %v4425_v61  ;;  %v4429_v37 = vmax.f32 %v4428_v32, %v7839_v6  ;;  %v7856_v52 = vadd.f32 %v4411_v5, %v4303_v36  ;;  %v7951_v61 = vld [vmem:[%s8153_s9] sm:$0xff] }
0x1886   :  { %v4430_v54 = vmax.f32 %v4429_v37, %v7844_v45  ;;  %v4433_v4 = vmax.f32 %v7846_v21, %v7848_v33 }
0x1888   :  { %4431 = vmax.xlane.f32.xlu0 %v4430_v54  ;;  %v4434_v27 = vmax.f32 %v4433_v4, %v7851_v29 }
0x188a   :  { %v4435_v2 = vmax.f32 %v4434_v27, %v7856_v52 }
0x188c   :  { %4436 = vmax.xlane.f32.xlu1 %v4435_v2 }
0x1909   :  { %v7866_v35 = vpop.xlane.xlu0 %4421 }
0x190a   :  { %vm4587_vm5 = vcmp.eq.f32.partialorder %v7812_v60, %v7866_v35  ;;  %vm4588_vm6 = vcmp.eq.f32.partialorder %v7814_v7, %v7866_v35  ;;  %vm4589_vm7 = vcmp.eq.f32.partialorder %v7816_v8, %v7866_v35  ;;  %vm4590_vm13 = vcmp.eq.f32.partialorder %v7820_v18, %v7866_v35 }
0x190b   :  { %v4603_v40 = vsel %vm4587_vm5, %v7861_v57, 512  ;;  %v4604_v15 = vsel %vm4588_vm6, %v7864_v48, 512  ;;  %v4605_v56 = vsel %vm4589_vm7, %v7869_v3, 512  ;;  %v4606_v1 = vsel %vm4590_vm13, %v7878_v23, 512 }
0x190c   :  { %vm4619_vm14 = vcmp.lt.s32.totalorder %v4603_v40, %v4604_v15 }
0x190d   :  { %v7884_v10 = vpop.xlane.xlu1 %4426  ;;  %v4620_v12 = vsel %vm4619_vm14, %v4603_v40, %v4604_v15 }
0x190e   :  { %vm4621_vm15 = vcmp.lt.s32.totalorder %v4620_v12, %v4605_v56  ;;  %vm4591_vm0 = vcmp.eq.f32.partialorder %v7822_v30, %v7884_v10  ;;  %vm4592_vm1 = vcmp.eq.f32.partialorder %v7824_v26, %v7884_v10  ;;  %vm4593_vm8 = vcmp.eq.f32.partialorder %v7827_v53, %v7884_v10 }
0x190f   :  { %v4622_v59 = vsel %vm4621_vm15, %v4620_v12, %v4605_v56  ;;  %v4607_v9 = vsel %vm4591_vm0, %v7861_v57, 512  ;;  %v4608_v20 = vsel %vm4592_vm1, %v7864_v48, 512  ;;  %vm4594_vm10 = vcmp.eq.f32.partialorder %v7832_v16, %v7884_v10 }
0x1910   :  { %vm4623_vm9 = vcmp.lt.s32.totalorder %v4622_v59, %v4606_v1  ;;  %vm4639_vm11 = vcmp.lt.s32.totalorder %v4607_v9, %v4608_v20  ;;  %v4609_v44 = vsel %vm4593_vm8, %v7869_v3, 512  ;;  %v4610_v19 = vsel %vm4594_vm10, %v7878_v23, 512 }
0x1911   :  { %v7898_v62 = vpop.xlane.xlu0 %4431  ;;  %v7900_v14 = vsel %vm4623_vm9, %v4622_v59, %v4606_v1  ;;  %v4640_v50 = vsel %vm4639_vm11, %v4607_v9, %v4608_v20  ;;  %v4442_v41 = vsub.f32 %v7822_v30, %v7884_v10  ;;  %v4443_v32 = vsub.f32 %v7824_v26, %v7884_v10 }
0x1912   :  { %v4626_v38 = vshra.s32 %v7900_v14, 16  ;;  %vm4641_vm12 = vcmp.lt.s32.totalorder %v4640_v50, %v4609_v44  ;;  %vm4595_vm2 = vcmp.eq.f32.partialorder %v7834_v55, %v7898_v62  ;;  %vm4596_vm3 = vcmp.eq.f32.partialorder %v7836_v46, %v7898_v62 }
0x1913   :  { %v4642_v22 = vsel %vm4641_vm12, %v4640_v50, %v4609_v44  ;;  %vm4597_vm4 = vcmp.eq.f32.partialorder %v7839_v6, %v7898_v62  ;;  %v4611_v47 = vsel %vm4595_vm2, %v7861_v57, 512  ;;  %v4612_v13 = vsel %vm4596_vm3, %v7864_v48, 512 }
0x1914   :  { %v7912_v36 = vcvt.s32.f32 %v4626_v38  ;;  %vm4643_vm5 = vcmp.lt.s32.totalorder %v4642_v22, %v4610_v19  ;;  %vm4598_vm6 = vcmp.eq.f32.partialorder %v7844_v45, %v7898_v62  ;;  %vm4659_vm7 = vcmp.lt.s32.totalorder %v4611_v47, %v4612_v13 }
0x1915   :  { %v7915_v31 = vsel %vm4643_vm5, %v4642_v22, %v4610_v19  ;;  %v4613_v28 = vsel %vm4597_vm4, %v7869_v3, 512  ;;  %v4660_v24 = vsel %vm4659_vm7, %v4611_v47, %v4612_v13  ;;  %v4614_v11 = vsel %vm4598_vm6, %v7878_v23, 512  ;;  %v7946_v0 = vpop.xlane.xlu1 %4436 }
0x1916   :  { %4629 = vmin.xlane.f32.xlu0 %v7912_v36  ;;  %v4646_v25 = vshra.s32 %v7915_v31, 16  ;;  %vm4661_vm13 = vcmp.lt.s32.totalorder %v4660_v24, %v4613_v28  ;;  %vm4599_vm15 = vcmp.eq.f32.partialorder %v7846_v21, %v7946_v0  ;;  %vm4600_vm0 = vcmp.eq.f32.partialorder %v7848_v33, %v7946_v0 }
0x1917   :  { %v4662_v43 = vsel %vm4661_vm13, %v4660_v24, %v4613_v28  ;;  %v4462_v63 = vmul.f32 1.442695, %v4442_v41  ;;  %v4464_v37 = vmul.f32 1.442695, %v4443_v32  ;;  %v4615_v5 = vsel %vm4599_vm15, %v7861_v57, 512 }
0x1918   :  { %v7922_v51 = vcvt.s32.f32 %v4646_v25  ;;  %vm4663_vm14 = vcmp.lt.s32.totalorder %v4662_v43, %v4614_v11  ;;  %v4616_v54 = vsel %vm4600_vm0, %v7864_v48, 512  ;;  %v4444_v4 = vsub.f32 %v7827_v53, %v7884_v10  ;;  %v7981_v25 = vld [vmem:[%s8153_s9 + $0x18] sm:$0xff] }
0x1919   :  { %v7926_v58 = vsel %vm4663_vm14, %v4662_v43, %v4614_v11  ;;  %5759 = vpow2.f32 %v4462_v63  ;;  %vm4679_vm1 = vcmp.lt.s32.totalorder %v4615_v5, %v4616_v54  ;;  %v4445_v27 = vsub.f32 %v7832_v16, %v7884_v10 }
0x191a   :  { %4649 = vmin.xlane.f32.xlu1 %v7922_v51  ;;  %v4666_v34 = vshra.s32 %v7926_v58, 16  ;;  %5761 = vpow2.f32 %v4464_v37  ;;  %v4466_v2 = vmul.f32 1.442695, %v4444_v4  ;;  %vm4601_vm8 = vcmp.eq.f32.partialorder %v7851_v29, %v7946_v0 }
0x191b   :  { %v4680_v40 = vsel %vm4679_vm1, %v4615_v5, %v4616_v54  ;;  %v4617_v15 = vsel %vm4601_vm8, %v7869_v3, 512  ;;  %v4468_v56 = vmul.f32 1.442695, %v4445_v27  ;;  %vm4602_vm10 = vcmp.eq.f32.partialorder %v7856_v52, %v7946_v0 }
0x191c   :  { %v7929_v42 = vcvt.s32.f32 %v4666_v34  ;;  %5763 = vpow2.f32 %v4466_v2  ;;  %vm4681_vm9 = vcmp.lt.s32.totalorder %v4680_v40, %v4617_v15  ;;  %v4618_v59 = vsel %vm4602_vm10, %v7878_v23, 512 }
0x191d   :  { %v4682_v12 = vsel %vm4681_vm9, %v4680_v40, %v4617_v15  ;;  %5765 = vpow2.f32 %v4468_v56  ;;  %v4438_v28 = vsub.f32 %v7812_v60, %v7866_v35  ;;  %v4439_v24 = vsub.f32 %v7814_v7, %v7866_v35 }
0x191e   :  { %4669 = vmin.xlane.f32.xlu0 %v7929_v42  ;;  %vm4683_vm11 = vcmp.lt.s32.totalorder %v4682_v12, %v4618_v59  ;;  %v4446_v43 = vsub.f32 %v7834_v55, %v7898_v62  ;;  %v4447_v41 = vsub.f32 %v7836_v46, %v7898_v62  ;;  %v4440_v32 = vsub.f32 %v7816_v8, %v7866_v35 }
0x191f   :  { %v7972_v20 = vsel %vm4683_vm11, %v4682_v12, %v4618_v59  ;;  %v4454_v11 = vmul.f32 1.442695, %v4438_v28  ;;  %v4456_v34 = vmul.f32 1.442695, %v4439_v24  ;;  %v4450_v37 = vsub.f32 %v7846_v21, %v7946_v0 }
0x1920   :  { %v4686_v38 = vshra.s32 %v7972_v20, 16  ;;  %v4470_v63 = vmul.f32 1.442695, %v4446_v43  ;;  %v4472_v5 = vmul.f32 1.442695, %v4447_v41  ;;  %v4451_v54 = vsub.f32 %v7848_v33, %v7946_v0 }
0x1921   :  { %5767 = vpow2.f32 %v4454_v11  ;;  %v4441_v4 = vsub.f32 %v7820_v18, %v7866_v35  ;;  %v4458_v27 = vmul.f32 1.442695, %v4440_v32  ;;  %v4448_v2 = vsub.f32 %v7839_v6, %v7898_v62 }
0x1922   :  { %v7975_v47 = vcvt.s32.f32 %v4686_v38  ;;  %5769 = vpow2.f32 %v4456_v34  ;;  %v4478_v40 = vmul.f32 1.442695, %v4450_v37  ;;  %v4480_v15 = vmul.f32 1.442695, %v4451_v54 }
0x1923   :  { %5771 = vpow2.f32 %v4470_v63  ;;  %v4460_v56 = vmul.f32 1.442695, %v4441_v4  ;;  %v4449_v12 = vsub.f32 %v7844_v45, %v7898_v62  ;;  %v4452_v59 = vsub.f32 %v7851_v29, %v7946_v0 }
0x1924   :  { %5773 = vpow2.f32 %v4472_v5 }
0x1925   :  { %5775 = vpow2.f32 %v4458_v27 }
0x1926   :  { %v5760_v1 = vpop.eup %5759  ;;  %5777 = vpow2.f32 %v4478_v40 }
0x1927   :  { %v5762_v9 = vpop.eup %5761  ;;  %5779 = vpow2.f32 %v4480_v15 }
0x1928   :  { %v4491_v44 = vadd.f32 %v5762_v9, %v5760_v1  ;;  %v4474_v1 = vmul.f32 1.442695, %v4448_v2  ;;  %5781 = vpow2.f32 %v4460_v56  ;;  %v4476_v9 = vmul.f32 1.442695, %v4449_v12 }
0x1929   :  { %v5764_v50 = vpop.eup %5763 }
0x192a   :  { %v4492_v19 = vadd.f32 %v5764_v50, %v4491_v44  ;;  %v5766_v22 = vpop.eup %5765  ;;  %5783 = vpow2.f32 %v4474_v1  ;;  %v4453_v44 = vsub.f32 %v7856_v52, %v7946_v0  ;;  %v4482_v50 = vmul.f32 1.442695, %v4452_v59 }
0x192b   :  { %4527 = vperm.xlu1 %5494, %v7935_v39   ;;  %5785 = vpow2.f32 %v4476_v9 }
0x192c   :  { %v4493_v13 = vadd.f32 %v5766_v22, %v4492_v19  ;;  %5787 = vpow2.f32 %v4482_v50  ;;  %v4484_v22 = vmul.f32 1.442695, %v4453_v44 }
0x192e   :  { %v5768_v38 = vpop.eup %5767  ;;  %5789 = vpow2.f32 %v4484_v22 }
0x192f   :  { %4530 = vperm.xlu1 %5494, %v7941_v49   ;;  %v5770_v19 = vpop.eup %5769 }
0x1930   :  { %v4486_v28 = vadd.f32 %v5770_v19, %v5768_v38 }
0x1934   :  { %4524 = vperm.xlu0 %5493, %v7951_v61  }
0x1953   :  { %4689 = vmin.xlane.f32.xlu1 %v7975_v47  ;;  %4494 = vadd.xlane.f32.xlu0 %v4493_v13  ;;  %v5772_v13 = vpop.eup %5771 }
0x1954   :  { %v5774_v24 = vpop.eup %5773 }
0x1955   :  { %v5776_v11 = vpop.eup %5775  ;;  %v4496_v41 = vadd.f32 %v5774_v24, %v5772_v13 }
0x1956   :  { %v5778_v43 = vpop.eup %5777  ;;  %v4487_v34 = vadd.f32 %v5776_v11, %v4486_v28  ;;  %v4665_v11 = vand.u32 65535, %v7926_v58 }
0x1957   :  { %v5780_v32 = vpop.eup %5779 }
0x1958   :  { %v5782_v63 = vpop.eup %5781  ;;  %v4501_v4 = vadd.f32 %v5780_v32, %v5778_v43  ;;  %v4667_v58 = vcvt.s32.f32 %v4665_v11 }
0x1959   :  { %v5784_v37 = vpop.eup %5783  ;;  %v4488_v5 = vadd.f32 %v5782_v63, %v4487_v34 }
0x195a   :  { %v4497_v54 = vadd.f32 %v5784_v37, %v4496_v41  ;;  %v5786_v27 = vpop.eup %5785 }
0x195b   :  { %v5788_v2 = vpop.eup %5787 }
0x195c   :  { %v4498_v40 = vadd.f32 %v5786_v27, %v4497_v54  ;;  %v4502_v15 = vadd.f32 %v5788_v2, %v4501_v4  ;;  %v5790_v56 = vpop.eup %5789 }
0x195e   :  { %v4503_v12 = vadd.f32 %v5790_v56, %v4502_v15 }
0x1964   :  { %4533 = vperm.xlu1 %5494, %v7981_v25  }
0x1988   :  { %4489 = vadd.xlane.f32.xlu1 %v4488_v5 }
0x198c   :  { %4499 = vadd.xlane.f32.xlu1 %v4498_v40 }
0x1990   :  { %4504 = vadd.xlane.f32.xlu1 %v4503_v12 }
0x199f   :  { %v8010_v9 = vpop.xlane.xlu0 %4629 }
0x19a0   :  { %vm4631_vm9 = vcmp.eq.f32.partialorder %v7912_v36, %v8010_v9 }
0x19a3   :  { %v8008_v1 = vpop.xlane.xlu1 %4649 }
0x19a4   :  { %vm4651_vm10 = vcmp.eq.f32.partialorder %v7922_v51, %v8008_v1 }
0x19a7   :  { %v4528_v59 = vpop.permute.xlu1 %4527  ;;  %v8018_v22 = vpop.xlane.xlu0 %4669 }
0x19a8   :  { %vm4539_vm12 = vcmp.eq.s32.totalorder %v7861_v57, %v4528_v59  ;;  %vm4540_vm2 = vcmp.eq.s32.totalorder %v7864_v48, %v4528_v59  ;;  %vm4541_vm3 = vcmp.eq.s32.totalorder %v7869_v3, %v4528_v59  ;;  %vm4542_vm4 = vcmp.eq.s32.totalorder %v7878_v23, %v4528_v59 }
0x19a9   :  { %v4555_v44 = vsel %vm4539_vm12, %v7822_v30, 0.0  ;;  %v4556_v50 = vsel %vm4540_vm2, %v7824_v26, 0.0  ;;  %v4557_v13 = vsel %vm4541_vm3, %v7827_v53, 0.0  ;;  %v4558_v26 = vsel %vm4542_vm4, %v7832_v16, 0.0 }
0x19aa   :  { %v4572_v38 = vadd.f32 %v4556_v50, %v4555_v44  ;;  %vm4671_vm0 = vcmp.eq.f32.partialorder %v7929_v42, %v8018_v22 }
0x19ab   :  { %v4531_v19 = vpop.permute.xlu1 %4530  ;;  %v4672_v37 = vsel %vm4671_vm0, %v4667_v58, inf  ;;  %vm4732_vm0 = vcmask 7168  }
0x19ac   :  { %vm4543_vm5 = vcmp.eq.s32.totalorder %v7861_v57, %v4531_v19  ;;  %vm4544_vm6 = vcmp.eq.s32.totalorder %v7864_v48, %v4531_v19  ;;  %v4573_v24 = vadd.f32 %v4572_v38, %v4557_v13  ;;  %vm4545_vm7 = vcmp.eq.s32.totalorder %v7869_v3, %v4531_v19 }
0x19ad   :  { %v4559_v28 = vsel %vm4543_vm5, %v7834_v55, 0.0  ;;  %v4560_v30 = vsel %vm4544_vm6, %v7836_v46, 0.0  ;;  %v4561_v55 = vsel %vm4545_vm7, %v7839_v6, 0.0  ;;  %vm4546_vm8 = vcmp.eq.s32.totalorder %v7878_v23, %v4531_v19 }
0x19ae   :  { %v4577_v43 = vadd.f32 %v4560_v30, %v4559_v28  ;;  %v4574_v41 = vadd.f32 %v4573_v24, %v4558_v26  ;;  %vm4699_vm5 = vcmp.gt.s32.totalorder %v7951_v61, 0  ;;  %vm4701_vm7 = vcmp.gt.s32.totalorder %v7941_v49, 0 }
0x19af   :  { %v4525_v34 = vpop.permute.xlu0 %4524 }
0x19b0   :  { %vm4535_vm13 = vcmp.eq.s32.totalorder %v7861_v57, %v4525_v34  ;;  %vm4536_vm14 = vcmp.eq.s32.totalorder %v7864_v48, %v4525_v34  ;;  %vm4537_vm15 = vcmp.eq.s32.totalorder %v7869_v3, %v4525_v34  ;;  %4575 = vadd.xlane.f32.xlu0 %v4574_v41  ;;  %vm4538_vm1 = vcmp.eq.s32.totalorder %v7878_v23, %v4525_v34 }
0x19b1   :  { %v4551_v53 = vsel %vm4535_vm13, %v7812_v60, 0.0  ;;  %v4552_v16 = vsel %vm4536_vm14, %v7814_v7, 0.0  ;;  %v4553_v32 = vsel %vm4537_vm15, %v7816_v8, 0.0  ;;  %v4578_v63 = vadd.f32 %v4577_v43, %v4561_v55 }
0x19b2   :  { %v4567_v46 = vadd.f32 %v4552_v16, %v4551_v53  ;;  %v4554_v42 = vsel %vm4538_vm1, %v7820_v18, 0.0  ;;  %v4625_v60 = vand.u32 65535, %v7900_v14  ;;  %v4562_v7 = vsel %vm4546_vm8, %v7844_v45, 0.0 }
0x19b3   :  { %v4579_v6 = vadd.f32 %v4578_v63, %v4562_v7  ;;  %v4645_v8 = vand.u32 65535, %v7915_v31  ;;  %v4685_v45 = vand.u32 65535, %v7972_v20  ;;  %vm4700_vm14 = vcmp.gt.s32.totalorder %v7935_v39, 0 }
0x19b4   :  { %v4568_v5 = vadd.f32 %v4567_v46, %v4553_v32  ;;  %4673 = vmin.xlane.f32.xlu0 %v4672_v37  ;;  %v4627_v4 = vcvt.s32.f32 %v4625_v60  ;;  %v4942_v53 = vsel %vm4699_vm5, 1.0, %v6005_v17  ;;  %v4944_v16 = vsel %vm4701_vm7, 1.0, %v6005_v17 }
0x19b5   :  { %v4647_v18 = vcvt.s32.f32 %v4645_v8  ;;  %v4687_v40 = vcvt.s32.f32 %v4685_v45  ;;  %v4943_v46 = vsel %vm4700_vm14, 1.0, %v6005_v17  ;;  %vm4702_vm1 = vcmp.gt.s32.totalorder %v7981_v25, 0 }
0x19b6   :  { %v4569_v54 = vadd.f32 %v4568_v5, %v4554_v42  ;;  %v4632_v27 = vsel %vm4631_vm9, %v4627_v4, inf  ;;  %vm4731_vm9 = vcmp.eq.s32.totalorder %v7861_v57, 0 }
0x19b7   :  { %v4652_v2 = vsel %vm4651_vm10, %v4647_v18, inf  ;;  %vm4751_vm10 = vcmp.eq.s32.totalorder %v7861_v57, 1 }
0x19b8   :  { %4570 = vadd.xlane.f32.xlu1 %v4569_v54  ;;  %4580 = vadd.xlane.f32.xlu0 %v4579_v6 }
0x19bc   :  { %4633 = vmin.xlane.f32.xlu1 %v4632_v27 }
0x19c0   :  { %4653 = vmin.xlane.f32.xlu1 %v4652_v2 }
0x19dc   :  { %v8048_v14 = vpop.xlane.xlu1 %4689  ;;  %v4495_v50 = vpop.xlane.xlu0 %4494 }
0x19dd   :  { %vm4691_vm11 = vcmp.eq.f32.partialorder %v7975_v47, %v8048_v14  ;;  %v4696_v4 = vcvt.f32.s32 %v8048_v14  ;;  %v4945_v14 = vsel %vm4702_vm1, 1.0, %v6005_v17 }
0x19de   :  { %v4692_v36 = vsel %vm4691_vm11, %v4687_v40, inf  ;;  %vm4771_vm11 = vcmp.eq.s32.totalorder %v7861_v57, 2 }
0x19df   :  { %4693 = vmin.xlane.f32.xlu1 %v4692_v36  ;;  %v4697_v40 = vshll.u32 %v4696_v4, 16 }
0x19e0   :  { %v4534_v15 = vpop.permute.xlu1 %4533 }
0x19e1   :  { %vm4547_vm12 = vcmp.eq.s32.totalorder %v7861_v57, %v4534_v15  ;;  %vm4548_vm2 = vcmp.eq.s32.totalorder %v7864_v48, %v4534_v15  ;;  %vm4549_vm3 = vcmp.eq.s32.totalorder %v7869_v3, %v4534_v15  ;;  %vm4550_vm4 = vcmp.eq.s32.totalorder %v7878_v23, %v4534_v15 }
0x19e2   :  { %v4563_v31 = vsel %vm4547_vm12, %v7846_v21, 0.0  ;;  %v4564_v51 = vsel %vm4548_vm2, %v7848_v33, 0.0  ;;  %v4565_v56 = vsel %vm4549_vm3, %v7851_v29, 0.0  ;;  %v4566_v47 = vsel %vm4550_vm4, %v7856_v52, 0.0 }
0x19e3   :  { %v4582_v20 = vadd.f32 %v4564_v51, %v4563_v31  ;;  %v4676_v21 = vcvt.f32.s32 %v8018_v22  ;;  %v4636_v23 = vcvt.f32.s32 %v8010_v9  ;;  %v4656_v29 = vcvt.f32.s32 %v8008_v1 }
0x19e5   :  { %v4583_v12 = vadd.f32 %v4582_v20, %v4565_v56  ;;  %v4677_v28 = vshll.u32 %v4676_v21, 16  ;;  %v4637_v52 = vshll.u32 %v4636_v23, 16  ;;  %v4657_v43 = vshll.u32 %v4656_v29, 16 }
0x19e7   :  { %v4584_v59 = vadd.f32 %v4583_v12, %v4566_v47 }
0x19e9   :  { %4585 = vadd.xlane.f32.xlu1 %v4584_v59 }
0x1a11   :  { %v4490_v44 = vpop.xlane.xlu1 %4489 }
0x1a12   :  { %5791 = vlog2.f32 %v4490_v44  ;;  %v4773_v44 = vsel %vm4732_vm0, %v4943_v46, 0.0 }
0x1a13   :  { %5793 = vlog2.f32 %v4495_v50  ;;  %v4772_v50 = vsel %vm4732_vm0, %v4942_v53, 0.0 }
0x1a15   :  { %v4500_v38 = vpop.xlane.xlu1 %4499 }
0x1a16   :  { %5795 = vlog2.f32 %v4500_v38 }
0x1a19   :  { %v4505_v3 = vpop.xlane.xlu1 %4504 }
0x1a1a   :  { %5797 = vlog2.f32 %v4505_v3 }
0x1a39   :  { %v8060_v48 = vpop.xlane.xlu0 %4575 }
0x1a3d   :  { %v4674_v19 = vpop.xlane.xlu0 %4673 }
0x1a3e   :  { %v4675_v13 = vcvt.f32.s32 %v4674_v19 }
0x1a40   :  { %v4678_v24 = vadd.s32 %v4677_v28, %v4675_v13 }
0x1a41   :  { %v4571_v33 = vpop.xlane.xlu1 %4570  ;;  %v4581_v51 = vpop.xlane.xlu0 %4580 }
0x1a42   :  { %vm4721_vm6 = vcmp.eq.s32.totalorder %v4678_v24, %v7941_v49 }
0x1a43   :  { %v4725_v41 = vsel %vm4721_vm6, 1.0, %v6005_v17 }
0x1a45   :  { %v4634_v30 = vpop.xlane.xlu1 %4633 }
0x1a46   :  { %v4635_v26 = vcvt.f32.s32 %v4634_v30 }
0x1a48   :  { %v4638_v11 = vadd.s32 %v4637_v52, %v4635_v26 }
0x1a49   :  { %v4654_v34 = vpop.xlane.xlu1 %4653 }
0x1a4a   :  { %vm4719_vm13 = vcmp.eq.s32.totalorder %v4638_v11, %v7951_v61  ;;  %v4655_v9 = vcvt.f32.s32 %v4654_v34  ;;  %v4729_v61 = vmul.f32 %v4944_v16, %v4725_v41  ;;  %v4777_v11 = vsel %vm4732_vm0, %v4945_v14, 0.0 }
0x1a4b   :  { %v4723_v22 = vsel %vm4719_vm13, 1.0, %v6005_v17 }
0x1a4c   :  { %v4658_v1 = vadd.s32 %v4657_v43, %v4655_v9  ;;  %v4727_v55 = vmul.f32 %v4942_v53, %v4723_v22  ;;  %v4755_v5 = vsel %vm4732_vm0, %v4729_v61, 0.0 }
0x1a4e   :  { %vm4720_vm15 = vcmp.eq.s32.totalorder %v4658_v1, %v7935_v39  ;;  %v4752_v32 = vsel %vm4732_vm0, %v4727_v55, 0.0  ;;  %v5792_v39 = vpop.eup %5791 }
0x1a4f   :  { %v4724_v49 = vsel %vm4720_vm15, 1.0, %v6005_v17  ;;  %v5794_v60 = vpop.eup %5793  ;;  %v4507_v7 = vmul.f32 0.6931472, %v5792_v39 }
0x1a50   :  { %v4728_v58 = vmul.f32 %v4943_v46, %v4724_v49  ;;  %v4509_v54 = vmul.f32 0.6931472, %v5794_v60  ;;  %v5796_v6 = vpop.eup %5795 }
0x1a51   :  { %v4514_v8 = vadd.f32 %v4507_v7, %v7866_v35  ;;  %v4511_v27 = vmul.f32 0.6931472, %v5796_v6  ;;  %v5798_v31 = vpop.eup %5797 }
0x1a52   :  { %v4753_v63 = vsel %vm4732_vm0, %v4728_v58, 0.0  ;;  %v4515_v18 = vadd.f32 %v4509_v54, %v7884_v10  ;;  %v4513_v35 = vmul.f32 0.6931472, %v5798_v31 }
0x1a53   :  { %v4754_v37 = vadd.f32 %v4753_v63, %v4752_v32  ;;  %v4711_v2 = vsub.f32 %v4514_v8, %v4571_v33  ;;  %v4516_v56 = vadd.f32 %v4511_v27, %v7898_v62 }
0x1a54   :  { %v4712_v36 = vsub.f32 %v4515_v18, %v8060_v48  ;;  %v4517_v19 = vadd.f32 %v4513_v35, %v7946_v0 }
0x1a55   :  { %v4756_v42 = vadd.f32 %v4755_v5, %v4754_v37  ;;  %v4715_v20 = vmul.f32 %v4942_v53, %v4711_v2  ;;  %v4713_v59 = vsub.f32 %v4516_v56, %v4581_v51 }
0x1a56   :  { %v4716_v47 = vmul.f32 %v4943_v46, %v4712_v36 }
0x1a57   :  { %v4733_v38 = vsel %vm4732_vm0, %v4715_v20, 0.0  ;;  %v4717_v62 = vmul.f32 %v4944_v16, %v4713_v59 }
0x1a58   :  { %v4734_v3 = vsel %vm4732_vm0, %v4716_v47, 0.0 }
0x1a59   :  { %v4735_v33 = vadd.f32 %v4734_v3, %v4733_v38  ;;  %v4736_v29 = vsel %vm4732_vm0, %v4717_v62, 0.0 }
0x1a5b   :  { %v4737_v52 = vadd.f32 %v4736_v29, %v4735_v33 }
0x1a68   :  { %v4694_v45 = vpop.xlane.xlu1 %4693 }
0x1a69   :  { %v4695_v15 = vcvt.f32.s32 %v4694_v45 }
0x1a6b   :  { %v4698_v12 = vadd.s32 %v4697_v40, %v4695_v15 }
0x1a6d   :  { %vm4722_vm8 = vcmp.eq.s32.totalorder %v4698_v12, %v7981_v25  ;;  %v4774_v25 = vadd.f32 %v4773_v44, %v4772_v50 }
0x1a6e   :  { %v4726_v10 = vsel %vm4722_vm8, 1.0, %v6005_v17  ;;  %v4775_v17 = vsel %vm4732_vm0, %v4944_v16, 0.0 }
0x1a6f   :  { %v4730_v48 = vmul.f32 %v4945_v14, %v4726_v10  ;;  %v4776_v24 = vadd.f32 %v4775_v17, %v4774_v25 }
0x1a71   :  { %v4757_v21 = vsel %vm4732_vm0, %v4730_v48, 0.0  ;;  %v4778_v43 = vadd.f32 %v4777_v11, %v4776_v24 }
0x1a72   :  { %v4586_v23 = vpop.xlane.xlu1 %4585  ;;  %v4758_v13 = vadd.f32 %v4757_v21, %v4756_v42 }
0x1a73   :  { %v4714_v28 = vsub.f32 %v4517_v19, %v4586_v23 }
0x1a74   :  { %4759 = vadd.xlane.f32.xlu1 %v4758_v13 }
0x1a75   :  { %v4718_v30 = vmul.f32 %v4945_v14, %v4714_v28 }
0x1a77   :  { %v4738_v26 = vsel %vm4732_vm0, %v4718_v30, 0.0 }
0x1a78   :  { %v4739_v0 = vadd.f32 %v4738_v26, %v4737_v52 }
0x1a7a   :  { %4740 = vadd.xlane.f32.xlu0 %v4739_v0 }
0x1a7e   :  { %4779 = vadd.xlane.f32.xlu0 %v4778_v43 }
0x1afd   :  { %v4760_v34 = vpop.xlane.xlu1 %4759 }
0x1afe   :  { %v4761_v9 = vrot.slane %v4760_v34, 4 }
0x1b00   :  { %v4762_v22 = vadd.f32 %v4761_v9, %v4760_v34 }
0x1b02   :  { %v4763_v1 = vrot.slane %v4762_v22, 2 }
0x1b03   :  { %v4741_v41 = vpop.xlane.xlu0 %4740 }
0x1b04   :  { %v4742_v53 = vrot.slane %v4741_v41, 4  ;;  %v4764_v55 = vadd.f32 %v4763_v1, %v4762_v22 }
0x1b06   :  { %v4743_v16 = vadd.f32 %v4742_v53, %v4741_v41  ;;  %v4765_v63 = vrot.slane %v4764_v55, 1 }
0x1b07   :  { %v4780_v46 = vpop.xlane.xlu0 %4779 }
0x1b08   :  { %v4744_v49 = vrot.slane %v4743_v16, 2  ;;  %v4781_v61 = vrot.slane %v4780_v46, 4  ;;  %v4766_v60 = vadd.f32 %v4765_v63, %v4764_v55 }
0x1b0a   :  { %v4782_v58 = vadd.f32 %v4781_v61, %v4780_v46  ;;  %v4745_v32 = vadd.f32 %v4744_v49, %v4743_v16 }
0x1b0c   :  { %v4783_v37 = vrot.slane %v4782_v58, 2  ;;  %v4746_v5 = vrot.slane %v4745_v32, 1 }
0x1b0e   :  { %v4784_v42 = vadd.f32 %v4783_v37, %v4782_v58  ;;  %v4747_v39 = vadd.f32 %v4746_v5, %v4745_v32 }
0x1b10   :  { %5408 = vpush %v4747_v39  ;;  %v4785_v7 = vrot.slane %v4784_v42, 1 }
0x1b11   :  { %5410 = vpush %v4766_v60 }
0x1b12   :  { %v4786_v54 = vadd.f32 %v4785_v7, %v4784_v42 }
0x1b14   :  { %5412 = vpush %v4786_v54 }
0x1b41   :  { %s5409_s5 = spop %5408 }
0x1b42   :  { %v4749_v6 = vstv %s5409_s5  ;;  %s5411_s7 = spop %5410 }
0x1b43   :  { %v4750_v4 = vsel %vm4731_vm9, %v4749_v6, 0.0  ;;  %v4768_v8 = vstv %s5411_s7 }
0x1b44   :  { %v4769_v27 = vsel %vm4751_vm10, %v4768_v8, 0.0 }
0x1b45   :  { %s5413_s28 = spop %5412  ;;  %v4770_v18 = vadd.f32 %v4769_v27, %v4750_v4 }
0x1b46   :  { %v4788_v2 = vstv %s5413_s28 }
0x1b47   :  { %v4789_v45 = vsel %vm4771_vm11, %v4788_v2, 0.0 }
0x1b48   :  { %v4790_v40 = vadd.f32 %v4789_v45, %v4770_v18 }
0x1b4a   :  { %4791 = vst [vmem:[%s8129_s24] sm:$0x1] %v4790_v40 }
0x1b4b   :  { %4800 = vsyncpa [#allocation3], 1 }
0x1b4c   :  { %4801 = vsyncpa [#allocation5], 1 }
0x1b4d   :  { %4802 = vsyncpa [#allocation8], 1 }
0x1b4e   :  { %4803 = vsyncpa [#allocation11], 1 }
0x1b4f   :  { %4804 = vsyncpa [#allocation14], 1 }

</bundles_post_ra>
